<compile_context>
chip_gen: v6e
topology: v6e:2x2x1
jax: 0.10.0
libtpu: 0.0.40
codegen_flags: <defaults>
</compile_context>

<pallas_src>
import jax
import jax.numpy as jnp
import numpy as np
from jax.experimental import pallas as pl
from jax.experimental.pallas import tpu as pltpu

BN_EPS = 1e-5
LN_EPS = 1e-5
OUT_LANES = 128     # lane-dense output slab width
SLAB_LANES = 128    # lane-dense parameter slab width


def _layer_norm(x, gamma, beta):
    """Per-sample LayerNorm: x is (Bblk, R, C); normalize over (R, C) of each sample."""
    mu = jnp.mean(jnp.mean(x, axis=2, keepdims=True), axis=1, keepdims=True)
    d = x - mu
    var = jnp.mean(jnp.mean(d * d, axis=2, keepdims=True), axis=1, keepdims=True)
    return d * jax.lax.rsqrt(var + LN_EPS) * gamma[None] + beta[None]


def make_aggregator_kernel(slots, *, bblk, T, Tp, Cv, Cp, HW):
    """Build the kernel body, closing over the static parameter-slab layout."""
    BT = bblk * T
    inv_cv = 1.0 / Cv
    inv_cp = 1.0 / Cp
    inv_hw = 1.0 / HW

    def kernel(video_ref, pose_ref, prm_ref, out_ref):
        def prm(name):
            row, (r, c) = slots[name]
            return prm_ref[row:row + r, 0:c]

        video = video_ref[...]                               # (Bblk*T,  Cv, HW)
        pose = pose_ref[...]                                 # (Bblk*Tp, Cp, HW)

        # ---- squeeze: spatial mean + co_squeeze 1x1 conv (BN folded) + ReLU -----------
        vmean = jnp.mean(video, axis=-1)                     # (BT, Cv)
        pmean = jnp.mean(pose, axis=-1)                      # (BT, Cp)  (Tp == T)
        co = (jnp.dot(vmean, prm('w_sqv'), preferred_element_type=jnp.float32)
              + jnp.dot(pmean, prm('w_sqp'), preferred_element_type=jnp.float32)
              + prm('b_sq'))
        co = jnp.maximum(co, 0.0)                            # (BT, Ca)

        # ---- excitation 1x1 convs + per-sample LayerNorm + sigmoid --------------------
        vex = (jnp.dot(co, prm('w_vex'), preferred_element_type=jnp.float32)
               + prm('b_vex')).reshape(bblk, T, Cv)
        pex = (jnp.dot(co, prm('w_pex'), preferred_element_type=jnp.float32)
               + prm('b_pex')).reshape(bblk, Tp, Cp)
        vscale3 = jax.nn.sigmoid(_layer_norm(vex, prm('vn_g'), prm('vn_b')))   # (Bblk,T,Cv)
        pscale3 = jax.nn.sigmoid(_layer_norm(pex, prm('pn_g'), prm('pn_b')))   # (Bblk,Tp,Cp)

        # ---- channel-mean of the *scaled* streams via MXU matvecs (linearity) ---------
        vfp3 = (jnp.einsum('fqc,fcs->fqs', vscale3.reshape(BT, 1, Cv), video,
                           preferred_element_type=jnp.float32)
                .reshape(bblk, T, HW)) * inv_cv              # (Bblk, T,  HW)
        pfp3 = (jnp.einsum('fqc,fcs->fqs', pscale3.reshape(BT, 1, Cp), pose,
                           preferred_element_type=jnp.float32)
                .reshape(bblk, Tp, HW)) * inv_cp             # (Bblk, Tp, HW)

        # ---- temporal cross-talk: stacked [conv ; gate] weights, one matmul per stream
        w_v2ps = jnp.broadcast_to(prm('w_v2ps'), (bblk, 2 * Tp, T))
        sv = (jnp.einsum('bqt,bts->bqs', w_v2ps, vfp3, preferred_element_type=jnp.float32)
              + prm('b_v2ps')[None])                         # (Bblk, 2*Tp, HW)
        v2p = _layer_norm(jnp.maximum(sv[:, 0:Tp, :], 0.0), prm('v2pn_g'), prm('v2pn_b'))
        v2pg = jax.nn.sigmoid(sv[:, Tp:2 * Tp, :])           # (Bblk, Tp, HW)

        w_p2vs = jnp.broadcast_to(prm('w_p2vs'), (bblk, 2 * T, Tp))
        sp = (jnp.einsum('bqt,bts->bqs', w_p2vs, pfp3, preferred_element_type=jnp.float32)
              + prm('b_p2vs')[None])                         # (Bblk, 2*T, HW)
        p2v = _layer_norm(jnp.maximum(sp[:, 0:T, :], 0.0), prm('p2vn_g'), prm('p2vn_b'))
        p2vg = jax.nn.sigmoid(sp[:, T:2 * T, :])             # (Bblk, T, HW)

        # ---- cross-gated blend + final spatial mean, via linearity --------------------
        vdot3 = (jnp.einsum('fqs,fcs->fqc', p2vg.reshape(BT, 1, HW), video,
                            preferred_element_type=jnp.float32)
                 .reshape(bblk, T, Cv)) * inv_hw             # (Bblk, T,  Cv)
        pdot3 = (jnp.einsum('fqs,fcs->fqc', v2pg.reshape(BT, 1, HW), pose,
                            preferred_element_type=jnp.float32)
                 .reshape(bblk, Tp, Cp)) * inv_hw            # (Bblk, Tp, Cp)
        const_v = jnp.mean(p2v * (1.0 - p2vg), axis=-1, keepdims=True)   # (Bblk, T,  1)
        const_p = jnp.mean(v2p * (1.0 - v2pg), axis=-1, keepdims=True)   # (Bblk, Tp, 1)
        vfeat = vscale3 * vdot3 + const_v                    # (Bblk, T,  Cv)
        pfeat = pscale3 * pdot3 + const_p                    # (Bblk, Tp, Cp)

        # ---- packed, lane-dense output slab --------------------------------------------
        out_ref[...] = jnp.zeros(out_ref.shape, out_ref.dtype)
        out_ref[:, 0:T, 0:HW] = p2vg                         # gate applied to video stream
        out_ref[:, T:T + Tp, 0:HW] = v2pg                    # gate applied to pose stream
        out_ref[:, T + Tp:T + Tp + T, 0:Cv] = vfeat
        out_ref[:, T + Tp:T + Tp + T, Cv:Cv + Cp] = pfeat

    return kernel


def _pick_bblk(batch):
    """Largest divisor of batch keeping >= 2 grid steps (v7x megacore) and <= 16 samples/step."""
    target = min(16, max(1, batch // 2))
    for cand in range(target, 0, -1):
        if batch % cand == 0:
            return cand
    return 1


def aggregator_pallas(video_in, pose_in, slab, slots, *, T, Tp, bblk=None):
    """video_in: (B*T, Cv, HW); pose_in: (B*Tp, Cp, HW); slab/slots from prepare_kernel_params.

    Returns a packed, lane-dense (B, 3*T, 128) f32 slab:
      rows [0, T)           cols [0, HW)      -> p2v gate (applied to the video stream)
      rows [T, T+Tp)        cols [0, HW)      -> v2p gate (applied to the pose stream)
      rows [T+Tp, T+Tp+T)   cols [0, Cv+Cp)   -> per-frame pooled [video | pose] features
    """
    BTtot, Cv, HW = video_in.shape
    BTptot, Cp, HWp = pose_in.shape
    assert T == Tp, "Aggregator_f kernel requires pose_frame_factor == 1 (T == Tp)"
    assert HW == HWp and BTtot % T == 0 and BTptot % Tp == 0
    B = BTtot // T
    assert B == BTptot // Tp
    assert HW <= OUT_LANES and Cv + Cp <= OUT_LANES
    if bblk is None:
        bblk = _pick_bblk(B)
    assert B % bblk == 0

    r_out = 2 * T + T
    kernel = make_aggregator_kernel(slots, bblk=bblk, T=T, Tp=Tp, Cv=Cv, Cp=Cp, HW=HW)
    grid_spec = pltpu.PrefetchScalarGridSpec(
        num_scalar_prefetch=0,
        grid=(B // bblk,),
        in_specs=[
            pl.BlockSpec((bblk * T, Cv, HW), lambda n: (n, 0, 0)),
            pl.BlockSpec((bblk * Tp, Cp, HW), lambda n: (n, 0, 0)),
            pl.BlockSpec(slab.shape, lambda n: (0, 0)),   # replicated param slab (re-copy skipped)
        ],
        out_specs=pl.BlockSpec((bblk, r_out, OUT_LANES), lambda n: (n, 0, 0)),
    )
    return pl.pallas_call(
        kernel,
        out_shape=jax.ShapeDtypeStruct((B, r_out, OUT_LANES), jnp.float32),
        grid_spec=grid_spec,
        compiler_params=pltpu.CompilerParams(dimension_semantics=("parallel",)),
    )(video_in, pose_in, slab)


def fold_bn(gamma, beta, mean, var):
    s = gamma / jnp.sqrt(var + BN_EPS)
    return s, beta - mean * s


def prepare_kernel_params(P, T, Tp, Cv, Cp, Ca, HW):
    """Fold eval-mode BatchNorms into the 1x1 convs, stack shared-operand temporal weights,
    and pack every tiny parameter into ONE lane-dense (rows, 128) slab (8-row aligned)."""
    sq_s, sq_t = fold_bn(P['sq_bn_g'], P['sq_bn_b'], P['sq_bn_m'], P['sq_bn_v'])
    w_sq = P['sq_w'] * sq_s[:, None]                 # (Ca, Cv+Cp), BN folded
    b_sq = P['sq_b'] * sq_s + sq_t
    v2p_s, v2p_t = fold_bn(P['v2p_bn_g'], P['v2p_bn_b'], P['v2p_bn_m'], P['v2p_bn_v'])
    p2v_s, p2v_t = fold_bn(P['p2v_bn_g'], P['p2v_bn_b'], P['p2v_bn_m'], P['p2v_bn_v'])

    params = {
        'w_sqv': jnp.transpose(w_sq[:, :Cv]),        # (Cv, Ca)
        'w_sqp': jnp.transpose(w_sq[:, Cv:]),        # (Cp, Ca)
        'b_sq': b_sq.reshape(1, Ca),
        'w_vex': jnp.transpose(P['vex_w']),          # (Ca, Cv)
        'b_vex': P['vex_b'].reshape(1, Cv),
        'w_pex': jnp.transpose(P['pex_w']),          # (Ca, Cp)
        'b_pex': P['pex_b'].reshape(1, Cp),
        'vn_g': jnp.transpose(P['vn_w'][:, :, 0]),   # (T, Cv)
        'vn_b': jnp.transpose(P['vn_b'][:, :, 0]),
        'pn_g': jnp.transpose(P['pn_w'][:, :, 0]),   # (Tp, Cp)
        'pn_b': jnp.transpose(P['pn_b'][:, :, 0]),
        # [video_2_pose (BN folded) ; v2p_gate] stacked along the output-frame dim
        'w_v2ps': jnp.concatenate([P['v2p_w'] * v2p_s[:, None], P['v2pg_w']], axis=0),
        'b_v2ps': jnp.concatenate([P['v2p_b'] * v2p_s + v2p_t, P['v2pg_b']]).reshape(2 * Tp, 1),
        'v2pn_g': P['v2pn_w'].reshape(Tp, HW),
        'v2pn_b': P['v2pn_b'].reshape(Tp, HW),
        # [pose_2_video (BN folded) ; p2v_gate]
        'w_p2vs': jnp.concatenate([P['p2v_w'] * p2v_s[:, None], P['p2vg_w']], axis=0),
        'b_p2vs': jnp.concatenate([P['p2v_b'] * p2v_s + p2v_t, P['p2vg_b']]).reshape(2 * T, 1),
        'p2vn_g': P['p2vn_w'].reshape(T, HW),
        'p2vn_b': P['p2vn_b'].reshape(T, HW),
    }

    slots, row = {}, 0
    for name, arr in params.items():
        assert arr.ndim == 2 and arr.shape[1] <= SLAB_LANES
        slots[name] = (row, tuple(arr.shape))
        row += ((arr.shape[0] + 7) // 8) * 8         # keep every window 8-row aligned
    slab = jnp.zeros((max(row, 8), SLAB_LANES), jnp.float32)
    for name, arr in params.items():
        r0 = slots[name][0]
        slab = slab.at[r0:r0 + arr.shape[0], 0:arr.shape[1]].set(arr.astype(jnp.float32))
    return slab, slots


def reference_forward(video_feat, pose_feat, P, batch, T, Tp, H, W):
    """Pure-JAX mirror of Aggregator_f.forward (eval-mode BN, pose_frame_factor == 1)."""
    Cv = video_feat.shape[1]
    Cp = pose_feat.shape[1]
    v = video_feat.reshape(batch, T, Cv, H, W).transpose(0, 2, 1, 3, 4)    # (B,Cv,T,H,W)
    p = pose_feat.reshape(batch, Tp, Cp, H, W).transpose(0, 2, 1, 3, 4)    # (B,Cp,Tp,H,W)

    def conv1x1(x, w, b):                       # x: (B, Cin, A, B'); w: (Cout, Cin)
        return jnp.einsum('oc,bcij->boij', w, x,
                          precision=jax.lax.Precision.HIGHEST) + b[None, :, None, None]

    def bn(x, gamma, beta, mean, var):          # eval-mode BN over channel dim 1
        s = gamma / jnp.sqrt(var + BN_EPS)
        t = beta - mean * s
        return x * s[None, :, None, None] + t[None, :, None, None]

    def ln(x, w, b):                            # LayerNorm over the last w.ndim dims
        axes = tuple(range(x.ndim - w.ndim, x.ndim))
        mu = jnp.mean(x, axis=axes, keepdims=True)
        var = jnp.mean((x - mu) ** 2, axis=axes, keepdims=True)
        return (x - mu) * jax.lax.rsqrt(var + LN_EPS) * w + b

    v_ = jnp.mean(v, axis=(3, 4))[:, :, :, None]        # (B, Cv, T, 1)
    p_ = jnp.mean(p, axis=(3, 4))[:, :, :, None]        # (B, Cp, Tp, 1)
    co = jnp.concatenate([v_, p_], axis=1)               # (B, Cv+Cp, T, 1)
    co = jnp.maximum(bn(conv1x1(co, P['sq_w'], P['sq_b']),
                        P['sq_bn_g'], P['sq_bn_b'], P['sq_bn_m'], P['sq_bn_v']), 0.0)

    vscale = jax.nn.sigmoid(ln(conv1x1(co, P['vex_w'], P['vex_b']),
                               P['vn_w'], P['vn_b']))[:, :, :, :, None]
    pscale = jax.nn.sigmoid(ln(conv1x1(co, P['pex_w'], P['pex_b']),
                               P['pn_w'], P['pn_b']))[:, :, :, :, None]
    v = v * vscale
    p = p * pscale

    vfp = jnp.mean(v, axis=1)                   # (B, T, H, W)
    pfp = jnp.mean(p, axis=1)                   # (B, Tp, H, W)

    v2p = jnp.maximum(bn(conv1x1(vfp, P['v2p_w'], P['v2p_b']),
                         P['v2p_bn_g'], P['v2p_bn_b'], P['v2p_bn_m'], P['v2p_bn_v']), 0.0)
    v2p = ln(v2p, P['v2pn_w'], P['v2pn_b'])[:, None]                       # (B,1,Tp,H,W)
    v2pg = jax.nn.sigmoid(conv1x1(vfp, P['v2pg_w'], P['v2pg_b']))[:, None]

    p2v = jnp.maximum(bn(conv1x1(pfp, P['p2v_w'], P['p2v_b']),
                         P['p2v_bn_g'], P['p2v_bn_b'], P['p2v_bn_m'], P['p2v_bn_v']), 0.0)
    p2v = ln(p2v, P['p2vn_w'], P['p2vn_b'])[:, None]                       # (B,1,T,H,W)
    p2vg = jax.nn.sigmoid(conv1x1(pfp, P['p2vg_w'], P['p2vg_b']))[:, None]

    v = v * p2vg + p2v * (1.0 - p2vg)
    v = v.transpose(0, 2, 1, 3, 4).reshape(-1, Cv, H, W)
    p = p * v2pg + v2p * (1.0 - v2pg)
    p = p.transpose(0, 2, 1, 3, 4).reshape(-1, Cp, H, W)
    v = jnp.mean(v, axis=(2, 3))[:, :, None, None]
    p = jnp.mean(p, axis=(2, 3))[:, :, None, None]
    feat = jnp.concatenate([v, p], axis=1)
    return feat, v2pg, p2vg


if __name__ == "__main__":
    # Small config consistent with Aggregator_f:
    #   cfg.frame_per_seg=4, cfg.pose_frame_factor=1 -> pose_frame_num=4 (temporal conv skipped)
    #   img_resnet_dim = pose_resnet_dim = agg_feat_dim = 32 (required by the LayerNorm shapes)
    #   spatial 7x7 (fixed by v2p_norm / p2v_norm normalized_shape).
    # batch=4 so the kernel runs with Bblk=2 samples per grid step and grid=(2,) ("parallel").
    batch = 4
    T = 4                                   # cfg.frame_per_seg
    pose_frame_factor = 1
    Tp = (T - 1) * pose_frame_factor + 1    # pose_frame_num
    Cv = Cp = Ca = 32
    H = W = 7
    HW = H * W

    keys = iter(jax.random.split(jax.random.PRNGKey(0), 64))

    def nrm(shape, scale=0.1):
        return jax.random.normal(next(keys), shape, jnp.float32) * scale

    def unif(shape, lo, hi):
        return jax.random.uniform(next(keys), shape, jnp.float32, lo, hi)

    # Forward inputs (PyTorch convention: (batch*frames, C, H, W)).
    video_feat = jax.random.normal(next(keys), (batch * T, Cv, H, W), jnp.float32)
    pose_feat = jax.random.normal(next(keys), (batch * Tp, Cp, H, W), jnp.float32)

    # Synthetic module parameters (PyTorch conventions; 1x1 conv weights as (out, in)).
    P = dict(
        sq_w=nrm((Ca, Cv + Cp)), sq_b=nrm((Ca,)),
        sq_bn_g=1.0 + nrm((Ca,)), sq_bn_b=nrm((Ca,)), sq_bn_m=nrm((Ca,)),
        sq_bn_v=unif((Ca,), 0.5, 1.5),
        vex_w=nrm((Cv, Ca)), vex_b=nrm((Cv,)),
        pex_w=nrm((Cp, Ca)), pex_b=nrm((Cp,)),
        vn_w=1.0 + nrm((Ca, T, 1)), vn_b=nrm((Ca, T, 1)),
        pn_w=1.0 + nrm((Ca, Tp, 1)), pn_b=nrm((Ca, Tp, 1)),
        v2p_w=nrm((Tp, T)), v2p_b=nrm((Tp,)),
        v2p_bn_g=1.0 + nrm((Tp,)), v2p_bn_b=nrm((Tp,)), v2p_bn_m=nrm((Tp,)),
        v2p_bn_v=unif((Tp,), 0.5, 1.5),
        v2pn_w=1.0 + nrm((Tp, H, W)), v2pn_b=nrm((Tp, H, W)),
        v2pg_w=nrm((Tp, T)), v2pg_b=nrm((Tp,)),
        p2v_w=nrm((T, Tp)), p2v_b=nrm((T,)),
        p2v_bn_g=1.0 + nrm((T,)), p2v_bn_b=nrm((T,)), p2v_bn_m=nrm((T,)),
        p2v_bn_v=unif((T,), 0.5, 1.5),
        p2vn_w=1.0 + nrm((T, H, W)), p2vn_b=nrm((T, H, W)),
        p2vg_w=nrm((T, Tp)), p2vg_b=nrm((T,)),
    )

    # ---- glue: the kernel consumes the native per-frame (C, H*W) layout (no transpose) ----
    video_in = video_feat.reshape(batch * T, Cv, HW)
    pose_in = pose_feat.reshape(batch * Tp, Cp, HW)
    slab, slots = prepare_kernel_params(P, T, Tp, Cv, Cp, Ca, HW)

    packed = aggregator_pallas(video_in, pose_in, slab, slots, T=T, Tp=Tp)
    packed = jax.block_until_ready(packed)

    # Unpack the lane-dense output slab back to PyTorch output conventions.
    p2vg_out = packed[:, 0:T, :HW].reshape(batch, 1, T, H, W)
    v2pg_out = packed[:, T:T + Tp, :HW].reshape(batch, 1, Tp, H, W)
    feat = packed[:, T + Tp:T + Tp + T, :Cv + Cp].reshape(batch * T, Cv + Cp)[:, :, None, None]

    # ---- correctness check vs. pure-JAX reference ----
    feat_r, v2pg_r, p2vg_r = reference_forward(video_feat, pose_feat, P, batch, T, Tp, H, W)
    np.testing.assert_allclose(np.asarray(feat), np.asarray(feat_r), rtol=2e-4, atol=2e-4)
    np.testing.assert_allclose(np.asarray(v2pg_out), np.asarray(v2pg_r), rtol=2e-4, atol=2e-4)
    np.testing.assert_allclose(np.asarray(p2vg_out), np.asarray(p2vg_r), rtol=2e-4, atol=2e-4)

    print("KERNEL_OK")
</pallas_src>

<mosaic_0001>
module attributes {stable_mosaic.version = 11 : i64} {
  func.func @kernel(%arg0: i32, %arg1: memref<8x32x49xf32, #tpu.memory_space<vmem>>, %arg2: memref<8x32x49xf32, #tpu.memory_space<vmem>>, %arg3: memref<248x128xf32, #tpu.memory_space<vmem>>, %arg4: memref<2x12x128xf32, #tpu.memory_space<vmem>>) attributes {dimension_semantics = [#tpu.dimension_semantics<parallel>], iteration_bounds = array<i64: 2>, scalar_prefetch = 0 : i64, scratch_operands = 0 : i64, tpu.core_type = #tpu.core_type<tc>, window_params = [{transform_indices = @transform_0, window_bounds = array<i64: 8, 32, 49>}, {transform_indices = @transform_1, window_bounds = array<i64: 8, 32, 49>}, {pipeline_mode = #tpu.pipeline_mode<synchronous>, transform_indices = @transform_2, window_bounds = array<i64: 248, 128>}, {transform_indices = @transform_3, window_bounds = array<i64: 2, 12, 128>}]} {
    %c0 = arith.constant 0 : index
    %c0_0 = arith.constant 0 : index
    %c0_1 = arith.constant 0 : index
    %0 = vector.load %arg1[%c0, %c0_0, %c0_1] : memref<8x32x49xf32, #tpu.memory_space<vmem>>, vector<8x32x49xf32>
    %c0_2 = arith.constant 0 : index
    %c0_3 = arith.constant 0 : index
    %c0_4 = arith.constant 0 : index
    %1 = vector.load %arg2[%c0_2, %c0_3, %c0_4] : memref<8x32x49xf32, #tpu.memory_space<vmem>>, vector<8x32x49xf32>
    %cst = arith.constant dense<0.000000e+00> : vector<8x32xf32>
    %2 = vector.multi_reduction <add>, %0, %cst [2] : vector<8x32x49xf32> to vector<8x32xf32>
    %cst_5 = arith.constant 4.900000e+01 : f32
    %3 = vector.broadcast %cst_5 : f32 to vector<8x32xf32>
    %4 = arith.divf %2, %3 : vector<8x32xf32>
    %cst_6 = arith.constant dense<0.000000e+00> : vector<8x32xf32>
    %5 = vector.multi_reduction <add>, %1, %cst_6 [2] : vector<8x32x49xf32> to vector<8x32xf32>
    %cst_7 = arith.constant 4.900000e+01 : f32
    %6 = vector.broadcast %cst_7 : f32 to vector<8x32xf32>
    %7 = arith.divf %5, %6 : vector<8x32xf32>
    %c0_8 = arith.constant 0 : index
    %c0_9 = arith.constant 0 : index
    %8 = vector.load %arg3[%c0_8, %c0_9] : memref<248x128xf32, #tpu.memory_space<vmem>>, vector<32x32xf32>
    %cst_10 = arith.constant dense<0.000000e+00> : vector<8x32xf32>
    %9 = tpu.matmul %4, %8, %cst_10 {dimension_numbers = #tpu.dot_dimension_numbers<[1], [0], [0], [1], [0, 0, 1, 1], [], []>} : vector<8x32xf32>, vector<32x32xf32>, vector<8x32xf32> -> vector<8x32xf32>
    %c32 = arith.constant 32 : index
    %c0_11 = arith.constant 0 : index
    %10 = vector.load %arg3[%c32, %c0_11] : memref<248x128xf32, #tpu.memory_space<vmem>>, vector<32x32xf32>
    %cst_12 = arith.constant dense<0.000000e+00> : vector<8x32xf32>
    %11 = tpu.matmul %7, %10, %cst_12 {dimension_numbers = #tpu.dot_dimension_numbers<[1], [0], [0], [1], [0, 0, 1, 1], [], []>} : vector<8x32xf32>, vector<32x32xf32>, vector<8x32xf32> -> vector<8x32xf32>
    %12 = arith.addf %9, %11 : vector<8x32xf32>
    %c64 = arith.constant 64 : index
    %c0_13 = arith.constant 0 : index
    %13 = vector.load %arg3[%c64, %c0_13] : memref<248x128xf32, #tpu.memory_space<vmem>>, vector<1x32xf32>
    %14 = vector.broadcast %13 : vector<1x32xf32> to vector<8x32xf32>
    %15 = arith.addf %12, %14 : vector<8x32xf32>
    %cst_14 = arith.constant 0.000000e+00 : f32
    %16 = vector.broadcast %cst_14 : f32 to vector<8x32xf32>
    %17 = arith.maximumf %15, %16 : vector<8x32xf32>
    %c72 = arith.constant 72 : index
    %c0_15 = arith.constant 0 : index
    %18 = vector.load %arg3[%c72, %c0_15] : memref<248x128xf32, #tpu.memory_space<vmem>>, vector<32x32xf32>
    %cst_16 = arith.constant dense<0.000000e+00> : vector<8x32xf32>
    %19 = tpu.matmul %17, %18, %cst_16 {dimension_numbers = #tpu.dot_dimension_numbers<[1], [0], [0], [1], [0, 0, 1, 1], [], []>} : vector<8x32xf32>, vector<32x32xf32>, vector<8x32xf32> -> vector<8x32xf32>
    %c104 = arith.constant 104 : index
    %c0_17 = arith.constant 0 : index
    %20 = vector.load %arg3[%c104, %c0_17] : memref<248x128xf32, #tpu.memory_space<vmem>>, vector<1x32xf32>
    %21 = vector.broadcast %20 : vector<1x32xf32> to vector<8x32xf32>
    %22 = arith.addf %19, %21 : vector<8x32xf32>
    %23 = vector.shape_cast %22 : vector<8x32xf32> to vector<2x4x32xf32>
    %c112 = arith.constant 112 : index
    %c0_18 = arith.constant 0 : index
    %24 = vector.load %arg3[%c112, %c0_18] : memref<248x128xf32, #tpu.memory_space<vmem>>, vector<32x32xf32>
    %cst_19 = arith.constant dense<0.000000e+00> : vector<8x32xf32>
    %25 = tpu.matmul %17, %24, %cst_19 {dimension_numbers = #tpu.dot_dimension_numbers<[1], [0], [0], [1], [0, 0, 1, 1], [], []>} : vector<8x32xf32>, vector<32x32xf32>, vector<8x32xf32> -> vector<8x32xf32>
    %c144 = arith.constant 144 : index
    %c0_20 = arith.constant 0 : index
    %26 = vector.load %arg3[%c144, %c0_20] : memref<248x128xf32, #tpu.memory_space<vmem>>, vector<1x32xf32>
    %27 = vector.broadcast %26 : vector<1x32xf32> to vector<8x32xf32>
    %28 = arith.addf %25, %27 : vector<8x32xf32>
    %29 = vector.shape_cast %28 : vector<8x32xf32> to vector<2x4x32xf32>
    %c152 = arith.constant 152 : index
    %c0_21 = arith.constant 0 : index
    %30 = vector.load %arg3[%c152, %c0_21] : memref<248x128xf32, #tpu.memory_space<vmem>>, vector<4x32xf32>
    %c160 = arith.constant 160 : index
    %c0_22 = arith.constant 0 : index
    %31 = vector.load %arg3[%c160, %c0_22] : memref<248x128xf32, #tpu.memory_space<vmem>>, vector<4x32xf32>
    %cst_23 = arith.constant dense<0.000000e+00> : vector<2x4xf32>
    %32 = vector.multi_reduction <add>, %23, %cst_23 [2] : vector<2x4x32xf32> to vector<2x4xf32>
    %33 = vector.shape_cast %32 : vector<2x4xf32> to vector<2x4x1xf32>
    %cst_24 = arith.constant 3.200000e+01 : f32
    %34 = vector.broadcast %cst_24 : f32 to vector<2x4x1xf32>
    %35 = arith.divf %33, %34 : vector<2x4x1xf32>
    %cst_25 = arith.constant dense<0.000000e+00> : vector<2x1xf32>
    %36 = vector.multi_reduction <add>, %35, %cst_25 [1] : vector<2x4x1xf32> to vector<2x1xf32>
    %37 = vector.shape_cast %36 : vector<2x1xf32> to vector<2x1x1xf32>
    %cst_26 = arith.constant 4.000000e+00 : f32
    %38 = vector.broadcast %cst_26 : f32 to vector<2x1x1xf32>
    %39 = arith.divf %37, %38 : vector<2x1x1xf32>
    %40 = vector.broadcast %39 : vector<2x1x1xf32> to vector<2x4x32xf32>
    %41 = arith.subf %23, %40 : vector<2x4x32xf32>
    %42 = arith.mulf %41, %41 : vector<2x4x32xf32>
    %cst_27 = arith.constant dense<0.000000e+00> : vector<2x4xf32>
    %43 = vector.multi_reduction <add>, %42, %cst_27 [2] : vector<2x4x32xf32> to vector<2x4xf32>
    %44 = vector.shape_cast %43 : vector<2x4xf32> to vector<2x4x1xf32>
    %cst_28 = arith.constant 3.200000e+01 : f32
    %45 = vector.broadcast %cst_28 : f32 to vector<2x4x1xf32>
    %46 = arith.divf %44, %45 : vector<2x4x1xf32>
    %cst_29 = arith.constant dense<0.000000e+00> : vector<2x1xf32>
    %47 = vector.multi_reduction <add>, %46, %cst_29 [1] : vector<2x4x1xf32> to vector<2x1xf32>
    %48 = vector.shape_cast %47 : vector<2x1xf32> to vector<2x1x1xf32>
    %cst_30 = arith.constant 4.000000e+00 : f32
    %49 = vector.broadcast %cst_30 : f32 to vector<2x1x1xf32>
    %50 = arith.divf %48, %49 : vector<2x1x1xf32>
    %cst_31 = arith.constant 9.99999974E-6 : f32
    %51 = vector.broadcast %cst_31 : f32 to vector<2x1x1xf32>
    %52 = arith.addf %50, %51 : vector<2x1x1xf32>
    %53 = math.rsqrt %52 : vector<2x1x1xf32>
    %54 = vector.broadcast %53 : vector<2x1x1xf32> to vector<2x4x32xf32>
    %55 = arith.mulf %41, %54 : vector<2x4x32xf32>
    %56 = vector.shape_cast %30 : vector<4x32xf32> to vector<1x4x32xf32>
    %57 = vector.broadcast %56 : vector<1x4x32xf32> to vector<2x4x32xf32>
    %58 = arith.mulf %55, %57 : vector<2x4x32xf32>
    %59 = vector.shape_cast %31 : vector<4x32xf32> to vector<1x4x32xf32>
    %60 = vector.broadcast %59 : vector<1x4x32xf32> to vector<2x4x32xf32>
    %61 = arith.addf %58, %60 : vector<2x4x32xf32>
    %62 = arith.negf %61 : vector<2x4x32xf32>
    %63 = math.exp %62 : vector<2x4x32xf32>
    %cst_32 = arith.constant 1.000000e+00 : f32
    %64 = vector.broadcast %cst_32 : f32 to vector<2x4x32xf32>
    %65 = arith.addf %64, %63 : vector<2x4x32xf32>
    %66 = arith.divf %64, %65 : vector<2x4x32xf32>
    %c168 = arith.constant 168 : index
    %c0_33 = arith.constant 0 : index
    %67 = vector.load %arg3[%c168, %c0_33] : memref<248x128xf32, #tpu.memory_space<vmem>>, vector<4x32xf32>
    %c176 = arith.constant 176 : index
    %c0_34 = arith.constant 0 : index
    %68 = vector.load %arg3[%c176, %c0_34] : memref<248x128xf32, #tpu.memory_space<vmem>>, vector<4x32xf32>
    %cst_35 = arith.constant dense<0.000000e+00> : vector<2x4xf32>
    %69 = vector.multi_reduction <add>, %29, %cst_35 [2] : vector<2x4x32xf32> to vector<2x4xf32>
    %70 = vector.shape_cast %69 : vector<2x4xf32> to vector<2x4x1xf32>
    %cst_36 = arith.constant 3.200000e+01 : f32
    %71 = vector.broadcast %cst_36 : f32 to vector<2x4x1xf32>
    %72 = arith.divf %70, %71 : vector<2x4x1xf32>
    %cst_37 = arith.constant dense<0.000000e+00> : vector<2x1xf32>
    %73 = vector.multi_reduction <add>, %72, %cst_37 [1] : vector<2x4x1xf32> to vector<2x1xf32>
    %74 = vector.shape_cast %73 : vector<2x1xf32> to vector<2x1x1xf32>
    %cst_38 = arith.constant 4.000000e+00 : f32
    %75 = vector.broadcast %cst_38 : f32 to vector<2x1x1xf32>
    %76 = arith.divf %74, %75 : vector<2x1x1xf32>
    %77 = vector.broadcast %76 : vector<2x1x1xf32> to vector<2x4x32xf32>
    %78 = arith.subf %29, %77 : vector<2x4x32xf32>
    %79 = arith.mulf %78, %78 : vector<2x4x32xf32>
    %cst_39 = arith.constant dense<0.000000e+00> : vector<2x4xf32>
    %80 = vector.multi_reduction <add>, %79, %cst_39 [2] : vector<2x4x32xf32> to vector<2x4xf32>
    %81 = vector.shape_cast %80 : vector<2x4xf32> to vector<2x4x1xf32>
    %cst_40 = arith.constant 3.200000e+01 : f32
    %82 = vector.broadcast %cst_40 : f32 to vector<2x4x1xf32>
    %83 = arith.divf %81, %82 : vector<2x4x1xf32>
    %cst_41 = arith.constant dense<0.000000e+00> : vector<2x1xf32>
    %84 = vector.multi_reduction <add>, %83, %cst_41 [1] : vector<2x4x1xf32> to vector<2x1xf32>
    %85 = vector.shape_cast %84 : vector<2x1xf32> to vector<2x1x1xf32>
    %cst_42 = arith.constant 4.000000e+00 : f32
    %86 = vector.broadcast %cst_42 : f32 to vector<2x1x1xf32>
    %87 = arith.divf %85, %86 : vector<2x1x1xf32>
    %cst_43 = arith.constant 9.99999974E-6 : f32
    %88 = vector.broadcast %cst_43 : f32 to vector<2x1x1xf32>
    %89 = arith.addf %87, %88 : vector<2x1x1xf32>
    %90 = math.rsqrt %89 : vector<2x1x1xf32>
    %91 = vector.broadcast %90 : vector<2x1x1xf32> to vector<2x4x32xf32>
    %92 = arith.mulf %78, %91 : vector<2x4x32xf32>
    %93 = vector.shape_cast %67 : vector<4x32xf32> to vector<1x4x32xf32>
    %94 = vector.broadcast %93 : vector<1x4x32xf32> to vector<2x4x32xf32>
    %95 = arith.mulf %92, %94 : vector<2x4x32xf32>
    %96 = vector.shape_cast %68 : vector<4x32xf32> to vector<1x4x32xf32>
    %97 = vector.broadcast %96 : vector<1x4x32xf32> to vector<2x4x32xf32>
    %98 = arith.addf %95, %97 : vector<2x4x32xf32>
    %99 = arith.negf %98 : vector<2x4x32xf32>
    %100 = math.exp %99 : vector<2x4x32xf32>
    %cst_44 = arith.constant 1.000000e+00 : f32
    %101 = vector.broadcast %cst_44 : f32 to vector<2x4x32xf32>
    %102 = arith.addf %101, %100 : vector<2x4x32xf32>
    %103 = arith.divf %101, %102 : vector<2x4x32xf32>
    %104 = vector.shape_cast %66 : vector<2x4x32xf32> to vector<8x1x32xf32>
    "tpu.trace_start"() <{level = 10 : i32, message = "fqc,fcs->fqs"}> : () -> ()
    %cst_45 = arith.constant dense<0.000000e+00> : vector<8x1x49xf32>
    %105 = tpu.matmul %104, %0, %cst_45 {dimension_numbers = #tpu.dot_dimension_numbers<[2], [1], [1], [2], [0, 0, 0, 1, 1, 2], [0], [0]>} : vector<8x1x32xf32>, vector<8x32x49xf32>, vector<8x1x49xf32> -> vector<8x1x49xf32>
    "tpu.trace_stop"() : () -> ()
    %106 = vector.shape_cast %105 : vector<8x1x49xf32> to vector<2x4x49xf32>
    %cst_46 = arith.constant 3.125000e-02 : f32
    %107 = vector.broadcast %cst_46 : f32 to vector<2x4x49xf32>
    %108 = arith.mulf %106, %107 : vector<2x4x49xf32>
    %109 = vector.shape_cast %103 : vector<2x4x32xf32> to vector<8x1x32xf32>
    "tpu.trace_start"() <{level = 10 : i32, message = "fqc,fcs->fqs"}> : () -> ()
    %cst_47 = arith.constant dense<0.000000e+00> : vector<8x1x49xf32>
    %110 = tpu.matmul %109, %1, %cst_47 {dimension_numbers = #tpu.dot_dimension_numbers<[2], [1], [1], [2], [0, 0, 0, 1, 1, 2], [0], [0]>} : vector<8x1x32xf32>, vector<8x32x49xf32>, vector<8x1x49xf32> -> vector<8x1x49xf32>
    "tpu.trace_stop"() : () -> ()
    %111 = vector.shape_cast %110 : vector<8x1x49xf32> to vector<2x4x49xf32>
    %cst_48 = arith.constant 3.125000e-02 : f32
    %112 = vector.broadcast %cst_48 : f32 to vector<2x4x49xf32>
    %113 = arith.mulf %111, %112 : vector<2x4x49xf32>
    %c184 = arith.constant 184 : index
    %c0_49 = arith.constant 0 : index
    %114 = vector.load %arg3[%c184, %c0_49] : memref<248x128xf32, #tpu.memory_space<vmem>>, vector<8x4xf32>
    %115 = vector.shape_cast %114 : vector<8x4xf32> to vector<1x8x4xf32>
    %116 = vector.broadcast %115 : vector<1x8x4xf32> to vector<2x8x4xf32>
    "tpu.trace_start"() <{level = 10 : i32, message = "bqt,bts->bqs"}> : () -> ()
    %cst_50 = arith.constant dense<0.000000e+00> : vector<2x8x49xf32>
    %117 = tpu.matmul %116, %108, %cst_50 {dimension_numbers = #tpu.dot_dimension_numbers<[2], [1], [1], [2], [0, 0, 0, 1, 1, 2], [0], [0]>} : vector<2x8x4xf32>, vector<2x4x49xf32>, vector<2x8x49xf32> -> vector<2x8x49xf32>
    "tpu.trace_stop"() : () -> ()
    %c192 = arith.constant 192 : index
    %c0_51 = arith.constant 0 : index
    %118 = vector.load %arg3[%c192, %c0_51] : memref<248x128xf32, #tpu.memory_space<vmem>>, vector<8x1xf32>
    %119 = vector.shape_cast %118 : vector<8x1xf32> to vector<1x8x1xf32>
    %120 = vector.broadcast %119 : vector<1x8x1xf32> to vector<2x8x49xf32>
    %121 = arith.addf %117, %120 : vector<2x8x49xf32>
    %122 = vector.extract_strided_slice %121 {offsets = [0, 0, 0], sizes = [2, 4, 49], strides = [1, 1, 1]} : vector<2x8x49xf32> to vector<2x4x49xf32>
    %cst_52 = arith.constant 0.000000e+00 : f32
    %123 = vector.broadcast %cst_52 : f32 to vector<2x4x49xf32>
    %124 = arith.maximumf %122, %123 : vector<2x4x49xf32>
    %c200 = arith.constant 200 : index
    %c0_53 = arith.constant 0 : index
    %125 = vector.load %arg3[%c200, %c0_53] : memref<248x128xf32, #tpu.memory_space<vmem>>, vector<4x49xf32>
    %c208 = arith.constant 208 : index
    %c0_54 = arith.constant 0 : index
    %126 = vector.load %arg3[%c208, %c0_54] : memref<248x128xf32, #tpu.memory_space<vmem>>, vector<4x49xf32>
    %cst_55 = arith.constant dense<0.000000e+00> : vector<2x4xf32>
    %127 = vector.multi_reduction <add>, %124, %cst_55 [2] : vector<2x4x49xf32> to vector<2x4xf32>
    %128 = vector.shape_cast %127 : vector<2x4xf32> to vector<2x4x1xf32>
    %cst_56 = arith.constant 4.900000e+01 : f32
    %129 = vector.broadcast %cst_56 : f32 to vector<2x4x1xf32>
    %130 = arith.divf %128, %129 : vector<2x4x1xf32>
    %cst_57 = arith.constant dense<0.000000e+00> : vector<2x1xf32>
    %131 = vector.multi_reduction <add>, %130, %cst_57 [1] : vector<2x4x1xf32> to vector<2x1xf32>
    %132 = vector.shape_cast %131 : vector<2x1xf32> to vector<2x1x1xf32>
    %cst_58 = arith.constant 4.000000e+00 : f32
    %133 = vector.broadcast %cst_58 : f32 to vector<2x1x1xf32>
    %134 = arith.divf %132, %133 : vector<2x1x1xf32>
    %135 = vector.broadcast %134 : vector<2x1x1xf32> to vector<2x4x49xf32>
    %136 = arith.subf %124, %135 : vector<2x4x49xf32>
    %137 = arith.mulf %136, %136 : vector<2x4x49xf32>
    %cst_59 = arith.constant dense<0.000000e+00> : vector<2x4xf32>
    %138 = vector.multi_reduction <add>, %137, %cst_59 [2] : vector<2x4x49xf32> to vector<2x4xf32>
    %139 = vector.shape_cast %138 : vector<2x4xf32> to vector<2x4x1xf32>
    %cst_60 = arith.constant 4.900000e+01 : f32
    %140 = vector.broadcast %cst_60 : f32 to vector<2x4x1xf32>
    %141 = arith.divf %139, %140 : vector<2x4x1xf32>
    %cst_61 = arith.constant dense<0.000000e+00> : vector<2x1xf32>
    %142 = vector.multi_reduction <add>, %141, %cst_61 [1] : vector<2x4x1xf32> to vector<2x1xf32>
    %143 = vector.shape_cast %142 : vector<2x1xf32> to vector<2x1x1xf32>
    %cst_62 = arith.constant 4.000000e+00 : f32
    %144 = vector.broadcast %cst_62 : f32 to vector<2x1x1xf32>
    %145 = arith.divf %143, %144 : vector<2x1x1xf32>
    %cst_63 = arith.constant 9.99999974E-6 : f32
    %146 = vector.broadcast %cst_63 : f32 to vector<2x1x1xf32>
    %147 = arith.addf %145, %146 : vector<2x1x1xf32>
    %148 = math.rsqrt %147 : vector<2x1x1xf32>
    %149 = vector.broadcast %148 : vector<2x1x1xf32> to vector<2x4x49xf32>
    %150 = arith.mulf %136, %149 : vector<2x4x49xf32>
    %151 = vector.shape_cast %125 : vector<4x49xf32> to vector<1x4x49xf32>
    %152 = vector.broadcast %151 : vector<1x4x49xf32> to vector<2x4x49xf32>
    %153 = arith.mulf %150, %152 : vector<2x4x49xf32>
    %154 = vector.shape_cast %126 : vector<4x49xf32> to vector<1x4x49xf32>
    %155 = vector.broadcast %154 : vector<1x4x49xf32> to vector<2x4x49xf32>
    %156 = arith.addf %153, %155 : vector<2x4x49xf32>
    %157 = vector.extract_strided_slice %121 {offsets = [0, 4, 0], sizes = [2, 4, 49], strides = [1, 1, 1]} : vector<2x8x49xf32> to vector<2x4x49xf32>
    %158 = arith.negf %157 : vector<2x4x49xf32>
    %159 = math.exp %158 : vector<2x4x49xf32>
    %cst_64 = arith.constant 1.000000e+00 : f32
    %160 = vector.broadcast %cst_64 : f32 to vector<2x4x49xf32>
    %161 = arith.addf %160, %159 : vector<2x4x49xf32>
    %162 = arith.divf %160, %161 : vector<2x4x49xf32>
    %c216 = arith.constant 216 : index
    %c0_65 = arith.constant 0 : index
    %163 = vector.load %arg3[%c216, %c0_65] : memref<248x128xf32, #tpu.memory_space<vmem>>, vector<8x4xf32>
    %164 = vector.shape_cast %163 : vector<8x4xf32> to vector<1x8x4xf32>
    %165 = vector.broadcast %164 : vector<1x8x4xf32> to vector<2x8x4xf32>
    "tpu.trace_start"() <{level = 10 : i32, message = "bqt,bts->bqs"}> : () -> ()
    %cst_66 = arith.constant dense<0.000000e+00> : vector<2x8x49xf32>
    %166 = tpu.matmul %165, %113, %cst_66 {dimension_numbers = #tpu.dot_dimension_numbers<[2], [1], [1], [2], [0, 0, 0, 1, 1, 2], [0], [0]>} : vector<2x8x4xf32>, vector<2x4x49xf32>, vector<2x8x49xf32> -> vector<2x8x49xf32>
    "tpu.trace_stop"() : () -> ()
    %c224 = arith.constant 224 : index
    %c0_67 = arith.constant 0 : index
    %167 = vector.load %arg3[%c224, %c0_67] : memref<248x128xf32, #tpu.memory_space<vmem>>, vector<8x1xf32>
    %168 = vector.shape_cast %167 : vector<8x1xf32> to vector<1x8x1xf32>
    %169 = vector.broadcast %168 : vector<1x8x1xf32> to vector<2x8x49xf32>
    %170 = arith.addf %166, %169 : vector<2x8x49xf32>
    %171 = vector.extract_strided_slice %170 {offsets = [0, 0, 0], sizes = [2, 4, 49], strides = [1, 1, 1]} : vector<2x8x49xf32> to vector<2x4x49xf32>
    %cst_68 = arith.constant 0.000000e+00 : f32
    %172 = vector.broadcast %cst_68 : f32 to vector<2x4x49xf32>
    %173 = arith.maximumf %171, %172 : vector<2x4x49xf32>
    %c232 = arith.constant 232 : index
    %c0_69 = arith.constant 0 : index
    %174 = vector.load %arg3[%c232, %c0_69] : memref<248x128xf32, #tpu.memory_space<vmem>>, vector<4x49xf32>
    %c240 = arith.constant 240 : index
    %c0_70 = arith.constant 0 : index
    %175 = vector.load %arg3[%c240, %c0_70] : memref<248x128xf32, #tpu.memory_space<vmem>>, vector<4x49xf32>
    %cst_71 = arith.constant dense<0.000000e+00> : vector<2x4xf32>
    %176 = vector.multi_reduction <add>, %173, %cst_71 [2] : vector<2x4x49xf32> to vector<2x4xf32>
    %177 = vector.shape_cast %176 : vector<2x4xf32> to vector<2x4x1xf32>
    %cst_72 = arith.constant 4.900000e+01 : f32
    %178 = vector.broadcast %cst_72 : f32 to vector<2x4x1xf32>
    %179 = arith.divf %177, %178 : vector<2x4x1xf32>
    %cst_73 = arith.constant dense<0.000000e+00> : vector<2x1xf32>
    %180 = vector.multi_reduction <add>, %179, %cst_73 [1] : vector<2x4x1xf32> to vector<2x1xf32>
    %181 = vector.shape_cast %180 : vector<2x1xf32> to vector<2x1x1xf32>
    %cst_74 = arith.constant 4.000000e+00 : f32
    %182 = vector.broadcast %cst_74 : f32 to vector<2x1x1xf32>
    %183 = arith.divf %181, %182 : vector<2x1x1xf32>
    %184 = vector.broadcast %183 : vector<2x1x1xf32> to vector<2x4x49xf32>
    %185 = arith.subf %173, %184 : vector<2x4x49xf32>
    %186 = arith.mulf %185, %185 : vector<2x4x49xf32>
    %cst_75 = arith.constant dense<0.000000e+00> : vector<2x4xf32>
    %187 = vector.multi_reduction <add>, %186, %cst_75 [2] : vector<2x4x49xf32> to vector<2x4xf32>
    %188 = vector.shape_cast %187 : vector<2x4xf32> to vector<2x4x1xf32>
    %cst_76 = arith.constant 4.900000e+01 : f32
    %189 = vector.broadcast %cst_76 : f32 to vector<2x4x1xf32>
    %190 = arith.divf %188, %189 : vector<2x4x1xf32>
    %cst_77 = arith.constant dense<0.000000e+00> : vector<2x1xf32>
    %191 = vector.multi_reduction <add>, %190, %cst_77 [1] : vector<2x4x1xf32> to vector<2x1xf32>
    %192 = vector.shape_cast %191 : vector<2x1xf32> to vector<2x1x1xf32>
    %cst_78 = arith.constant 4.000000e+00 : f32
    %193 = vector.broadcast %cst_78 : f32 to vector<2x1x1xf32>
    %194 = arith.divf %192, %193 : vector<2x1x1xf32>
    %cst_79 = arith.constant 9.99999974E-6 : f32
    %195 = vector.broadcast %cst_79 : f32 to vector<2x1x1xf32>
    %196 = arith.addf %194, %195 : vector<2x1x1xf32>
    %197 = math.rsqrt %196 : vector<2x1x1xf32>
    %198 = vector.broadcast %197 : vector<2x1x1xf32> to vector<2x4x49xf32>
    %199 = arith.mulf %185, %198 : vector<2x4x49xf32>
    %200 = vector.shape_cast %174 : vector<4x49xf32> to vector<1x4x49xf32>
    %201 = vector.broadcast %200 : vector<1x4x49xf32> to vector<2x4x49xf32>
    %202 = arith.mulf %199, %201 : vector<2x4x49xf32>
    %203 = vector.shape_cast %175 : vector<4x49xf32> to vector<1x4x49xf32>
    %204 = vector.broadcast %203 : vector<1x4x49xf32> to vector<2x4x49xf32>
    %205 = arith.addf %202, %204 : vector<2x4x49xf32>
    %206 = vector.extract_strided_slice %170 {offsets = [0, 4, 0], sizes = [2, 4, 49], strides = [1, 1, 1]} : vector<2x8x49xf32> to vector<2x4x49xf32>
    %207 = arith.negf %206 : vector<2x4x49xf32>
    %208 = math.exp %207 : vector<2x4x49xf32>
    %cst_80 = arith.constant 1.000000e+00 : f32
    %209 = vector.broadcast %cst_80 : f32 to vector<2x4x49xf32>
    %210 = arith.addf %209, %208 : vector<2x4x49xf32>
    %211 = arith.divf %209, %210 : vector<2x4x49xf32>
    %212 = vector.shape_cast %211 : vector<2x4x49xf32> to vector<8x1x49xf32>
    "tpu.trace_start"() <{level = 10 : i32, message = "fqs,fcs->fqc"}> : () -> ()
    %cst_81 = arith.constant dense<0.000000e+00> : vector<8x1x32xf32>
    %213 = tpu.matmul %212, %0, %cst_81 {dimension_numbers = #tpu.dot_dimension_numbers<[2], [2], [1], [1], [0, 0, 0, 1, 1, 1], [0], [0]>} : vector<8x1x49xf32>, vector<8x32x49xf32>, vector<8x1x32xf32> -> vector<8x1x32xf32>
    "tpu.trace_stop"() : () -> ()
    %214 = vector.shape_cast %213 : vector<8x1x32xf32> to vector<2x4x32xf32>
    %cst_82 = arith.constant 0.0204081628 : f32
    %215 = vector.broadcast %cst_82 : f32 to vector<2x4x32xf32>
    %216 = arith.mulf %214, %215 : vector<2x4x32xf32>
    %217 = vector.shape_cast %162 : vector<2x4x49xf32> to vector<8x1x49xf32>
    "tpu.trace_start"() <{level = 10 : i32, message = "fqs,fcs->fqc"}> : () -> ()
    %cst_83 = arith.constant dense<0.000000e+00> : vector<8x1x32xf32>
    %218 = tpu.matmul %217, %1, %cst_83 {dimension_numbers = #tpu.dot_dimension_numbers<[2], [2], [1], [1], [0, 0, 0, 1, 1, 1], [0], [0]>} : vector<8x1x49xf32>, vector<8x32x49xf32>, vector<8x1x32xf32> -> vector<8x1x32xf32>
    "tpu.trace_stop"() : () -> ()
    %219 = vector.shape_cast %218 : vector<8x1x32xf32> to vector<2x4x32xf32>
    %cst_84 = arith.constant 0.0204081628 : f32
    %220 = vector.broadcast %cst_84 : f32 to vector<2x4x32xf32>
    %221 = arith.mulf %219, %220 : vector<2x4x32xf32>
    %cst_85 = arith.constant 1.000000e+00 : f32
    %222 = vector.broadcast %cst_85 : f32 to vector<2x4x49xf32>
    %223 = arith.subf %222, %211 : vector<2x4x49xf32>
    %224 = arith.mulf %205, %223 : vector<2x4x49xf32>
    %cst_86 = arith.constant dense<0.000000e+00> : vector<2x4xf32>
    %225 = vector.multi_reduction <add>, %224, %cst_86 [2] : vector<2x4x49xf32> to vector<2x4xf32>
    %226 = vector.shape_cast %225 : vector<2x4xf32> to vector<2x4x1xf32>
    %cst_87 = arith.constant 4.900000e+01 : f32
    %227 = vector.broadcast %cst_87 : f32 to vector<2x4x1xf32>
    %228 = arith.divf %226, %227 : vector<2x4x1xf32>
    %cst_88 = arith.constant 1.000000e+00 : f32
    %229 = vector.broadcast %cst_88 : f32 to vector<2x4x49xf32>
    %230 = arith.subf %229, %162 : vector<2x4x49xf32>
    %231 = arith.mulf %156, %230 : vector<2x4x49xf32>
    %cst_89 = arith.constant dense<0.000000e+00> : vector<2x4xf32>
    %232 = vector.multi_reduction <add>, %231, %cst_89 [2] : vector<2x4x49xf32> to vector<2x4xf32>
    %233 = vector.shape_cast %232 : vector<2x4xf32> to vector<2x4x1xf32>
    %cst_90 = arith.constant 4.900000e+01 : f32
    %234 = vector.broadcast %cst_90 : f32 to vector<2x4x1xf32>
    %235 = arith.divf %233, %234 : vector<2x4x1xf32>
    %236 = arith.mulf %66, %216 : vector<2x4x32xf32>
    %237 = vector.broadcast %228 : vector<2x4x1xf32> to vector<2x4x32xf32>
    %238 = arith.addf %236, %237 : vector<2x4x32xf32>
    %239 = arith.mulf %103, %221 : vector<2x4x32xf32>
    %240 = vector.broadcast %235 : vector<2x4x1xf32> to vector<2x4x32xf32>
    %241 = arith.addf %239, %240 : vector<2x4x32xf32>
    %cst_91 = arith.constant 0.000000e+00 : f32
    %242 = vector.broadcast %cst_91 : f32 to vector<2x12x128xf32>
    %c0_92 = arith.constant 0 : index
    %c0_93 = arith.constant 0 : index
    %c0_94 = arith.constant 0 : index
    %243 = vector.load %arg4[%c0_92, %c0_93, %c0_94] : memref<2x12x128xf32, #tpu.memory_space<vmem>>, vector<2x12x128xf32>
    tpu.vector_store %arg4[%c0_92, %c0_93, %c0_94], %242 {strides = array<i32>} : memref<2x12x128xf32, #tpu.memory_space<vmem>>, vector<2x12x128xf32>,
    %c0_95 = arith.constant 0 : index
    %c0_96 = arith.constant 0 : index
    %c0_97 = arith.constant 0 : index
    %244 = vector.load %arg4[%c0_95, %c0_96, %c0_97] : memref<2x12x128xf32, #tpu.memory_space<vmem>>, vector<2x4x49xf32>
    tpu.vector_store %arg4[%c0_95, %c0_96, %c0_97], %211 {strides = array<i32>} : memref<2x12x128xf32, #tpu.memory_space<vmem>>, vector<2x4x49xf32>,
    %c0_98 = arith.constant 0 : index
    %c4 = arith.constant 4 : index
    %c0_99 = arith.constant 0 : index
    %245 = vector.load %arg4[%c0_98, %c4, %c0_99] : memref<2x12x128xf32, #tpu.memory_space<vmem>>, vector<2x4x49xf32>
    tpu.vector_store %arg4[%c0_98, %c4, %c0_99], %162 {strides = array<i32>} : memref<2x12x128xf32, #tpu.memory_space<vmem>>, vector<2x4x49xf32>,
    %c0_100 = arith.constant 0 : index
    %c8 = arith.constant 8 : index
    %c0_101 = arith.constant 0 : index
    %246 = vector.load %arg4[%c0_100, %c8, %c0_101] : memref<2x12x128xf32, #tpu.memory_space<vmem>>, vector<2x4x32xf32>
    tpu.vector_store %arg4[%c0_100, %c8, %c0_101], %238 {strides = array<i32>} : memref<2x12x128xf32, #tpu.memory_space<vmem>>, vector<2x4x32xf32>,
    %c0_102 = arith.constant 0 : index
    %c8_103 = arith.constant 8 : index
    %c32_104 = arith.constant 32 : index
    %247 = vector.load %arg4[%c0_102, %c8_103, %c32_104] : memref<2x12x128xf32, #tpu.memory_space<vmem>>, vector<2x4x32xf32>
    tpu.vector_store %arg4[%c0_102, %c8_103, %c32_104], %241 {strides = array<i32>} : memref<2x12x128xf32, #tpu.memory_space<vmem>>, vector<2x4x32xf32>,
    return
  }
  func.func @transform_0(%arg0: i32) -> (i32, i32, i32) {
    %c0_i32 = arith.constant 0 : i32
    %c0_i32_0 = arith.constant 0 : i32
    %c0_i32_1 = arith.constant 0 : i32
    return %arg0, %c0_i32, %c0_i32_0 : i32, i32, i32
  }
  func.func @transform_1(%arg0: i32) -> (i32, i32, i32) {
    %c0_i32 = arith.constant 0 : i32
    %c0_i32_0 = arith.constant 0 : i32
    %c0_i32_1 = arith.constant 0 : i32
    return %arg0, %c0_i32, %c0_i32_0 : i32, i32, i32
  }
  func.func @transform_2(%arg0: i32) -> (i32, i32) {
    %c0_i32 = arith.constant 0 : i32
    %c0_i32_0 = arith.constant 0 : i32
    %c0_i32_1 = arith.constant 0 : i32
    return %c0_i32, %c0_i32_0 : i32, i32
  }
  func.func @transform_3(%arg0: i32) -> (i32, i32, i32) {
    %c0_i32 = arith.constant 0 : i32
    %c0_i32_0 = arith.constant 0 : i32
    %c0_i32_1 = arith.constant 0 : i32
    return %arg0, %c0_i32, %c0_i32_0 : i32, i32, i32
  }
}

</mosaic_0001>

<bundles_post_ra>
// kernel: tpu_custom_call.1
= control target key start
LH: loop header
LB: loop body
LE: loop exit
PB: predicated region body
PF: predicated region fallthrough
CT: control target
= control target key end

     0   :  { %8 = vsyncpa [#allocation3], 0  ;;  %s7356_s0 = inlined_call_operand.hbm [shape: f32[16,32,49], index: 0, kind: input, shape index: {}]   ;;  %s7357_s1 = inlined_call_operand.hbm [shape: f32[16,32,49], index: 1, kind: input, shape index: {}]   ;;  %s7358_s2 = inlined_call_operand.hbm [shape: f32[248,128], index: 2, kind: input, shape index: {}]   ;;  %s7359_s3 = inlined_call_operand.vmem [shape: f32[4,12,128], index: 3, kind: output, shape index: {}]  }
   0x1   :  { %10 = vsyncpa [#allocation3 + $0x1], 0 }
   0x2   :  { %11 = vsyncpa [#allocation5], 0 }
   0x3   :  { %13 = vsyncpa [#allocation5 + $0x1], 0  ;;  %s5997_s12 = smov 0   ;;  %s5999_s13 = smov 0  }
   0x4   :  { %s6001_s14 = smov 0   ;;  %s6003_s15 = smov 0  }
   0x5 LB: > { %s6016_s16 = sadd.s32 4294967295, %s5965_s15   ;;  %p39_p0 = scmp.ne.s32.totalorder %s5957_s13, %s5953_s12  ;;  %s5965_s15 = sphi %s6003_s15, %s7444_s15   ;;  %s5961_s14 = sphi %s6001_s14, %s7443_s14   ;;  %s5957_s13 = sphi %s5999_s13, %s7442_s13   ;;  %s5953_s12 = sphi %s5997_s12, %s7441_s12  }
   0x6   : > { %p7360_p1 = scmp.eq.s32.totalorder %s6016_s16, 0  ;;  %p4917_p2 = scmp.ge.s32.totalorder %s5965_s15, 1 }
   0x7   : > { %p123_p3 = scmp.lt.s32.totalorder %s5965_s15, 3  ;;  %s5967_s19 = smov [#allocation6]  }
   0x8   : > { %p6024_p4 = por %p7360_p1, %p39_p0  ;;  %s135_s20 = sshll.u32 %s5967_s19, 4  ;;  %s136_s20 = int_to_ptr.vmem [resolvable:$true] %s135_s20 }
   0x9   : > { %p6028_p5 = pnand %p4917_p2, %p123_p3  ;;  %s6041_s22 = sadd.s32 1, %s5965_s15  }
   0xa   : > { %s7387_s17 = scalar_select %p6024_p4, 1, 0 }
   0xb   : > { %p5673_p6 = pneg %p6028_p5  ;;  %s26_s23 = sadd.s32 1, %s5961_s14 }
   0xc   : > { %s23_s24 = ssub.s32 %s5965_s15, %s6041_s22  ;;  %s5852_s25 = scalar_lea.vmem %s136_s20, 3968 }
   0xd   : > { %p6036_p7 = pnand %p5673_p6, %p7360_p1  ;;  %p5853_p9 = scmp.ne.s32.totalorder %s136_s20, %s5852_s25 }
   0xe   : > { %p5860_p12 = scmp.lt.s32.totalorder %s136_s20, %s136_s20  ;;  %p5861_p13 = scmp.lt.s32.totalorder %s5852_s25, %s5852_s25 }
   0xf   : > { %p5843_p8 = pneg %p6036_p7 }
  0x10   : > { %p5862_p0 = por %p5861_p13, %p5860_p12 }
  0x11   : > { %p5855_p10 = pnand %p5853_p9, %p5843_p8 }
  0x13   : > { %p5856_p11 = pneg %p5855_p10 }
  0x15   : > { %p5863_p2 = pnand %p5862_p0, %p5856_p11 }
  0x17   : > { %5866 = shalt.err (!%p5863_p2)
}
  0x18   : > { %s5968_s26 = smov 128   ;;  %s5969_s27 = smov 8  }
  0x19   : > { %5676 = dma.hbm_to_vmem [thread:$0]  (!%p6036_p7), %s7358_s2, 3968, %s136_s20, [#allocation5], %s5968_s26, %s5968_s26, %s5969_s27  }
  0x1a   : > { %p24_p3 = scmp.eq.s32.totalorder %s23_s24, 0  ;;  %p33_p6 = scmp.ne.s32.totalorder %s5961_s14, %s5957_s13 }
  0x1b   : > { %p34_p8 = scmp.eq.s32.totalorder %s5965_s15, 0  ;;  %p5685_p9 = scmp.lt.s32.totalorder %s5965_s15, 2 }
  0x1c   : > { %s6061_s30 = scalar_select %p24_p3, %s5961_s14, %s26_s23  }
  0x1d   : > { %p35_p10 = por %p34_p8, %p33_p6  ;;  %s149_s4 = sand.u32 1, %s5961_s14  }
  0x1e   : > { %s4920_s5 = sshll.u32 %s149_s4, 8  ;;  %s5057_s6 = sshll.u32 %s5965_s15, 12 }
  0x1f   : > { %s6068_s9 = scalar_lea.hbm %s7356_s0, %s5057_s6  ;;  %s153_s10 = scalar_lea.vmem [#allocation2], %s4920_s5 }
  0x20   : > { %s161_s11 = sshll.u32 %s153_s10, 4  ;;  %p6072_p7 = pnand %p5685_p9, %p35_p10  ;;  %s6070_s11 = int_to_ptr.vmem [resolvable:$true] %s161_s11 }
  0x21   : > { %s6079_s21 = scalar_lea.hbm %s7357_s1, %s5057_s6  ;;  %s175_s23 = scalar_lea.vmem [#allocation4], %s4920_s5 }
  0x22   : > { %s6081_s24 = sshll.u32 %s175_s23, 4  ;;  %s6083_s25 = scalar_lea.sflag [#allocation3], %s149_s4  ;;  %s6114_s24 = int_to_ptr.vmem [resolvable:$true] %s6081_s24 }
  0x23   : > { %s5867_s28 = scalar_lea.hbm %s6068_s9, 4096  ;;  %p5869_p12 = pneg %p6072_p7 }
  0x24   : > { %p5868_p11 = scmp.ne.s32.totalorder %s6068_s9, %s5867_s28  ;;  %s5872_s8 = scalar_lea.hbm %s7356_s0, 8192 }
  0x25   : > { %p5873_p2 = scmp.lt.s32.totalorder %s6068_s9, %s7356_s0  ;;  %p5874_p3 = scmp.lt.s32.totalorder %s5872_s8, %s5867_s28 }
  0x26   : > { %p5870_p13 = pnand %p5869_p12, %p5868_p11 }
  0x27   : > { %p5875_p6 = por %p5874_p3, %p5873_p2 }
  0x28   : > { %p5871_p0 = pneg %p5870_p13 }
  0x2a   : > { %p5876_p8 = pnand %p5875_p6, %p5871_p0 }
  0x2c   : > { %5879 = shalt.err (!%p5876_p8)
}
  0x2d   : > { %s5880_s4 = scalar_lea.vmem %s6070_s11, 4096  ;;  %s5970_s5 = smov [#allocation2]  }
  0x2e   : > { %p5881_p9 = scmp.ne.s32.totalorder %s6070_s11, %s5880_s4  ;;  %s5885_s19 = sshll.u32 %s5970_s5, 4  ;;  %s5886_s19 = int_to_ptr.vmem [resolvable:$false] %s5885_s19 }
  0x2f   : > { %s5887_s20 = scalar_lea.vmem %s5886_s19, 8192  ;;  %p5888_p13 = scmp.lt.s32.totalorder %s6070_s11, %s5886_s19 }
  0x30   : > { %p5883_p10 = pnand %p5881_p9, %p5869_p12  ;;  %p5889_p1 = scmp.lt.s32.totalorder %s5887_s20, %s5880_s4 }
  0x32   : > { %p5884_p11 = pneg %p5883_p10  ;;  %p5890_p4 = por %p5889_p1, %p5888_p13 }
  0x34   : > { %p5891_p2 = pnand %p5890_p4, %p5884_p11 }
  0x36   : > { %5894 = shalt.err (!%p5891_p2)
}
  0x37   : > { %5680 = dma.hbm_to_vmem [thread:$0]  (!%p6072_p7), %s6068_s9, 4096, %s6070_s11, %s6083_s25, %s5968_s26, %s5968_s26, %s5969_s27  }
  0x38   : > { %s171_s23 = sand.u32 1, %s5965_s15   ;;  %s5895_s29 = scalar_lea.hbm %s6079_s21, 4096 }
  0x39   : > { %s172_s28 = scalar_lea.sflag [#allocation5], %s171_s23  ;;  %p5896_p1 = scmp.ne.s32.totalorder %s6079_s21, %s5895_s29 }
  0x3a   : > { %s5900_s10 = scalar_lea.hbm %s7357_s1, 8192  ;;  %p5901_p3 = scmp.lt.s32.totalorder %s6079_s21, %s7357_s1 }
  0x3b   : > { %p5898_p4 = pnand %p5896_p1, %p5869_p12  ;;  %p5902_p6 = scmp.lt.s32.totalorder %s5900_s10, %s5895_s29 }
  0x3d   : > { %p5899_p0 = pneg %p5898_p4  ;;  %p5903_p8 = por %p5902_p6, %p5901_p3 }
  0x3f   : > { %p5904_p9 = pnand %p5903_p8, %p5899_p0 }
  0x41   : > { %5907 = shalt.err (!%p5904_p9)
}
  0x42   : > { %s5908_s15 = scalar_lea.vmem %s6114_s24, 4096  ;;  %s5971_s9 = smov [#allocation4]  }
  0x43   : > { %p5909_p10 = scmp.ne.s32.totalorder %s6114_s24, %s5908_s15  ;;  %s5913_s11 = sshll.u32 %s5971_s9, 4  ;;  %s5914_s11 = int_to_ptr.vmem [resolvable:$false] %s5913_s11 }
  0x44   : > { %s5915_s25 = scalar_lea.vmem %s5914_s11, 8192  ;;  %p5916_p2 = scmp.lt.s32.totalorder %s6114_s24, %s5914_s11 }
  0x45   : > { %p5911_p11 = pnand %p5909_p10, %p5869_p12  ;;  %p5917_p1 = scmp.lt.s32.totalorder %s5915_s25, %s5908_s15 }
  0x47   : > { %p5912_p13 = pneg %p5911_p11  ;;  %p5918_p4 = por %p5917_p1, %p5916_p2 }
  0x49   : > { %p5919_p3 = pnand %p5918_p4, %p5912_p13 }
  0x4b   : > { %5922 = shalt.err (!%p5919_p3)
}
  0x4c   : > { %5683 = dma.hbm_to_vmem [thread:$0]  (!%p6072_p7), %s6079_s21, 4096, %s6114_s24, %s172_s28, %s5968_s26, %s5968_s26, %s5969_s27  }
  0x4d   : > { %195 = sbr.rel (%p6028_p5) target bundleno = 2157 (0x86d), region = 32 }
  0x52   : > { %s197_s5 = sand.u32 1, %s5957_s13   ;;  %p7391_p12 = scmp.ne.s32.totalorder %s7387_s17, 0 }
  0x53   : > { %s4929_s19 = sshll.u32 %s197_s5, 8  ;;  %s198_s20 = scalar_lea.sflag [#allocation3], %s197_s5 }
  0x54   : > { %s6145_s23 = scalar_lea.vmem [#allocation2], %s4929_s19 }
  0x55   : > { %5940 = dma.done.wait (%p7391_p12), %s198_s20, 4096  }
  0x56   : > { %5942 = vsyncadd (%p7391_p12), %s198_s20, 4294963200  ;;  %s206_s12 = sand.u32 1, %s6016_s16   ;;  %s6152_s26 = scalar_lea.vmem [#allocation4], %s4929_s19 }
  0x57   : > { %s207_s29 = scalar_lea.sflag [#allocation5], %s206_s12 }
  0x58   : > { %5944 = dma.done.wait (%p7391_p12), %s207_s29, 4096  }
  0x59   : > { %5946 = vsyncadd (%p7391_p12), %s207_s29, 4294963200  ;;  %p7392_p5 = scmp.eq.s32.totalorder %s6016_s16, 0 }
  0x5b   : > { %5948 = dma.done.wait (%p7392_p5), [#allocation5], 3968   ;;  %p7393_p7 = pmov %p7392_p5 }
  0x5c   : > { %vm316_vm0 = vcmask 400384   ;;  %v256_v0 = vld [vmem:[%s6145_s23 + $0x20] sm:$0xff]  ;;  %v257_v2 = vld [vmem:[%s6145_s23 + $0x28] sm:$0xff]  ;;  %v258_v16 = vld [vmem:[%s6145_s23 + $0x30] sm:$0xff]  ;;  %vm5973_vm1 = vmmov 0   ;;  %vm625_vm2 = vcmask 130112  }
  0x5d   : > { %5950 = vsyncadd (%p7393_p7), [#allocation5], 4294963328  ;;  %v252_v1 = vld [vmem:[%s6145_s23] sm:$0xff]  ;;  %v329_v3 = vsel %vm316_vm0, %v256_v0, 0.0  ;;  %v253_v5 = vld [vmem:[%s6145_s23 + $0x8] sm:$0xff]  ;;  %v332_v6 = vsel %vm316_vm0, %v257_v2, 0.0 }
  0x5e   : > { %v317_v4 = vsel %vm316_vm0, %v252_v1, 0.0  ;;  %330 = vadd.xlane.f32.xlu1 %v329_v3  ;;  %v320_v7 = vsel %vm316_vm0, %v253_v5, 0.0  ;;  %v285_v8 = vld [vmem:[%s6152_s26 + $0x8] sm:$0xff]  ;;  %v284_v9 = vld [vmem:[%s6152_s26] sm:$0xff]  ;;  %v254_v17 = vld [vmem:[%s6145_s23 + $0x10] sm:$0xff]  ;;  %v335_v18 = vsel %vm316_vm0, %v258_v16, 0.0 }
  0x5f   : > { %318 = vadd.xlane.f32.xlu0 %v317_v4  ;;  %v449_v10 = vsel %vm316_vm0, %v285_v8, 0.0  ;;  %v446_v11 = vsel %vm316_vm0, %v284_v9, 0.0  ;;  %v289_v12 = vld [vmem:[%s6152_s26 + $0x28] sm:$0xff]  ;;  %v288_v13 = vld [vmem:[%s6152_s26 + $0x20] sm:$0xff]  ;;  %v323_v19 = vsel %vm316_vm0, %v254_v17, 0.0  ;;  %v290_v24 = vld [vmem:[%s6152_s26 + $0x30] sm:$0xff] }
  0x60   : > { %v461_v14 = vsel %vm316_vm0, %v289_v12, 0.0  ;;  %v458_v15 = vsel %vm316_vm0, %v288_v13, 0.0  ;;  %v261_v20 = vld [vmem:[%s6145_s23 + $0x48] sm:$0xff]  ;;  %v260_v21 = vld [vmem:[%s6145_s23 + $0x40] sm:$0xff]  ;;  %v286_v25 = vld [vmem:[%s6152_s26 + $0x10] sm:$0xff]  ;;  %v464_v26 = vsel %vm316_vm0, %v290_v24, 0.0 }
  0x61   : > { %v344_v22 = vsel %vm316_vm0, %v261_v20, 0.0  ;;  %v341_v23 = vsel %vm316_vm0, %v260_v21, 0.0  ;;  %v452_v27 = vsel %vm316_vm0, %v286_v25, 0.0  ;;  %v293_v28 = vld [vmem:[%s6152_s26 + $0x48] sm:$0xff]  ;;  %v292_v29 = vld [vmem:[%s6152_s26 + $0x40] sm:$0xff]  ;;  %v6195_v32 = vld [vmem:[%s6145_s23 + $0x38] sm:$0xff] }
  0x62   : > { %333 = vadd.xlane.f32.xlu1 %v332_v6  ;;  %v473_v30 = vsel %vm316_vm0, %v293_v28, 0.0  ;;  %v470_v31 = vsel %vm316_vm0, %v292_v29, 0.0  ;;  %v6198_v33 = vld [vmem:[%s6145_s23 + $0x18] sm:$0xff]  ;;  %v338_v34 = vsel %vm316_vm0, %v6195_v32, 0.0  ;;  %v264_v36 = vld [vmem:[%s6145_s23 + $0x60] sm:$0xff]  ;;  %v262_v37 = vld [vmem:[%s6145_s23 + $0x50] sm:$0xff] }
  0x63   : > { %321 = vadd.xlane.f32.xlu0 %v320_v7  ;;  %v326_v35 = vsel %vm316_vm0, %v6198_v33, 0.0  ;;  %v353_v38 = vsel %vm316_vm0, %v264_v36, 0.0  ;;  %v347_v39 = vsel %vm316_vm0, %v262_v37, 0.0  ;;  %v287_v40 = vld [vmem:[%s6152_s26 + $0x18] sm:$0xff]  ;;  %v265_v41 = vld [vmem:[%s6145_s23 + $0x68] sm:$0xff]  ;;  %v294_v44 = vld [vmem:[%s6152_s26 + $0x50] sm:$0xff] }
  0x64   : > { %v455_v42 = vsel %vm316_vm0, %v287_v40, 0.0  ;;  %v356_v43 = vsel %vm316_vm0, %v265_v41, 0.0  ;;  %v291_v45 = vld [vmem:[%s6152_s26 + $0x38] sm:$0xff]  ;;  %v476_v46 = vsel %vm316_vm0, %v294_v44, 0.0  ;;  %v297_v48 = vld [vmem:[%s6152_s26 + $0x68] sm:$0xff]  ;;  %v296_v49 = vld [vmem:[%s6152_s26 + $0x60] sm:$0xff] }
  0x65   : > { %v467_v47 = vsel %vm316_vm0, %v291_v45, 0.0  ;;  %v485_v50 = vsel %vm316_vm0, %v297_v48, 0.0  ;;  %v482_v51 = vsel %vm316_vm0, %v296_v49, 0.0  ;;  %v266_v52 = vld [vmem:[%s6145_s23 + $0x70] sm:$0xff]  ;;  %v263_v53 = vld [vmem:[%s6145_s23 + $0x58] sm:$0xff]  ;;  %v269_v56 = vld [vmem:[%s6145_s23 + $0x88] sm:$0xff] }
  0x66   : > { %450 = vadd.xlane.f32.xlu1 %v449_v10  ;;  %v359_v54 = vsel %vm316_vm0, %v266_v52, 0.0  ;;  %v350_v55 = vsel %vm316_vm0, %v263_v53, 0.0  ;;  %v268_v57 = vld [vmem:[%s6145_s23 + $0x80] sm:$0xff]  ;;  %v368_v58 = vsel %vm316_vm0, %v269_v56, 0.0  ;;  %v298_v60 = vld [vmem:[%s6152_s26 + $0x70] sm:$0xff]  ;;  %v295_v61 = vld [vmem:[%s6152_s26 + $0x58] sm:$0xff] }
  0x67   : > { %447 = vadd.xlane.f32.xlu0 %v446_v11  ;;  %v365_v59 = vsel %vm316_vm0, %v268_v57, 0.0  ;;  %v488_v62 = vsel %vm316_vm0, %v298_v60, 0.0  ;;  %v479_v63 = vsel %vm316_vm0, %v295_v61, 0.0  ;;  %v301_v0 = vld [vmem:[%s6152_s26 + $0x88] sm:$0xff]  ;;  %v300_v1 = vld [vmem:[%s6152_s26 + $0x80] sm:$0xff]  ;;  %v270_v4 = vld [vmem:[%s6145_s23 + $0x90] sm:$0xff] }
  0x68   : > { %v497_v2 = vsel %vm316_vm0, %v301_v0, 0.0  ;;  %v494_v3 = vsel %vm316_vm0, %v300_v1, 0.0  ;;  %v267_v5 = vld [vmem:[%s6145_s23 + $0x78] sm:$0xff]  ;;  %v371_v6 = vsel %vm316_vm0, %v270_v4, 0.0  ;;  %v273_v8 = vld [vmem:[%s6145_s23 + $0xa8] sm:$0xff]  ;;  %v272_v9 = vld [vmem:[%s6145_s23 + $0xa0] sm:$0xff] }
  0x69   : > { %v362_v7 = vsel %vm316_vm0, %v267_v5, 0.0  ;;  %v380_v10 = vsel %vm316_vm0, %v273_v8, 0.0  ;;  %v377_v11 = vsel %vm316_vm0, %v272_v9, 0.0  ;;  %v302_v12 = vld [vmem:[%s6152_s26 + $0x90] sm:$0xff]  ;;  %v299_v13 = vld [vmem:[%s6152_s26 + $0x78] sm:$0xff]  ;;  %v305_v16 = vld [vmem:[%s6152_s26 + $0xa8] sm:$0xff] }
  0x6a   : > { %462 = vadd.xlane.f32.xlu1 %v461_v14  ;;  %v500_v14 = vsel %vm316_vm0, %v302_v12, 0.0  ;;  %v304_v17 = vld [vmem:[%s6152_s26 + $0xa0] sm:$0xff]  ;;  %v274_v20 = vld [vmem:[%s6145_s23 + $0xb0] sm:$0xff]  ;;  %v271_v21 = vld [vmem:[%s6145_s23 + $0x98] sm:$0xff]  ;;  %vm632_vm3 = vcmask 195712   ;;  %vm639_vm4 = vcmask 261312  }
  0x6b   : > { %459 = vadd.xlane.f32.xlu0 %v458_v15  ;;  %v491_v15 = vsel %vm316_vm0, %v299_v13, 0.0  ;;  %v277_v24 = vld [vmem:[%s6145_s23 + $0xc8] sm:$0xff]  ;;  %v276_v25 = vld [vmem:[%s6145_s23 + $0xc0] sm:$0xff]  ;;  %v306_v28 = vld [vmem:[%s6152_s26 + $0xb0] sm:$0xff]  ;;  %vm774_vm5 = vcmask 1041409   ;;  %vm776_vm6 = vcmask 1042434  }
  0x6c   : > { %v303_v29 = vld [vmem:[%s6152_s26 + $0x98] sm:$0xff]  ;;  %v576_v8 = vld [vmem:[#allocation6 + $0x10] sm:$0xff]  ;;  %v575_v12 = vld [vmem:[#allocation6 + $0x8] sm:$0xff]  ;;  %vm778_vm7 = vcmask 1043459   ;;  %vm780_vm8 = vcmask 1044484   ;;  %vm782_vm9 = vcmask 1045509  }
  0x6d   : > { %v581_v4 = vld [vmem:[#allocation6 + $0x38] sm:$0xff]  ;;  %v578_v13 = vld [vmem:[#allocation6 + $0x20] sm:$0xff]  ;;  %vm784_vm10 = vcmask 1046534   ;;  %vm786_vm11 = vcmask 1047559   ;;  %vm788_vm12 = vcmask 261120   ;;  %vm1300_vm13 = vcmask 257024  }
  0x6e   : > { %336 = vadd.xlane.f32.xlu1 %v335_v18  ;;  %v509_v18 = vsel %vm316_vm0, %v305_v16, 0.0  ;;  %v577_v5 = vld [vmem:[#allocation6 + $0x18] sm:$0xff]  ;;  %v574_v16 = vld [vmem:[#allocation6] sm:$0xff]  ;;  %vm1310_vm14 = vcmask 1043456   ;;  %vm2739_vm15 = vcmask 31744   ;;  %s4932_s17 = sshll.u32 %s6016_s16, 1 }
  0x6f   : > { %324 = vadd.xlane.f32.xlu0 %v323_v19  ;;  %v506_v19 = vsel %vm316_vm0, %v304_v17, 0.0  ;;  %p246_p0 = scmp.lt.s32.totalorder %s4932_s17, 3  ;;  %s5976_s16 = smov 32  }
  0x71   : > { %s7446_s17 = smov (!%p246_p0, %s4932_s17), 3 }
  0x72   : > { %345 = vadd.xlane.f32.xlu1 %v344_v22  ;;  %v383_v22 = vsel %vm316_vm0, %v274_v20, 0.0  ;;  %s5060_s18 = sshll.u32 %s7446_s17, 4 }
  0x73   : > { %342 = vadd.xlane.f32.xlu0 %v341_v23  ;;  %v374_v23 = vsel %vm316_vm0, %v271_v21, 0.0  ;;  %s6967_s24 = scalar_lea.vmem %s7359_s3, %s5060_s18 }
  0x76   : > { %465 = vadd.xlane.f32.xlu1 %v464_v26  ;;  %v392_v26 = vsel %vm316_vm0, %v277_v24, 0.0 }
  0x77   : > { %453 = vadd.xlane.f32.xlu0 %v452_v27  ;;  %v389_v27 = vsel %vm316_vm0, %v276_v25, 0.0 }
  0x7a   : > { %474 = vadd.xlane.f32.xlu1 %v473_v30  ;;  %v512_v30 = vsel %vm316_vm0, %v306_v28, 0.0 }
  0x7b   : > { %471 = vadd.xlane.f32.xlu0 %v470_v31  ;;  %v503_v31 = vsel %vm316_vm0, %v303_v29, 0.0 }
  0x7e   : > { %339 = vadd.xlane.f32.xlu1 %v338_v34  ;;  %v309_v34 = vld [vmem:[%s6152_s26 + $0xc8] sm:$0xff] }
  0x7f   : > { %327 = vadd.xlane.f32.xlu0 %v326_v35  ;;  %v308_v35 = vld [vmem:[%s6152_s26 + $0xc0] sm:$0xff]  ;;  %v521_v36 = vsel %vm316_vm0, %v309_v34, 0.0 }
  0x80   : > { %v518_v37 = vsel %vm316_vm0, %v308_v35, 0.0 }
  0x82   : > { %354 = vadd.xlane.f32.xlu1 %v353_v38  ;;  %v278_v38 = vld [vmem:[%s6145_s23 + $0xd0] sm:$0xff] }
  0x83   : > { %348 = vadd.xlane.f32.xlu0 %v347_v39  ;;  %v275_v39 = vld [vmem:[%s6145_s23 + $0xb8] sm:$0xff]  ;;  %v395_v40 = vsel %vm316_vm0, %v278_v38, 0.0 }
  0x84   : > { %v386_v41 = vsel %vm316_vm0, %v275_v39, 0.0 }
  0x86   : > { %456 = vadd.xlane.f32.xlu1 %v455_v42  ;;  %v281_v42 = vld [vmem:[%s6145_s23 + $0xe8] sm:$0xff] }
  0x87   : > { %357 = vadd.xlane.f32.xlu0 %v356_v43  ;;  %v280_v43 = vld [vmem:[%s6145_s23 + $0xe0] sm:$0xff]  ;;  %v404_v44 = vsel %vm316_vm0, %v281_v42, 0.0 }
  0x88   : > { %v401_v45 = vsel %vm316_vm0, %v280_v43, 0.0 }
  0x8a   : > { %477 = vadd.xlane.f32.xlu1 %v476_v46  ;;  %v310_v46 = vld [vmem:[%s6152_s26 + $0xd0] sm:$0xff] }
  0x8b   : > { %468 = vadd.xlane.f32.xlu0 %v467_v47  ;;  %v307_v47 = vld [vmem:[%s6152_s26 + $0xb8] sm:$0xff]  ;;  %v524_v48 = vsel %vm316_vm0, %v310_v46, 0.0 }
  0x8c   : > { %v515_v49 = vsel %vm316_vm0, %v307_v47, 0.0 }
  0x8e   : > { %486 = vadd.xlane.f32.xlu1 %v485_v50  ;;  %v313_v50 = vld [vmem:[%s6152_s26 + $0xe8] sm:$0xff] }
  0x8f   : > { %483 = vadd.xlane.f32.xlu0 %v482_v51  ;;  %v312_v51 = vld [vmem:[%s6152_s26 + $0xe0] sm:$0xff]  ;;  %v533_v52 = vsel %vm316_vm0, %v313_v50, 0.0 }
  0x90   : > { %v530_v53 = vsel %vm316_vm0, %v312_v51, 0.0 }
  0x92   : > { %360 = vadd.xlane.f32.xlu1 %v359_v54  ;;  %v282_v54 = vld [vmem:[%s6145_s23 + $0xf0] sm:$0xff] }
  0x93   : > { %351 = vadd.xlane.f32.xlu0 %v350_v55  ;;  %v279_v55 = vld [vmem:[%s6145_s23 + $0xd8] sm:$0xff]  ;;  %v407_v56 = vsel %vm316_vm0, %v282_v54, 0.0 }
  0x94   : > { %v398_v57 = vsel %vm316_vm0, %v279_v55, 0.0 }
  0x96   : > { %369 = vadd.xlane.f32.xlu1 %v368_v58  ;;  %v314_v58 = vld [vmem:[%s6152_s26 + $0xf0] sm:$0xff] }
  0x97   : > { %366 = vadd.xlane.f32.xlu0 %v365_v59  ;;  %v311_v59 = vld [vmem:[%s6152_s26 + $0xd8] sm:$0xff]  ;;  %v536_v60 = vsel %vm316_vm0, %v314_v58, 0.0 }
  0x98   : > { %v527_v61 = vsel %vm316_vm0, %v311_v59, 0.0 }
  0x9a   : > { %489 = vadd.xlane.f32.xlu1 %v488_v62  ;;  %v315_v62 = vld [vmem:[%s6152_s26 + $0xf8] sm:$0xff] }
  0x9b   : > { %480 = vadd.xlane.f32.xlu0 %v479_v63  ;;  %v283_v63 = vld [vmem:[%s6145_s23 + $0xf8] sm:$0xff]  ;;  %v539_v0 = vsel %vm316_vm0, %v315_v62, 0.0 }
  0x9c   : > { %v410_v1 = vsel %vm316_vm0, %v283_v63, 0.0 }
  0x9e   : > { %498 = vadd.xlane.f32.xlu1 %v497_v2  ;;  %v614_v2 = vlaneseq }
  0x9f   : > { %495 = vadd.xlane.f32.xlu0 %v494_v3  ;;  %v7381_v3 = vmov 0.0  }
  0xa0   : > { %5249 = vmatprep.subr.mxu0 %v7381_v3  ;;  %5260 = vmatprep.subr.mxu1 %v7381_v3  ;;  %v6302_v9 = vshrl.u32 %v614_v2, 7 }
  0xa1   : > { %5250 = vmatpush3.msra.mxu0 %v581_v4  ;;  %5261 = vmatpush3.msra.mxu1 %v577_v5 }
  0xa2   : > { %372 = vadd.xlane.f32.xlu1 %v371_v6  ;;  %v6298_v6 = vand.u32 127, %v614_v2  ;;  %5251 = vmatprep.subr.mxu0 %v7381_v3 }
  0xa3   : > { %363 = vadd.xlane.f32.xlu0 %v362_v7  ;;  %5262 = vmatprep.subr.mxu1 %v7381_v3  ;;  %v580_v7 = vld [vmem:[#allocation6 + $0x30] sm:$0xff] }
  0xa4   : > { %5252 = vmatpush3.msra.mxu0 %v580_v7  ;;  %5263 = vmatpush3.msra.mxu1 %v576_v8  ;;  %v6313_v17 = vsub.s32 %v6298_v6, %v6302_v9  ;;  %v627_v39 = vadd.s32 4294967280, %v6298_v6  ;;  %v634_v8 = vadd.s32 4294967272, %v6298_v6 }
  0xa5   : > { %5253 = vmatprep.subr.mxu0 %v7381_v3  ;;  %5264 = vmatprep.subr.mxu1 %v7381_v3 }
  0xa6   : > { %381 = vadd.xlane.f32.xlu1 %v380_v10  ;;  %v620_v10 = vadd.s32 4294967288, %v6298_v6  ;;  %5265 = vmatpush3.msra.mxu1 %v575_v12  ;;  %v6335_v47 = vsub.s32 %v627_v39, %v6302_v9 }
  0xa7   : > { %378 = vadd.xlane.f32.xlu0 %v377_v11  ;;  %v579_v11 = vld [vmem:[#allocation6 + $0x28] sm:$0xff]  ;;  %5266 = vmatprep.subr.mxu1 %v7381_v3 }
  0xa8   : > { %5254 = vmatpush3.msra.mxu0 %v579_v11  ;;  %5257 = vmatprep.mubr.msk.f32.mxu0 %vm5973_vm1, %v7381_v3  ;;  %v6316_v20 = vsub.s32 %v620_v10, %v6302_v9 }
  0xa9   : > { %5255 = vmatprep.subr.mxu0 %v7381_v3  ;;  %5267 = vmatpush3.msra.mxu1 %v574_v16 }
  0xaa   : > { %501 = vadd.xlane.f32.xlu1 %v500_v14  ;;  %5256 = vmatpush3.msra.mxu0 %v578_v13 }
  0xab   : > { %492 = vadd.xlane.f32.xlu0 %v491_v15  ;;  %5268 = vmatprep.mubr.msk.f32.mxu1 %vm5973_vm1, %v7381_v3 }
  0xac   : > { %5271 = vmatprep.subr.mxu0 %v7381_v3  ;;  %5282 = vmatprep.subr.mxu1 %v7381_v3 }
  0xae   : > { %510 = vadd.xlane.f32.xlu1 %v509_v18 }
  0xaf   : > { %507 = vadd.xlane.f32.xlu0 %v506_v19 }
  0xb2   : > { %384 = vadd.xlane.f32.xlu1 %v383_v22 }
  0xb3   : > { %375 = vadd.xlane.f32.xlu0 %v374_v23 }
  0xb6   : > { %393 = vadd.xlane.f32.xlu1 %v392_v26 }
  0xb7   : > { %390 = vadd.xlane.f32.xlu0 %v389_v27 }
  0xba   : > { %513 = vadd.xlane.f32.xlu1 %v512_v30 }
  0xbb   : > { %504 = vadd.xlane.f32.xlu0 %v503_v31 }
  0xbe   : > { %522 = vadd.xlane.f32.xlu1 %v521_v36 }
  0xbf   : > { %519 = vadd.xlane.f32.xlu0 %v518_v37 }
  0xc2   : > { %396 = vadd.xlane.f32.xlu1 %v395_v40 }
  0xc3   : > { %387 = vadd.xlane.f32.xlu0 %v386_v41 }
  0xc6   : > { %405 = vadd.xlane.f32.xlu1 %v404_v44 }
  0xc7   : > { %402 = vadd.xlane.f32.xlu0 %v401_v45 }
  0xca   : > { %525 = vadd.xlane.f32.xlu1 %v524_v48 }
  0xcb   : > { %516 = vadd.xlane.f32.xlu0 %v515_v49 }
  0xce   : > { %534 = vadd.xlane.f32.xlu1 %v533_v52 }
  0xcf   : > { %531 = vadd.xlane.f32.xlu0 %v530_v53 }
  0xd2   : > { %408 = vadd.xlane.f32.xlu1 %v407_v56 }
  0xd3   : > { %399 = vadd.xlane.f32.xlu0 %v398_v57 }
  0xd6   : > { %537 = vadd.xlane.f32.xlu1 %v536_v60 }
  0xd7   : > { %528 = vadd.xlane.f32.xlu0 %v527_v61 }
  0xda   : > { %540 = vadd.xlane.f32.xlu1 %v539_v0 }
  0xdb   : > { %411 = vadd.xlane.f32.xlu0 %v410_v1 }
  0xe7   : > { %v331_v14 = vpop.xlane.xlu1 %330 }
  0xe8   : > { %v319_v15 = vpop.xlane.xlu0 %318  ;;  %v418_v18 = vmul.f32 0.020408163, %v331_v14 }
  0xe9   : > { %v414_v19 = vmul.f32 0.020408163, %v319_v15 }
  0xea   : > { %v915_v25 = vrot.slane %v418_v18, %v6313_v17 }
  0xeb   : > { %v334_v21 = vpop.xlane.xlu1 %333  ;;  %v896_v26 = vrot.slane %v414_v19, %v6313_v17  ;;  %v6353_v19 = vsub.s32 %v634_v8, %v6302_v9 }
  0xec   : > { %v322_v22 = vpop.xlane.xlu0 %321  ;;  %v419_v23 = vmul.f32 0.020408163, %v334_v21 }
  0xed   : > { %v415_v24 = vmul.f32 0.020408163, %v322_v22 }
  0xee   : > { %v919_v27 = vrot.slane %v419_v23, %v6316_v20 }
  0xef   : > { %v900_v28 = vrot.slane %v415_v24, %v6316_v20  ;;  %v451_v29 = vpop.xlane.xlu1 %450 }
  0xf0   : > { %v448_v30 = vpop.xlane.xlu0 %447  ;;  %v920_v31 = vsel %vm625_vm2, %v919_v27, %v915_v25  ;;  %v543_v35 = vmul.f32 0.020408163, %v451_v29 }
  0xf1   : > { %v901_v34 = vsel %vm625_vm2, %v900_v28, %v896_v26  ;;  %v542_v36 = vmul.f32 0.020408163, %v448_v30 }
  0xf2   : > { %v624_v37 = vrot.slane %v543_v35, %v6316_v20 }
  0xf3   : > { %v619_v38 = vrot.slane %v542_v36, %v6313_v17  ;;  %v463_v40 = vpop.xlane.xlu1 %462 }
  0xf4   : > { %v460_v41 = vpop.xlane.xlu0 %459  ;;  %v547_v43 = vmul.f32 0.020408163, %v463_v40 }
  0xf5   : > { %v626_v42 = vsel %vm625_vm2, %v624_v37, %v619_v38  ;;  %v546_v44 = vmul.f32 0.020408163, %v460_v41 }
  0xf6   : > { %v648_v45 = vrot.slane %v547_v43, %v6316_v20 }
  0xf7   : > { %v644_v46 = vrot.slane %v546_v44, %v6313_v17  ;;  %v337_v48 = vpop.xlane.xlu1 %336 }
  0xf8   : > { %v325_v49 = vpop.xlane.xlu0 %324  ;;  %v420_v51 = vmul.f32 0.020408163, %v337_v48 }
  0xf9   : > { %v649_v50 = vsel %vm625_vm2, %v648_v45, %v644_v46  ;;  %v416_v52 = vmul.f32 0.020408163, %v325_v49 }
  0xfa   : > { %v924_v53 = vrot.slane %v420_v51, %v6335_v47 }
  0xfb   : > { %v905_v54 = vrot.slane %v416_v52, %v6335_v47  ;;  %v346_v55 = vpop.xlane.xlu1 %345 }
  0xfc   : > { %v343_v56 = vpop.xlane.xlu0 %342  ;;  %v925_v57 = vsel %vm632_vm3, %v924_v53, %v920_v31  ;;  %v423_v59 = vmul.f32 0.020408163, %v346_v55 }
  0xfd   : > { %v906_v58 = vsel %vm632_vm3, %v905_v54, %v901_v34  ;;  %v422_v60 = vmul.f32 0.020408163, %v343_v56 }
  0xfe   : > { %v938_v61 = vrot.slane %v423_v59, %v6316_v20 }
  0xff   : > { %v934_v62 = vrot.slane %v422_v60, %v6313_v17  ;;  %v466_v63 = vpop.xlane.xlu1 %465 }
 0x100   : > { %v454_v0 = vpop.xlane.xlu0 %453  ;;  %v548_v2 = vmul.f32 0.020408163, %v466_v63 }
 0x101   : > { %v939_v1 = vsel %vm625_vm2, %v938_v61, %v934_v62  ;;  %v544_v4 = vmul.f32 0.020408163, %v454_v0 }
 0x102   : > { %v653_v5 = vrot.slane %v548_v2, %v6335_v47 }
 0x103   : > { %v631_v7 = vrot.slane %v544_v4, %v6335_v47  ;;  %v475_v10 = vpop.xlane.xlu1 %474 }
 0x104   : > { %v472_v11 = vpop.xlane.xlu0 %471  ;;  %v654_v12 = vsel %vm632_vm3, %v653_v5, %v649_v50  ;;  %v551_v14 = vmul.f32 0.020408163, %v475_v10 }
 0x105   : > { %v633_v13 = vsel %vm632_vm3, %v631_v7, %v626_v42  ;;  %v550_v15 = vmul.f32 0.020408163, %v472_v11 }
 0x106   : > { %v667_v16 = vrot.slane %v551_v14, %v6316_v20 }
 0x107   : > { %v663_v18 = vrot.slane %v550_v15, %v6313_v17  ;;  %v340_v21 = vpop.xlane.xlu1 %339 }
 0x108   : > { %v328_v22 = vpop.xlane.xlu0 %327  ;;  %v421_v6 = vmul.f32 0.020408163, %v340_v21 }
 0x109   : > { %v668_v23 = vsel %vm625_vm2, %v667_v16, %v663_v18  ;;  %v417_v24 = vmul.f32 0.020408163, %v328_v22 }
 0x10a   : > { %v929_v25 = vrot.slane %v421_v6, %v6353_v19 }
 0x10b   : > { %v910_v26 = vrot.slane %v417_v24, %v6353_v19  ;;  %v355_v27 = vpop.xlane.xlu1 %354 }
 0x10c   : > { %v349_v28 = vpop.xlane.xlu0 %348  ;;  %v930_v29 = vsel %vm639_vm4, %v929_v25, %v925_v57  ;;  %v426_v35 = vmul.f32 0.020408163, %v355_v27 }
 0x10d   : > { %v911_v30 = vsel %vm639_vm4, %v910_v26, %v906_v58  ;;  %v424_v31 = vmul.f32 0.020408163, %v349_v28 }
 0x10e   : > { %v1045_v34 = vsel %vm774_vm5, %v930_v29, %v911_v30  ;;  %v953_v42 = vrot.slane %v426_v35, %v6313_v17 }
 0x10f   : > { %v943_v36 = vrot.slane %v424_v31, %v6335_v47  ;;  %v457_v37 = vpop.xlane.xlu1 %456 }
 0x110   : > { %v358_v38 = vpop.xlane.xlu0 %357  ;;  %v545_v40 = vmul.f32 0.020408163, %v457_v37 }
 0x111   : > { %v944_v39 = vsel %vm632_vm3, %v943_v36, %v939_v1  ;;  %v427_v41 = vmul.f32 0.020408163, %v358_v38 }
 0x112   : > { %v638_v43 = vrot.slane %v545_v40, %v6353_v19 }
 0x113   : > { %v957_v44 = vrot.slane %v427_v41, %v6316_v20  ;;  %v478_v45 = vpop.xlane.xlu1 %477 }
 0x114   : > { %v469_v46 = vpop.xlane.xlu0 %468  ;;  %v640_v48 = vsel %vm639_vm4, %v638_v43, %v633_v13  ;;  %v552_v50 = vmul.f32 0.020408163, %v478_v45 }
 0x115   : > { %v958_v49 = vsel %vm625_vm2, %v957_v44, %v953_v42  ;;  %v549_v51 = vmul.f32 0.020408163, %v469_v46 }
 0x116   : > { %v672_v52 = vrot.slane %v552_v50, %v6335_v47 }
 0x117   : > { %v658_v53 = vrot.slane %v549_v51, %v6353_v19  ;;  %v487_v54 = vpop.xlane.xlu1 %486 }
 0x118   : > { %v484_v55 = vpop.xlane.xlu0 %483  ;;  %v673_v56 = vsel %vm632_vm3, %v672_v52, %v668_v23  ;;  %v555_v58 = vmul.f32 0.020408163, %v487_v54 }
 0x119   : > { %v659_v57 = vsel %vm639_vm4, %v658_v53, %v654_v12  ;;  %v554_v59 = vmul.f32 0.020408163, %v484_v55 }
 0x11a   : > { %v775_v60 = vsel %vm774_vm5, %v659_v57, %v640_v48  ;;  %v686_v61 = vrot.slane %v555_v58, %v6316_v20 }
 0x11b   : > { %v682_v62 = vrot.slane %v554_v59, %v6313_v17  ;;  %v361_v63 = vpop.xlane.xlu1 %360 }
 0x11c   : > { %v352_v0 = vpop.xlane.xlu0 %351  ;;  %v428_v2 = vmul.f32 0.020408163, %v361_v63 }
 0x11d   : > { %v687_v1 = vsel %vm625_vm2, %v686_v61, %v682_v62  ;;  %v425_v4 = vmul.f32 0.020408163, %v352_v0 }
 0x11e   : > { %v962_v5 = vrot.slane %v428_v2, %v6335_v47 }
 0x11f   : > { %v948_v7 = vrot.slane %v425_v4, %v6353_v19  ;;  %v370_v8 = vpop.xlane.xlu1 %369 }
 0x120   : > { %v367_v10 = vpop.xlane.xlu0 %366  ;;  %v963_v11 = vsel %vm632_vm3, %v962_v5, %v958_v49 }
 0x121   : > { %v949_v12 = vsel %vm639_vm4, %v948_v7, %v944_v39  ;;  %v430_v57 = vmul.f32 0.020408163, %v367_v10 }
 0x122   : > { %v1046_v13 = vsel %vm776_vm6, %v949_v12, %v1045_v34 }
 0x123   : > { %v490_v14 = vpop.xlane.xlu1 %489 }
 0x124   : > { %v481_v15 = vpop.xlane.xlu0 %480  ;;  %v556_v28 = vmul.f32 0.020408163, %v490_v14 }
 0x125   : > { %v553_v16 = vmul.f32 0.020408163, %v481_v15 }
 0x126   : > { %v691_v35 = vrot.slane %v556_v28, %v6335_v47 }
 0x127   : > { %v677_v18 = vrot.slane %v553_v16, %v6353_v19  ;;  %v499_v21 = vpop.xlane.xlu1 %498 }
 0x128   : > { %v496_v22 = vpop.xlane.xlu0 %495  ;;  %v692_v40 = vsel %vm632_vm3, %v691_v35, %v687_v1 }
 0x129   : > { %v678_v23 = vsel %vm639_vm4, %v677_v18, %v673_v56  ;;  %v431_v56 = vmul.f32 0.020408163, %v370_v8  ;;  %v558_v61 = vmul.f32 0.020408163, %v496_v22 }
 0x12a   : > { %v777_v6 = vsel %vm776_vm6, %v678_v23, %v775_v60  ;;  %v559_v60 = vmul.f32 0.020408163, %v499_v21 }
 0x12b   : > { %v373_v24 = vpop.xlane.xlu1 %372  ;;  %v976_v5 = vrot.slane %v431_v56, %v6316_v20  ;;  %v701_v10 = vrot.slane %v558_v61, %v6313_v17 }
 0x12c   : > { %v364_v25 = vpop.xlane.xlu0 %363  ;;  %v432_v62 = vmul.f32 0.020408163, %v373_v24  ;;  %v705_v8 = vrot.slane %v559_v60, %v6316_v20 }
 0x12d   : > { %v429_v26 = vmul.f32 0.020408163, %v364_v25 }
 0x12e   : > { %v981_v15 = vrot.slane %v432_v62, %v6335_v47 }
 0x12f   : > { %v967_v27 = vrot.slane %v429_v26, %v6353_v19  ;;  %v382_v29 = vpop.xlane.xlu1 %381 }
 0x130   : > { %v379_v30 = vpop.xlane.xlu0 %378  ;;  %v435_v63 = vmul.f32 0.020408163, %v382_v29 }
 0x131   : > { %v968_v31 = vsel %vm639_vm4, %v967_v27, %v963_v11  ;;  %v434_v0 = vmul.f32 0.020408163, %v379_v30  ;;  %v706_v30 = vsel %vm625_vm2, %v705_v8, %v701_v10 }
 0x132   : > { %v6387_v34 = vsel %vm778_vm7, %v968_v31, %v1046_v13  ;;  %v972_v13 = vrot.slane %v430_v57, %v6313_v17  ;;  %v995_v16 = vrot.slane %v435_v63, %v6316_v20 }
 0x133   : > { %v502_v36 = vpop.xlane.xlu1 %501  ;;  %v991_v18 = vrot.slane %v434_v0, %v6313_v17 }
 0x134   : > { %v493_v37 = vpop.xlane.xlu0 %492  ;;  %v560_v1 = vmul.f32 0.020408163, %v502_v36  ;;  %v977_v29 = vsel %vm625_vm2, %v976_v5, %v972_v13 }
 0x135   : > { %v557_v38 = vmul.f32 0.020408163, %v493_v37  ;;  %v982_v36 = vsel %vm632_vm3, %v981_v15, %v977_v29  ;;  %v996_v37 = vsel %vm625_vm2, %v995_v16, %v991_v18 }
 0x136   : > { %v710_v21 = vrot.slane %v560_v1, %v6335_v47 }
 0x137   : > { %v696_v39 = vrot.slane %v557_v38, %v6353_v19  ;;  %v511_v41 = vpop.xlane.xlu1 %510 }
 0x138   : > { %v508_v42 = vpop.xlane.xlu0 %507  ;;  %v563_v2 = vmul.f32 0.020408163, %v511_v41 }
 0x139   : > { %v697_v43 = vsel %vm639_vm4, %v696_v39, %v692_v40  ;;  %v562_v4 = vmul.f32 0.020408163, %v508_v42  ;;  %v711_v40 = vsel %vm632_vm3, %v710_v21, %v706_v30 }
 0x13a   : > { %v6394_v44 = vsel %vm778_vm7, %v697_v43, %v777_v6  ;;  %v724_v22 = vrot.slane %v563_v2, %v6316_v20 }
 0x13b   : > { %v385_v45 = vpop.xlane.xlu1 %384  ;;  %v720_v23 = vrot.slane %v562_v4, %v6313_v17 }
 0x13c   : > { %v376_v46 = vpop.xlane.xlu0 %375  ;;  %v436_v7 = vmul.f32 0.020408163, %v385_v45 }
 0x13d   : > { %v433_v14 = vmul.f32 0.020408163, %v376_v46  ;;  %v725_v41 = vsel %vm625_vm2, %v724_v22, %v720_v23 }
 0x13e   : > { %v1000_v25 = vrot.slane %v436_v7, %v6335_v47 }
 0x13f   : > { %v394_v48 = vpop.xlane.xlu1 %393  ;;  %v986_v31 = vrot.slane %v433_v14, %v6353_v19 }
 0x140   : > { %v391_v49 = vpop.xlane.xlu0 %390  ;;  %v439_v6 = vmul.f32 0.020408163, %v394_v48  ;;  %v1001_v45 = vsel %vm632_vm3, %v1000_v25, %v996_v37 }
 0x141   : > { %v438_v24 = vmul.f32 0.020408163, %v391_v49 }
 0x142   : > { %v1014_v42 = vrot.slane %v439_v6, %v6316_v20 }
 0x143   : > { %v514_v50 = vpop.xlane.xlu1 %513  ;;  %v1010_v43 = vrot.slane %v438_v24, %v6313_v17 }
 0x144   : > { %v505_v51 = vpop.xlane.xlu0 %504  ;;  %v564_v26 = vmul.f32 0.020408163, %v514_v50 }
 0x145   : > { %v561_v35 = vmul.f32 0.020408163, %v505_v51  ;;  %v1015_v0 = vsel %vm625_vm2, %v1014_v42, %v1010_v43 }
 0x146   : > { %v729_v46 = vrot.slane %v564_v26, %v6335_v47 }
 0x147   : > { %v523_v52 = vpop.xlane.xlu1 %522 }
 0x148   : > { %v520_v53 = vpop.xlane.xlu0 %519  ;;  %v567_v38 = vmul.f32 0.020408163, %v523_v52  ;;  %v987_v52 = vsel %vm639_vm4, %v986_v31, %v982_v36  ;;  %v730_v2 = vsel %vm632_vm3, %v729_v46, %v725_v41 }
 0x149   : > { %v566_v39 = vmul.f32 0.020408163, %v520_v53  ;;  %v715_v53 = vrot.slane %v561_v35, %v6353_v19 }
 0x14a   : > { %v743_v60 = vrot.slane %v567_v38, %v6316_v20 }
 0x14b   : > { %v397_v54 = vpop.xlane.xlu1 %396  ;;  %v739_v61 = vrot.slane %v566_v39, %v6313_v17 }
 0x14c   : > { %v388_v55 = vpop.xlane.xlu0 %387  ;;  %v440_v48 = vmul.f32 0.020408163, %v397_v54 }
 0x14d   : > { %v437_v49 = vmul.f32 0.020408163, %v388_v55  ;;  %v744_v14 = vsel %vm625_vm2, %v743_v60, %v739_v61  ;;  %v1131_v60 = vld [vmem:[#allocation6 + $0x48] sm:$0xff]  ;;  %v1216_v61 = vld [vmem:[#allocation6 + $0x70] sm:$0xff] }
 0x14e   : > { %v1019_v4 = vrot.slane %v440_v48, %v6335_v47 }
 0x14f   : > { %v406_v58 = vpop.xlane.xlu1 %405  ;;  %v1005_v5 = vrot.slane %v437_v49, %v6353_v19 }
 0x150   : > { %v403_v59 = vpop.xlane.xlu0 %402  ;;  %v443_v62 = vmul.f32 0.020408163, %v406_v58  ;;  %v1020_v6 = vsel %vm632_vm3, %v1019_v4, %v1015_v0  ;;  %v4937_v0 = vld [vmem:[#allocation6 + $0x40] ss:$0 sm:$0xff] }
 0x151   : > { %v442_v54 = vmul.f32 0.020408163, %v403_v59  ;;  %v716_v59 = vsel %vm639_vm4, %v715_v53, %v711_v40  ;;  %v1006_v24 = vsel %vm639_vm4, %v1005_v5, %v1001_v45  ;;  %v1218_v53 = vld [vmem:[#allocation6 + $0x80] sm:$0xff]  ;;  %v6483_v5 = vld [vmem:[%s6145_s23 + $0x10] sm:$0xff] }
 0x152   : > { %v1033_v15 = vrot.slane %v443_v62, %v6316_v20  ;;  %v781_v35 = vsel %vm780_vm8, %v716_v59, %v6394_v44 }
 0x153   : > { %v526_v11 = vpop.xlane.xlu1 %525  ;;  %v1029_v18 = vrot.slane %v442_v54, %v6313_v17 }
 0x154   : > { %v517_v12 = vpop.xlane.xlu0 %516  ;;  %v568_v56 = vmul.f32 0.020408163, %v526_v11 }
 0x155   : > { %v565_v57 = vmul.f32 0.020408163, %v517_v12 }
 0x156   : > { %v748_v58 = vrot.slane %v568_v56, %v6335_v47  ;;  %v1132_v56 = vld [vmem:[#allocation6 + $0x50] sm:$0xff] }
 0x157   : > { %v535_v27 = vpop.xlane.xlu1 %534  ;;  %v734_v13 = vrot.slane %v565_v57, %v6353_v19  ;;  %v1217_v57 = vld [vmem:[#allocation6 + $0x78] sm:$0xff] }
 0x158   : > { %v532_v28 = vpop.xlane.xlu0 %531  ;;  %v571_v55 = vmul.f32 0.020408163, %v535_v27  ;;  %v749_v29 = vsel %vm632_vm3, %v748_v58, %v744_v14  ;;  %v4938_v58 = vld [vmem:[#allocation6 + $0x68] ss:$0 sm:$0xff] }
 0x159   : > { %v570_v1 = vmul.f32 0.020408163, %v532_v28  ;;  %v735_v30 = vsel %vm639_vm4, %v734_v13, %v730_v2  ;;  %v4940_v13 = vld [vmem:[#allocation6 + $0x90] ss:$0 sm:$0xff] }
 0x15a   : > { %v762_v21 = vrot.slane %v571_v55, %v6316_v20 }
 0x15b   : > { %v409_v50 = vpop.xlane.xlu1 %408  ;;  %v758_v22 = vrot.slane %v570_v1, %v6313_v17  ;;  %v1048_v17 = vsel %vm780_vm8, %v987_v52, %v6387_v34  ;;  %v783_v34 = vsel %vm782_vm9, %v735_v30, %v781_v35  ;;  %v1133_v52 = vld [vmem:[#allocation6 + $0x58] sm:$0xff] }
 0x15c   : > { %v400_v51 = vpop.xlane.xlu0 %399  ;;  %v444_v7 = vmul.f32 0.020408163, %v409_v50  ;;  %v1049_v44 = vsel %vm782_vm9, %v1006_v24, %v1048_v17  ;;  %v1134_v50 = vld [vmem:[#allocation6 + $0x60] sm:$0xff] }
 0x15d   : > { %v441_v63 = vmul.f32 0.020408163, %v400_v51  ;;  %v763_v38 = vsel %vm625_vm2, %v762_v21, %v758_v22  ;;  %v1219_v51 = vld [vmem:[#allocation6 + $0x88] sm:$0xff] }
 0x15e   : > { %v1038_v25 = vrot.slane %v444_v7, %v6335_v47  ;;  %v6487_v7 = vld [vmem:[%s6145_s23 + $0x30] sm:$0xff] }
 0x15f   : > { %v538_v11 = vpop.xlane.xlu1 %537  ;;  %v1024_v16 = vrot.slane %v441_v63, %v6353_v19 }
 0x160   : > { %v529_v12 = vpop.xlane.xlu0 %528  ;;  %v572_v8 = vmul.f32 0.020408163, %v538_v11  ;;  %v6504_v11 = vld [vmem:[%s6145_s23] sm:$0xff] }
 0x161   : > { %v569_v10 = vmul.f32 0.020408163, %v529_v12  ;;  %v1025_v36 = vsel %vm639_vm4, %v1024_v16, %v1020_v6  ;;  %v6510_v12 = vld [vmem:[%s6145_s23 + $0x20] sm:$0xff] }
 0x162   : > { %v767_v26 = vrot.slane %v572_v8, %v6335_v47  ;;  %v1034_v47 = vsel %vm625_vm2, %v1033_v15, %v1029_v18  ;;  %v1050_v48 = vsel %vm784_vm10, %v1025_v36, %v1049_v44  ;;  %vm2901_vm2 = vcmask 396288  }
 0x163   : > { %v753_v23 = vrot.slane %v569_v10, %v6353_v19  ;;  %v541_v27 = vpop.xlane.xlu1 %540  ;;  %v1039_v41 = vsel %vm632_vm3, %v1038_v25, %v1034_v47 }
 0x164   : > { %v412_v28 = vpop.xlane.xlu0 %411  ;;  %v573_v31 = vmul.f32 0.020408163, %v541_v27  ;;  %v768_v42 = vsel %vm632_vm3, %v767_v26, %v763_v38  ;;  %vm4796_vm3 = vcmask 400388  }
 0x165   : > { %v445_v20 = vmul.f32 0.020408163, %v412_v28  ;;  %v754_v37 = vsel %vm639_vm4, %v753_v23, %v749_v29 }
 0x166   : > { %v772_v39 = vrot.slane %v573_v31, %v6353_v19  ;;  %v785_v45 = vsel %vm784_vm10, %v754_v37, %v783_v34 }
 0x167   : > { %v1043_v40 = vrot.slane %v445_v20, %v6353_v19 }
 0x168   : > { %v773_v43 = vsel %vm639_vm4, %v772_v39, %v768_v42 }
 0x169   : > { %v1044_v46 = vsel %vm639_vm4, %v1043_v40, %v1039_v41  ;;  %v787_v49 = vsel %vm786_vm11, %v773_v43, %v785_v45 }
 0x16a   : > { %v1051_v19 = vsel %vm786_vm11, %v1044_v46, %v1050_v48  ;;  %5258 = vmatmul.mubr.msk.f32.vlgmr.msra.gmra.mxu0 %vm788_vm12, %v787_v49 }
 0x16b   : > { %5269 = vmatmul.mubr.msk.f32.vlgmr.msra.gmra.mxu1 %vm788_vm12, %v1051_v19  ;;  %5279 = vmatprep.mubr.msk.f32.mxu0 %vm5973_vm1, %v7381_v3 }
 0x16c   : > { %5290 = vmatprep.mubr.msk.f32.mxu1 %vm5973_vm1, %v7381_v3  ;;  %5272 = vmatpush3.msra.mxu0 %v1134_v50 }
 0x16d   : > { %5283 = vmatpush3.msra.mxu1 %v1219_v51  ;;  %5273 = vmatprep.subr.mxu0 %v7381_v3 }
 0x16e   : > { %5284 = vmatprep.subr.mxu1 %v7381_v3  ;;  %5274 = vmatpush3.msra.mxu0 %v1133_v52 }
 0x16f   : > { %5285 = vmatpush3.msra.mxu1 %v1218_v53  ;;  %5275 = vmatprep.subr.mxu0 %v7381_v3 }
 0x170   : > { %5286 = vmatprep.subr.mxu1 %v7381_v3  ;;  %5276 = vmatpush3.msra.mxu0 %v1132_v56 }
 0x171   : > { %5287 = vmatpush3.msra.mxu1 %v1217_v57  ;;  %5277 = vmatprep.subr.mxu0 %v7381_v3 }
 0x172   : > { %5288 = vmatprep.subr.mxu1 %v7381_v3  ;;  %5278 = vmatpush3.msra.mxu0 %v1131_v60 }
 0x173   : > { %5289 = vmatpush3.msra.mxu1 %v1216_v61  ;;  %5293 = vmatprep.subr.mxu0 %v7381_v3 }
 0x174   : > { %5304 = vmatprep.subr.mxu1 %v7381_v3 }
 0x22a   : > { %v857_v62 = vpop.f32.mrf.mxu0 }
 0x22b   : > { %v1120_v63 = vpop.f32.mrf.mxu1 }
 0x22c   : > { %v1121_v54 = vadd.f32 %v1120_v63, %v857_v62  ;;  %v5259_v55 = vpop.f32.mrf.mxu0 }
 0x22d   : > { %v5270_v1 = vpop.f32.mrf.mxu1 }
 0x22e   : > { %v1129_v2 = vadd.f32 %v4937_v0, %v1121_v54 }
 0x230   : > { %v1130_v4 = vmax.f32 %v1129_v2, 0.0 }
 0x232   : > { %5280 = vmatmul.mubr.msk.f32.vlgmr.msra.gmra.mxu0 %vm788_vm12, %v1130_v4  ;;  %5291 = vmatmul.mubr.msk.f32.vlgmr.msra.gmra.mxu1 %vm788_vm12, %v1130_v4 }
 0x233   : > { %5294 = vmatpush3.msra.mxu0 %v6198_v33  ;;  %5305 = vmatpush3.msra.mxu1 %v6195_v32  ;;  %v6493_v33 = vld [vmem:[%s6145_s23 + $0x8] sm:$0xff] }
 0x234   : > { %5295 = vmatprep.subr.mxu0 %v7381_v3  ;;  %5306 = vmatprep.subr.mxu1 %v7381_v3  ;;  %v6497_v32 = vld [vmem:[%s6145_s23 + $0x28] sm:$0xff] }
 0x235   : > { %5296 = vmatpush3.msra.mxu0 %v6483_v5  ;;  %5307 = vmatpush3.msra.mxu1 %v6487_v7 }
 0x236   : > { %5297 = vmatprep.subr.mxu0 %v7381_v3  ;;  %5308 = vmatprep.subr.mxu1 %v7381_v3 }
 0x237   : > { %5298 = vmatpush3.msra.mxu0 %v6493_v33  ;;  %5309 = vmatpush3.msra.mxu1 %v6497_v32 }
 0x238   : > { %5299 = vmatprep.subr.mxu0 %v7381_v3  ;;  %5301 = vmatprep.mubr.msk.f32.mxu0 %vm5973_vm1, %v7381_v3 }
 0x239   : > { %5300 = vmatpush3.msra.mxu0 %v6504_v11  ;;  %5310 = vmatprep.subr.mxu1 %v7381_v3 }
 0x23a   : > { %5315 = vmatprep.subr.mxu0 %v7381_v3  ;;  %5311 = vmatpush3.msra.mxu1 %v6510_v12 }
 0x23b   : > { %5312 = vmatprep.mubr.msk.f32.mxu1 %vm5973_vm1, %v7381_v3  ;;  %5326 = vmatprep.subr.mxu1 %v7381_v3 }
 0x2f2   : > { %v1209_v8 = vpop.f32.mrf.mxu0  ;;  %v1291_v10 = vpop.f32.mrf.mxu1 }
 0x2f3   : > { %v1210_v59 = vadd.f32 %v4938_v58, %v1209_v8  ;;  %v1292_v14 = vadd.f32 %v4940_v13, %v1291_v10 }
 0x2f4   : > { %v5281_v15 = vpop.f32.mrf.mxu0  ;;  %v5292_v16 = vpop.f32.mrf.mxu1 }
 0x2f5   : > { %v1301_v18 = vsel %vm1300_vm13, %v1210_v59, 0.0  ;;  %v1214_v21 = vcombine.high %v1210_v59, %v1210_v59  ;;  %v1296_v23 = vcombine.high %v1292_v14, %v1292_v14  ;;  %v1380_v6 = vsel %vm1300_vm13, %v1292_v14, 0.0 }
 0x2f6   : > { %1302 = vadd.xlane.f32.xlu0 %v1301_v18 }
 0x2f7   : > { %v1304_v22 = vsel %vm1300_vm13, %v1214_v21, 0.0  ;;  %v1383_v24 = vsel %vm1300_vm13, %v1296_v23, 0.0 }
 0x2f8   : > { %1305 = vadd.xlane.f32.xlu1 %v1304_v22 }
 0x2fa   : > { %1381 = vadd.xlane.f32.xlu0 %v1380_v6 }
 0x2fc   : > { %1384 = vadd.xlane.f32.xlu1 %v1383_v24 }
 0x37f   : > { %v1303_v25 = vpop.xlane.xlu0 %1302 }
 0x380   : > { %v1308_v26 = vmul.f32 0.03125, %v1303_v25 }
 0x381   : > { %v1306_v27 = vpop.xlane.xlu1 %1305 }
 0x382   : > { %v1311_v28 = vsel %vm1310_vm14, %v1308_v26, 0.0  ;;  %v1309_v29 = vmul.f32 0.03125, %v1306_v27 }
 0x383   : > { %v1312_v30 = vrot.slane %v1311_v28, 4  ;;  %v1382_v31 = vpop.xlane.xlu0 %1381 }
 0x384   : > { %v1318_v20 = vsel %vm1310_vm14, %v1309_v29, 0.0  ;;  %v1386_v17 = vmul.f32 0.03125, %v1382_v31 }
 0x385   : > { %v1313_v35 = vadd.f32 %v1312_v30, %v1311_v28  ;;  %v1319_v36 = vrot.slane %v1318_v20, 4  ;;  %v1385_v37 = vpop.xlane.xlu1 %1384 }
 0x386   : > { %v1388_v47 = vsel %vm1310_vm14, %v1386_v17, 0.0  ;;  %v1387_v38 = vmul.f32 0.03125, %v1385_v37 }
 0x387   : > { %v1314_v39 = vrot.slane %v1313_v35, 2  ;;  %v1320_v40 = vadd.f32 %v1319_v36, %v1318_v20  ;;  %v1389_v41 = vrot.slane %v1388_v47, 4 }
 0x388   : > { %v1395_v42 = vsel %vm1310_vm14, %v1387_v38, 0.0 }
 0x389   : > { %v1315_v34 = vadd.f32 %v1314_v39, %v1313_v35  ;;  %v1321_v44 = vrot.slane %v1320_v40, 2  ;;  %v1390_v43 = vadd.f32 %v1389_v41, %v1388_v47  ;;  %v1396_v45 = vrot.slane %v1395_v42, 4 }
 0x38b   : > { %v1316_v46 = vrot.slane %v1315_v34, 1  ;;  %v1322_v48 = vadd.f32 %v1321_v44, %v1320_v40  ;;  %v1391_v49 = vrot.slane %v1390_v43, 2  ;;  %v1397_v19 = vadd.f32 %v1396_v45, %v1395_v42 }
 0x38d   : > { %v1323_v50 = vrot.slane %v1322_v48, 1  ;;  %v1392_v51 = vadd.f32 %v1391_v49, %v1390_v43  ;;  %v1398_v52 = vrot.slane %v1397_v19, 2  ;;  %v1317_v53 = vadd.f32 %v1316_v46, %v1315_v34 }
 0x38f   : > { %v1393_v56 = vrot.slane %v1392_v51, 1  ;;  %v1399_v57 = vadd.f32 %v1398_v52, %v1397_v19  ;;  %v1326_v60 = vmul.f32 0.25, %v1317_v53  ;;  %v1324_v61 = vadd.f32 %v1323_v50, %v1322_v48 }
 0x391   : > { %v1400_v62 = vrot.slane %v1399_v57, 1  ;;  %v6524_v63 = vsub.f32 %v1210_v59, %v1326_v60  ;;  %v1327_v0 = vmul.f32 0.25, %v1324_v61  ;;  %v1394_v54 = vadd.f32 %v1393_v56, %v1392_v51 }
 0x393   : > { %v1330_v55 = vmul.f32 %v6524_v63, %v6524_v63  ;;  %v6528_v1 = vsub.f32 %v1214_v21, %v1327_v0  ;;  %v1402_v2 = vmul.f32 0.25, %v1394_v54  ;;  %v1401_v4 = vadd.f32 %v1400_v62, %v1399_v57  ;;  %v1298_v62 = vld [vmem:[#allocation6 + $0x98] sm:$0xf] }
 0x395   : > { %v1332_v58 = vsel %vm1300_vm13, %v1330_v55, 0.0  ;;  %v1331_v13 = vmul.f32 %v6528_v1, %v6528_v1  ;;  %v6533_v8 = vsub.f32 %v1292_v14, %v1402_v2  ;;  %v1403_v10 = vmul.f32 0.25, %v1401_v4  ;;  %v1299_v4 = vld [vmem:[#allocation6 + $0xa0] sm:$0xf] }
 0x396   : > { %1333 = vadd.xlane.f32.xlu0 %v1332_v58 }
 0x397   : > { %v1335_v59 = vsel %vm1300_vm13, %v1331_v13, 0.0  ;;  %v1406_v15 = vmul.f32 %v6533_v8, %v6533_v8  ;;  %v6538_v16 = vsub.f32 %v1296_v23, %v1403_v10 }
 0x398   : > { %1336 = vadd.xlane.f32.xlu1 %v1335_v59 }
 0x399   : > { %v1408_v18 = vsel %vm1300_vm13, %v1406_v15, 0.0  ;;  %v1407_v21 = vmul.f32 %v6538_v16, %v6538_v16 }
 0x39a   : > { %1409 = vadd.xlane.f32.xlu0 %v1408_v18 }
 0x39b   : > { %v1411_v22 = vsel %vm1300_vm13, %v1407_v21, 0.0 }
 0x39c   : > { %1412 = vadd.xlane.f32.xlu1 %v1411_v22 }
 0x41f   : > { %v1334_v14 = vpop.xlane.xlu0 %1333 }
 0x420   : > { %v1338_v6 = vmul.f32 0.03125, %v1334_v14 }
 0x421   : > { %v1337_v24 = vpop.xlane.xlu1 %1336 }
 0x422   : > { %v1340_v25 = vsel %vm1310_vm14, %v1338_v6, 0.0  ;;  %v1339_v26 = vmul.f32 0.03125, %v1337_v24 }
 0x423   : > { %v1341_v27 = vrot.slane %v1340_v25, 4  ;;  %v1410_v28 = vpop.xlane.xlu0 %1409 }
 0x424   : > { %v1347_v23 = vsel %vm1310_vm14, %v1339_v26, 0.0  ;;  %v1414_v29 = vmul.f32 0.03125, %v1410_v28  ;;  %v1378_v28 = vld [vmem:[#allocation6 + $0xa8] sm:$0xf] }
 0x425   : > { %v1342_v30 = vadd.f32 %v1341_v27, %v1340_v25  ;;  %v1348_v31 = vrot.slane %v1347_v23, 4  ;;  %v1413_v44 = vpop.xlane.xlu1 %1412 }
 0x426   : > { %v1416_v20 = vsel %vm1310_vm14, %v1414_v29, 0.0  ;;  %v1415_v19 = vmul.f32 0.03125, %v1413_v44  ;;  %v1379_v29 = vld [vmem:[#allocation6 + $0xb0] sm:$0xf] }
 0x427   : > { %v1343_v17 = vrot.slane %v1342_v30, 2  ;;  %v1349_v35 = vadd.f32 %v1348_v31, %v1347_v23  ;;  %v1417_v36 = vrot.slane %v1416_v20, 4 }
 0x428   : > { %v1423_v52 = vsel %vm1310_vm14, %v1415_v19, 0.0 }
 0x429   : > { %v1344_v37 = vadd.f32 %v1343_v17, %v1342_v30  ;;  %v1350_v47 = vrot.slane %v1349_v35, 2  ;;  %v1418_v38 = vadd.f32 %v1417_v36, %v1416_v20  ;;  %v1424_v53 = vrot.slane %v1423_v52, 4 }
 0x42a   : > { %v5974_v30 = vmov 1966171168  }
 0x42b   : > { %v1345_v39 = vrot.slane %v1344_v37, 1  ;;  %v1351_v40 = vadd.f32 %v1350_v47, %v1349_v35  ;;  %v1419_v34 = vrot.slane %v1418_v38, 2  ;;  %v1425_v57 = vadd.f32 %v1424_v53, %v1423_v52  ;;  %v6604_v53 = vld [vmem:[%s6145_s23 + $0x60] sm:$0xff] }
 0x42c   : > { %v1457_v31 = vunpack.c.l.s4 %v5974_v30 }
 0x42d   : > { %v1346_v41 = vadd.f32 %v1345_v39, %v1344_v37  ;;  %v1352_v42 = vrot.slane %v1351_v40, 1  ;;  %v1420_v49 = vadd.f32 %v1419_v34, %v1418_v38  ;;  %v1426_v0 = vrot.slane %v1425_v57, 2  ;;  %v6563_v34 = vld [vmem:[%s6145_s23 + $0x58] sm:$0xff] }
 0x42e   : > { %v1458_v35 = vunpack.c.0.s8 %v1457_v31  ;;  %v6717_v31 = vld [vmem:[%s6152_s26 + $0x10] sm:$0xff] }
 0x42f   : > { %v1354_v43 = vmul.f32 0.25, %v1346_v41  ;;  %v1353_v45 = vadd.f32 %v1352_v42, %v1351_v40  ;;  %v1421_v51 = vrot.slane %v1420_v49, 1  ;;  %v1427_v10 = vadd.f32 %v1426_v0, %v1425_v57  ;;  %v6619_v0 = vld [vmem:[%s6145_s23 + $0x90] sm:$0xff] }
 0x430   : > { %v6552_v47 = vsub.s32 %v1458_v35, %v6302_v9  ;;  %v6731_v35 = vld [vmem:[%s6152_s26 + $0x30] sm:$0xff] }
 0x431   : > { %v1356_v46 = vadd.f32 1e-05, %v1354_v43  ;;  %v1355_v48 = vmul.f32 0.25, %v1353_v45  ;;  %v1422_v56 = vadd.f32 %v1421_v51, %v1420_v49  ;;  %v1428_v21 = vrot.slane %v1427_v10, 1  ;;  %v6575_v43 = vld [vmem:[%s6145_s23 + $0x78] sm:$0xff]  ;;  %v6581_v45 = vld [vmem:[%s6145_s23 + $0x48] sm:$0xff] }
 0x432   : > { %v6595_v51 = vld [vmem:[%s6145_s23 + $0x68] sm:$0xff] }
 0x433   : > { %5729 = vrsqrt.f32 %v1356_v46  ;;  %v1357_v50 = vadd.f32 1e-05, %v1355_v48  ;;  %v1430_v60 = vmul.f32 0.25, %v1422_v56  ;;  %v1429_v14 = vadd.f32 %v1428_v21, %v1427_v10  ;;  %v6585_v46 = vld [vmem:[%s6145_s23 + $0x70] sm:$0xff]  ;;  %v6646_v10 = vld [vmem:[%s6145_s23 + $0xa8] sm:$0xff] }
 0x434   : > { %v6667_v21 = vld [vmem:[%s6145_s23 + $0xd0] sm:$0xff] }
 0x435   : > { %5731 = vrsqrt.f32 %v1357_v50  ;;  %v1432_v55 = vadd.f32 1e-05, %v1430_v60  ;;  %v1431_v24 = vmul.f32 0.25, %v1429_v14  ;;  %v6591_v50 = vld [vmem:[%s6145_s23 + $0x40] sm:$0xff]  ;;  %v6610_v60 = vld [vmem:[%s6145_s23 + $0x98] sm:$0xff]  ;;  %v6677_v14 = vld [vmem:[%s6145_s23 + $0xc8] sm:$0xff] }
 0x437   : > { %5733 = vrsqrt.f32 %v1432_v55  ;;  %v6629_v55 = vld [vmem:[%s6145_s23 + $0x88] sm:$0xff] }
 0x440   : > { %v5730_v61 = vpop.eup %5729 }
 0x441   : > { %v1360_v54 = vmul.f32 %v5730_v61, %v6524_v63  ;;  %v1433_v63 = vadd.f32 1e-05, %v1431_v24  ;;  %v6687_v24 = vld [vmem:[%s6145_s23 + $0xc0] sm:$0xff] }
 0x442   : > { %v5732_v2 = vpop.eup %5731 }
 0x443   : > { %v1362_v58 = vmul.f32 %v1360_v54, %v1298_v62  ;;  %v1361_v13 = vmul.f32 %v5732_v2, %v6528_v1  ;;  %v6623_v54 = vld [vmem:[%s6145_s23 + $0xb8] sm:$0xff]  ;;  %v6633_v2 = vld [vmem:[%s6145_s23 + $0xb0] sm:$0xff] }
 0x444   : > { %v5734_v25 = vpop.eup %5733 }
 0x445   : > { %v1364_v59 = vadd.f32 %v1362_v58, %v1299_v4  ;;  %v1363_v15 = vmul.f32 %v1361_v13, %v1298_v62  ;;  %v1436_v26 = vmul.f32 %v5734_v25, %v6533_v8  ;;  %v6639_v58 = vld [vmem:[%s6145_s23 + $0x80] sm:$0xff] }
 0x447   : > { %v4942_v18 = vmul.f32 -1.442695, %v1364_v59  ;;  %v1365_v22 = vadd.f32 %v1363_v15, %v1299_v4  ;;  %v1438_v1 = vmul.f32 %v1436_v26, %v1378_v28  ;;  %v6653_v59 = vld [vmem:[%s6145_s23 + $0xa0] sm:$0xff]  ;;  %v6693_v26 = vld [vmem:[%s6145_s23 + $0xe8] sm:$0xff] }
 0x449   : > { %5735 = vpow2.f32 %v4942_v18  ;;  %v4943_v6 = vmul.f32 -1.442695, %v1365_v22  ;;  %v1440_v20 = vadd.f32 %v1438_v1, %v1379_v29  ;;  %v6660_v18 = vld [vmem:[%s6145_s23 + $0xd8] sm:$0xff] }
 0x44a   : > { %v6671_v22 = vld [vmem:[%s6145_s23 + $0xf8] sm:$0xff] }
 0x44b   : > { %5737 = vpow2.f32 %v4943_v6  ;;  %v4944_v36 = vmul.f32 -1.442695, %v1440_v20  ;;  %v6681_v6 = vld [vmem:[%s6145_s23 + $0xf0] sm:$0xff]  ;;  %v6708_v1 = vld [vmem:[%s6152_s26 + $0x18] sm:$0xff] }
 0x44c   : > { %5739 = vrsqrt.f32 %v1433_v63  ;;  %v6721_v20 = vld [vmem:[%s6152_s26 + $0x38] sm:$0xff] }
 0x456   : > { %v5736_v27 = vpop.eup %5735 }
 0x457   : > { %v1372_v23 = vadd.f32 1.0, %v5736_v27 }
 0x458   : > { %v5738_v17 = vpop.eup %5737 }
 0x459   : > { %5741 = vrcp.f32 %v1372_v23  ;;  %v1373_v37 = vadd.f32 1.0, %v5738_v17  ;;  %v5740_v38 = vpop.eup %5739  ;;  %v6727_v17 = vld [vmem:[%s6152_s26 + $0x8] sm:$0xff] }
 0x45a   : > { %5743 = vpow2.f32 %v4944_v36  ;;  %v1437_v40 = vmul.f32 %v5740_v38, %v6538_v16  ;;  %v6571_v16 = vld [vmem:[%s6145_s23 + $0x50] sm:$0xff] }
 0x45b   : > { %5745 = vrcp.f32 %v1373_v37  ;;  %v6737_v37 = vld [vmem:[%s6152_s26] sm:$0xff] }
 0x45c   : > { %v1439_v44 = vmul.f32 %v1437_v40, %v1378_v28  ;;  %v6702_v28 = vld [vmem:[%s6145_s23 + $0xe0] sm:$0xff] }
 0x45d   : > { %v6751_v40 = vld [vmem:[%s6152_s26 + $0x20] sm:$0xff] }
 0x45e   : > { %v1441_v48 = vadd.f32 %v1439_v44, %v1379_v29  ;;  %v6769_v44 = vld [vmem:[%s6152_s26 + $0x78] sm:$0xff] }
 0x460   : > { %v4945_v57 = vmul.f32 -1.442695, %v1441_v48  ;;  %v6775_v48 = vld [vmem:[%s6152_s26 + $0x48] sm:$0xff] }
 0x462   : > { %5747 = vpow2.f32 %v4945_v57  ;;  %v6791_v57 = vld [vmem:[%s6152_s26 + $0x68] sm:$0xff] }
 0x463   : > { %7398 = vst [vmem:[#allocation14_spill] sm:$0xff] %v6791_v57 }
 0x466   : > { %v6554_v8 = vpop.eup %5741 }
 0x467   : > { %7394 = vst [vmem:[#allocation10_spill] sm:$0xff] %v6554_v8  ;;  %v1462_v39 = vrot.slane %v6554_v8, %v6552_v47  ;;  %v5744_v19 = vpop.eup %5743  ;;  %v6873_v8 = vld [vmem:[%s6152_s26 + $0xc8] sm:$0xff] }
 0x468   : > { %v6598_v52 = vpop.eup %5745  ;;  %v1448_v62 = vadd.f32 1.0, %v5744_v19  ;;  %v6785_v19 = vld [vmem:[%s6152_s26 + $0x40] sm:$0xff]  ;;  %7412 = vst [vmem:[#allocation28_spill] sm:$0xff] %v6873_v8 }
 0x469   : > { %v1470_v41 = vrot.slane %v1462_v39, %v6552_v47  ;;  %v1463_v42 = vcombine.high %v1462_v39, %v1462_v39  ;;  %7395 = vst [vmem:[#allocation11_spill] sm:$0xff] %v6598_v52  ;;  %v1486_v61 = vrot.slane %v6598_v52, %v6552_v47  ;;  %v6744_v39 = vld [vmem:[%s6152_s26 + $0x28] sm:$0xff]  ;;  %7397 = vst [vmem:[#allocation13_spill] sm:$0xff] %v6785_v19  ;;  %v6863_v52 = vld [vmem:[%s6152_s26 + $0xd0] sm:$0xff] }
 0x46a   : > { %5749 = vrcp.f32 %v1448_v62  ;;  %v6800_v62 = vld [vmem:[%s6152_s26 + $0x60] sm:$0xff]  ;;  %7410 = vst [vmem:[#allocation26_spill] sm:$0xff] %v6863_v52 }
 0x46b   : > { %5302 = vmatmul.mubr.msk.f32.vlgmr.msra.gmra.mxu0 %vm788_vm12, %v1470_v41  ;;  %v1477_v9 = vrot.slane %v1463_v42, %v6552_v47  ;;  %v1478_v49 = vcombine.high %v1470_v41, %v1470_v41  ;;  %v1487_v4 = vcombine.high %v1486_v61, %v1486_v61  ;;  %v1494_v13 = vrot.slane %v1486_v61, %v6552_v47  ;;  %v6758_v42 = vld [vmem:[%s6152_s26 + $0x58] sm:$0xff] }
 0x46c   : > { %5316 = vmatpush3.msra.mxu0 %v6563_v34  ;;  %5323 = vmatprep.mubr.msk.f32.mxu0 %vm5973_vm1, %v7381_v3  ;;  %7400 = vst [vmem:[#allocation16_spill] sm:$0xff] %v6800_v62 }
 0x46d   : > { %5317 = vmatprep.subr.mxu0 %v7381_v3  ;;  %5313 = vmatmul.mubr.msk.f32.vlgmr.msra.gmra.mxu1 %vm788_vm12, %v1477_v9  ;;  %v1479_v56 = vcombine.high %v1477_v9, %v1477_v9  ;;  %v1501_v15 = vrot.slane %v1487_v4, %v6552_v47  ;;  %v1502_v25 = vcombine.high %v1494_v13, %v1494_v13  ;;  %v6765_v9 = vld [vmem:[%s6152_s26 + $0x50] sm:$0xff] }
 0x46e   : > { %5318 = vmatpush3.msra.mxu0 %v6571_v16  ;;  %5327 = vmatpush3.msra.mxu1 %v6575_v43 }
 0x46f   : > { %5319 = vmatprep.subr.mxu0 %v7381_v3  ;;  %5328 = vmatprep.subr.mxu1 %v7381_v3  ;;  %v5748_v63 = vpop.eup %5747  ;;  %v1503_v23 = vcombine.high %v1501_v15, %v1501_v15 }
 0x470   : > { %5320 = vmatpush3.msra.mxu0 %v6581_v45  ;;  %5329 = vmatpush3.msra.mxu1 %v6585_v46  ;;  %v1449_v30 = vadd.f32 1.0, %v5748_v63  ;;  %v6819_v63 = vld [vmem:[%s6152_s26 + $0xb8] sm:$0xff] }
 0x471   : > { %5321 = vmatprep.subr.mxu0 %v7381_v3  ;;  %5330 = vmatprep.subr.mxu1 %v7381_v3  ;;  %7403 = vst [vmem:[#allocation19_spill] sm:$0xff] %v6819_v63 }
 0x472   : > { %5322 = vmatpush3.msra.mxu0 %v6591_v50  ;;  %5331 = vmatpush3.msra.mxu1 %v6595_v51  ;;  %5751 = vrcp.f32 %v1449_v30 }
 0x473   : > { %5324 = vmatmul.mubr.msk.f32.vlgmr.msra.gmra.mxu0 %vm788_vm12, %v1478_v49  ;;  %5332 = vmatprep.subr.mxu1 %v7381_v3  ;;  %v6779_v49 = vld [vmem:[%s6152_s26 + $0x70] sm:$0xff] }
 0x474   : > { %5337 = vmatprep.subr.mxu0 %v7381_v3  ;;  %5333 = vmatpush3.msra.mxu1 %v6604_v53 }
 0x475   : > { %5334 = vmatprep.mubr.msk.f32.mxu1 %vm5973_vm1, %v7381_v3  ;;  %5338 = vmatpush3.msra.mxu0 %v6610_v60 }
 0x476   : > { %5335 = vmatmul.mubr.msk.f32.vlgmr.msra.gmra.mxu1 %vm788_vm12, %v1479_v56  ;;  %5339 = vmatprep.subr.mxu0 %v7381_v3 }
 0x477   : > { %5348 = vmatprep.subr.mxu1 %v7381_v3  ;;  %5340 = vmatpush3.msra.mxu0 %v6619_v0  ;;  %v6696_v27 = vpop.eup %5749 }
 0x478   : > { %5349 = vmatpush3.msra.mxu1 %v6623_v54  ;;  %5341 = vmatprep.subr.mxu0 %v7381_v3  ;;  %7396 = vst [vmem:[#allocation12_spill] sm:$0xff] %v6696_v27  ;;  %v2096_v29 = vrot.slane %v6696_v27, %v6552_v47  ;;  %v6883_v27 = vld [vmem:[%s6152_s26 + $0xc0] sm:$0xff] }
 0x479   : > { %5350 = vmatprep.subr.mxu1 %v7381_v3  ;;  %5342 = vmatpush3.msra.mxu0 %v6629_v55  ;;  %7414 = vst [vmem:[#allocation30_spill] sm:$0xff] %v6883_v27 }
 0x47a   : > { %5351 = vmatpush3.msra.mxu1 %v6633_v2  ;;  %5343 = vmatprep.subr.mxu0 %v7381_v3  ;;  %v2097_v36 = vcombine.high %v2096_v29, %v2096_v29  ;;  %v2104_v38 = vrot.slane %v2096_v29, %v6552_v47  ;;  %v6829_v29 = vld [vmem:[%s6152_s26 + $0xb0] sm:$0xff] }
 0x47b   : > { %5352 = vmatprep.subr.mxu1 %v7381_v3  ;;  %5344 = vmatpush3.msra.mxu0 %v6639_v58  ;;  %7405 = vst [vmem:[#allocation21_spill] sm:$0xff] %v6829_v29 }
 0x47c   : > { %5345 = vmatprep.mubr.msk.f32.mxu0 %vm5973_vm1, %v7381_v3  ;;  %5353 = vmatpush3.msra.mxu1 %v6646_v10  ;;  %v2111_v41 = vrot.slane %v2097_v36, %v6552_v47  ;;  %v2112_v56 = vcombine.high %v2104_v38, %v2104_v38  ;;  %v6835_v36 = vld [vmem:[%s6152_s26 + $0x80] sm:$0xff] }
 0x47d   : > { %5346 = vmatmul.mubr.msk.f32.vlgmr.msra.gmra.mxu0 %vm788_vm12, %v1494_v13  ;;  %5354 = vmatprep.subr.mxu1 %v7381_v3  ;;  %v6806_v13 = vld [vmem:[%s6152_s26 + $0x98] sm:$0xff]  ;;  %7406 = vst [vmem:[#allocation22_spill] sm:$0xff] %v6835_v36 }
 0x47e   : > { %5359 = vmatprep.subr.mxu0 %v7381_v3  ;;  %5355 = vmatpush3.msra.mxu1 %v6653_v59  ;;  %v2113_v4 = vcombine.high %v2111_v41, %v2111_v41  ;;  %7401 = vst [vmem:[#allocation17_spill] sm:$0xff] %v6806_v13 }
 0x47f   : > { %5356 = vmatprep.mubr.msk.f32.mxu1 %vm5973_vm1, %v7381_v3  ;;  %5360 = vmatpush3.msra.mxu0 %v6660_v18  ;;  %v6794_v61 = vpop.eup %5751 }
 0x480   : > { %5357 = vmatmul.mubr.msk.f32.vlgmr.msra.gmra.mxu1 %vm788_vm12, %v1501_v15  ;;  %5361 = vmatprep.subr.mxu0 %v7381_v3  ;;  %7399 = vst [vmem:[#allocation15_spill] sm:$0xff] %v6794_v61  ;;  %v2120_v15 = vrot.slane %v6794_v61, %v6552_v47  ;;  %v6877_v61 = vld [vmem:[%s6152_s26 + $0xf0] sm:$0xff] }
 0x481   : > { %5370 = vmatprep.subr.mxu1 %v7381_v3  ;;  %5362 = vmatpush3.msra.mxu0 %v6667_v21  ;;  %7413 = vst [vmem:[#allocation29_spill] sm:$0xff] %v6877_v61 }
 0x482   : > { %5371 = vmatpush3.msra.mxu1 %v6671_v22  ;;  %5363 = vmatprep.subr.mxu0 %v7381_v3  ;;  %v2121_v30 = vcombine.high %v2120_v15, %v2120_v15 }
 0x483   : > { %5372 = vmatprep.subr.mxu1 %v7381_v3  ;;  %5364 = vmatpush3.msra.mxu0 %v6677_v14 }
 0x484   : > { %5373 = vmatpush3.msra.mxu1 %v6681_v6  ;;  %5365 = vmatprep.subr.mxu0 %v7381_v3 }
 0x485   : > { %5374 = vmatprep.subr.mxu1 %v7381_v3  ;;  %5366 = vmatpush3.msra.mxu0 %v6687_v24 }
 0x486   : > { %5367 = vmatprep.mubr.msk.f32.mxu0 %vm5973_vm1, %v7381_v3  ;;  %5375 = vmatpush3.msra.mxu1 %v6693_v26 }
 0x487   : > { %5368 = vmatmul.mubr.msk.f32.vlgmr.msra.gmra.mxu0 %vm788_vm12, %v1502_v25  ;;  %5376 = vmatprep.subr.mxu1 %v7381_v3  ;;  %v6815_v25 = vld [vmem:[%s6152_s26 + $0x90] sm:$0xff] }
 0x488   : > { %5381 = vmatprep.subr.mxu0 %v7381_v3  ;;  %5377 = vmatpush3.msra.mxu1 %v6702_v28  ;;  %7402 = vst [vmem:[#allocation18_spill] sm:$0xff] %v6815_v25 }
 0x489   : > { %5378 = vmatprep.mubr.msk.f32.mxu1 %vm5973_vm1, %v7381_v3  ;;  %5382 = vmatpush3.msra.mxu0 %v6708_v1 }
 0x48a   : > { %5379 = vmatmul.mubr.msk.f32.vlgmr.msra.gmra.mxu1 %vm788_vm12, %v1503_v23  ;;  %5383 = vmatprep.subr.mxu0 %v7381_v3  ;;  %v6825_v23 = vld [vmem:[%s6152_s26 + $0x88] sm:$0xff] }
 0x48b   : > { %5392 = vmatprep.subr.mxu1 %v7381_v3  ;;  %5384 = vmatpush3.msra.mxu0 %v6717_v31  ;;  %7404 = vst [vmem:[#allocation20_spill] sm:$0xff] %v6825_v23 }
 0x48c   : > { %5393 = vmatpush3.msra.mxu1 %v6721_v20  ;;  %5385 = vmatprep.subr.mxu0 %v7381_v3 }
 0x48d   : > { %5394 = vmatprep.subr.mxu1 %v7381_v3  ;;  %5386 = vmatpush3.msra.mxu0 %v6727_v17 }
 0x48e   : > { %5395 = vmatpush3.msra.mxu1 %v6731_v35  ;;  %5387 = vmatprep.subr.mxu0 %v7381_v3 }
 0x48f   : > { %5396 = vmatprep.subr.mxu1 %v7381_v3  ;;  %5388 = vmatpush3.msra.mxu0 %v6737_v37 }
 0x490   : > { %5389 = vmatprep.mubr.msk.f32.mxu0 %vm5973_vm1, %v7381_v3  ;;  %5397 = vmatpush3.msra.mxu1 %v6744_v39 }
 0x491   : > { %5390 = vmatmul.mubr.msk.f32.vlgmr.msra.gmra.mxu0 %vm788_vm12, %v2104_v38  ;;  %5398 = vmatprep.subr.mxu1 %v7381_v3  ;;  %v2128_v38 = vrot.slane %v2120_v15, %v6552_v47  ;;  %v6856_v15 = vld [vmem:[%s6152_s26 + $0xd8] sm:$0xff] }
 0x492   : > { %5403 = vmatprep.subr.mxu0 %v7381_v3  ;;  %5399 = vmatpush3.msra.mxu1 %v6751_v40  ;;  %7409 = vst [vmem:[#allocation25_spill] sm:$0xff] %v6856_v15 }
 0x493   : > { %5400 = vmatprep.mubr.msk.f32.mxu1 %vm5973_vm1, %v7381_v3  ;;  %5404 = vmatpush3.msra.mxu0 %v6758_v42 }
 0x494   : > { %5401 = vmatmul.mubr.msk.f32.vlgmr.msra.gmra.mxu1 %vm788_vm12, %v2111_v41  ;;  %5405 = vmatprep.subr.mxu0 %v7381_v3  ;;  %v6842_v41 = vld [vmem:[%s6152_s26 + $0xa8] sm:$0xff] }
 0x495   : > { %5414 = vmatprep.subr.mxu1 %v7381_v3  ;;  %5406 = vmatpush3.msra.mxu0 %v6765_v9  ;;  %7407 = vst [vmem:[#allocation23_spill] sm:$0xff] %v6842_v41 }
 0x496   : > { %5415 = vmatpush3.msra.mxu1 %v6769_v44  ;;  %5407 = vmatprep.subr.mxu0 %v7381_v3 }
 0x497   : > { %5416 = vmatprep.subr.mxu1 %v7381_v3  ;;  %5408 = vmatpush3.msra.mxu0 %v6775_v48 }
 0x498   : > { %5417 = vmatpush3.msra.mxu1 %v6779_v49  ;;  %5409 = vmatprep.subr.mxu0 %v7381_v3 }
 0x499   : > { %5418 = vmatprep.subr.mxu1 %v7381_v3  ;;  %5410 = vmatpush3.msra.mxu0 %v6785_v19 }
 0x49a   : > { %5411 = vmatprep.mubr.msk.f32.mxu0 %vm5973_vm1, %v7381_v3  ;;  %5419 = vmatpush3.msra.mxu1 %v6791_v57 }
 0x49b   : > { %5412 = vmatmul.mubr.msk.f32.vlgmr.msra.gmra.mxu0 %vm788_vm12, %v2112_v56  ;;  %5420 = vmatprep.subr.mxu1 %v7381_v3  ;;  %v6849_v56 = vld [vmem:[%s6152_s26 + $0xa0] sm:$0xff] }
 0x49c   : > { %5425 = vmatprep.subr.mxu0 %v7381_v3  ;;  %5421 = vmatpush3.msra.mxu1 %v6800_v62  ;;  %7408 = vst [vmem:[#allocation24_spill] sm:$0xff] %v6849_v56 }
 0x49d   : > { %5422 = vmatprep.mubr.msk.f32.mxu1 %vm5973_vm1, %v7381_v3  ;;  %5426 = vmatpush3.msra.mxu0 %v6806_v13 }
 0x49e   : > { %5423 = vmatmul.mubr.msk.f32.vlgmr.msra.gmra.mxu1 %vm788_vm12, %v2113_v4  ;;  %5427 = vmatprep.subr.mxu0 %v7381_v3  ;;  %v2135_v4 = vrot.slane %v2121_v30, %v6552_v47  ;;  %v6867_v30 = vld [vmem:[%s6152_s26 + $0xf8] sm:$0xff] }
 0x49f   : > { %5436 = vmatprep.subr.mxu1 %v7381_v3  ;;  %5428 = vmatpush3.msra.mxu0 %v6815_v25  ;;  %7411 = vst [vmem:[#allocation27_spill] sm:$0xff] %v6867_v30 }
 0x4a0   : > { %5437 = vmatpush3.msra.mxu1 %v6819_v63  ;;  %5429 = vmatprep.subr.mxu0 %v7381_v3 }
 0x4a1   : > { %5438 = vmatprep.subr.mxu1 %v7381_v3  ;;  %5430 = vmatpush3.msra.mxu0 %v6825_v23 }
 0x4a2   : > { %5439 = vmatpush3.msra.mxu1 %v6829_v29  ;;  %5431 = vmatprep.subr.mxu0 %v7381_v3 }
 0x4a3   : > { %5440 = vmatprep.subr.mxu1 %v7381_v3  ;;  %5432 = vmatpush3.msra.mxu0 %v6835_v36 }
 0x4a4   : > { %5433 = vmatprep.mubr.msk.f32.mxu0 %vm5973_vm1, %v7381_v3  ;;  %5441 = vmatpush3.msra.mxu1 %v6842_v41 }
 0x4a5   : > { %5434 = vmatmul.mubr.msk.f32.vlgmr.msra.gmra.mxu0 %vm788_vm12, %v2128_v38  ;;  %5442 = vmatprep.subr.mxu1 %v7381_v3 }
 0x4a6   : > { %5447 = vmatprep.subr.mxu0 %v7381_v3  ;;  %5443 = vmatpush3.msra.mxu1 %v6849_v56 }
 0x4a7   : > { %5444 = vmatprep.mubr.msk.f32.mxu1 %vm5973_vm1, %v7381_v3  ;;  %5448 = vmatpush3.msra.mxu0 %v6856_v15 }
 0x4a8   : > { %5445 = vmatmul.mubr.msk.f32.vlgmr.msra.gmra.mxu1 %vm788_vm12, %v2135_v4  ;;  %5449 = vmatprep.subr.mxu0 %v7381_v3 }
 0x4a9   : > { %5458 = vmatprep.subr.mxu1 %v7381_v3  ;;  %5450 = vmatpush3.msra.mxu0 %v6863_v52  ;;  %v2136_v52 = vcombine.high %v2128_v38, %v2128_v38  ;;  %v2977_v38 = vld [vmem:[#allocation6 + $0xe0] sm:$0xff] }
 0x4aa   : > { %5459 = vmatpush3.msra.mxu1 %v6867_v30  ;;  %5451 = vmatprep.subr.mxu0 %v7381_v3  ;;  %v6889_v30 = vld [vmem:[%s6152_s26 + $0xe8] sm:$0xff] }
 0x4ab   : > { %5460 = vmatprep.subr.mxu1 %v7381_v3  ;;  %5452 = vmatpush3.msra.mxu0 %v6873_v8  ;;  %7415 = vst [vmem:[#allocation31_spill] sm:$0xff] %v6889_v30  ;;  %v2137_v8 = vcombine.high %v2135_v4, %v2135_v4  ;;  %v5975_v4 = vmov 0  }
 0x4ac   : > { %5461 = vmatpush3.msra.mxu1 %v6877_v61  ;;  %5453 = vmatprep.subr.mxu0 %v7381_v3  ;;  %v6895_v61 = vld [vmem:[%s6152_s26 + $0xe0] sm:$0xff] }
 0x4ad   : > { %5462 = vmatprep.subr.mxu1 %v7381_v3  ;;  %5454 = vmatpush3.msra.mxu0 %v6883_v27  ;;  %7416 = vst [vmem:[#allocation32_spill] sm:$0xff] %v6895_v61 }
 0x4ae   : > { %5455 = vmatprep.mubr.msk.f32.mxu0 %vm5973_vm1, %v7381_v3  ;;  %5463 = vmatpush3.msra.mxu1 %v6889_v30 }
 0x4af   : > { %5456 = vmatmul.mubr.msk.f32.vlgmr.msra.gmra.mxu0 %vm788_vm12, %v2136_v52  ;;  %5464 = vmatprep.subr.mxu1 %v7381_v3  ;;  %v2723_v52 = vld [vmem:[#allocation6 + $0xc0] sm:$0xff] }
 0x4b0   : > { %5465 = vmatpush3.msra.mxu1 %v6895_v61  ;;  %5466 = vmatprep.mubr.msk.f32.mxu1 %vm5973_vm1, %v7381_v3 }
 0x4b1   : > { %5467 = vmatmul.mubr.msk.f32.vlgmr.msra.gmra.mxu1 %vm788_vm12, %v2137_v8  ;;  %5469 = vmatprep.subr.mxu0 %v7381_v3 }
 0x4b2   : > { %5471 = vmatprep.mubr.msk.f32.mxu0 %vm5973_vm1, %v7381_v3  ;;  %5474 = vmatprep.subr.mxu1 %v7381_v3 }
 0x4b3   : > { %5476 = vmatprep.mubr.msk.f32.mxu1 %vm5973_vm1, %v7381_v3  ;;  %5728 = vset.pattern.permute.xlu1 %v5975_v4 }
 0x4b4   : > { %5727 = vset.pattern.permute.xlu0 %v5975_v4  ;;  %2726 = vperm.xlu1 %5728, %v2723_v52  }
 0x4b5   : > { %2980 = vperm.xlu0 %5727, %v2977_v38   ;;  %v2722_v38 = vld [vmem:[#allocation6 + $0xb8] sm:$0xff] }
 0x52b   : > { %v1572_v61 = vpop.f32.mrf.mxu0 }
 0x52c   : > { %v2080_v23 = vmul.f32 0.03125, %v1572_v61  ;;  %v7417_v61 = vmov 0.0  }
 0x52d   : > { %v5303_v27 = vpop.f32.mrf.mxu0  ;;  %v1644_v8 = vpop.f32.mrf.mxu1  ;;  %4792 = vst [vmem:[%s6967_s24] sm:$0xff] %v7417_v61  ;;  %4793 = vst [vmem:[%s6967_s24 + $0x8] sm:$0xf] %v7417_v61 }
 0x52e   : > { %v2081_v30 = vmul.f32 0.03125, %v1644_v8  ;;  %4794 = vst [vmem:[%s6967_s24 + $0x10] sm:$0xff] %v7417_v61  ;;  %4795 = vst [vmem:[%s6967_s24 + $0x18] sm:$0xf] %v7417_v61 }
 0x52f   : > { %v5314_v15 = vpop.f32.mrf.mxu1 }
 0x530   : > { %v2733_v56 = vrot.slane %v2081_v30, 7 }
 0x532   : > { %v2734_v3 = vsel %vm774_vm5, %v2733_v56, %v2080_v23 }
 0x533   : > { %v1716_v36 = vpop.f32.mrf.mxu0 }
 0x534   : > { %v2082_v41 = vmul.f32 0.03125, %v1716_v36 }
 0x535   : > { %v5325_v29 = vpop.f32.mrf.mxu0 }
 0x536   : > { %v2735_v25 = vrot.slane %v2082_v41, 6  ;;  %v1788_v63 = vpop.f32.mrf.mxu1 }
 0x537   : > { %v2083_v13 = vmul.f32 0.03125, %v1788_v63 }
 0x538   : > { %v2736_v62 = vsel %vm776_vm6, %v2735_v25, %v2734_v3  ;;  %v5336_v4 = vpop.f32.mrf.mxu1 }
 0x539   : > { %v2737_v52 = vrot.slane %v2083_v13, 5 }
 0x53b   : > { %v2738_v27 = vsel %vm778_vm7, %v2737_v52, %v2736_v62 }
 0x53c   : > { %5470 = vmatpush3.msk.msra.mxu0 %vm1310_vm14, %v2738_v27 }
 0x53d   : > { %v1860_v15 = vpop.f32.mrf.mxu0  ;;  %5472 = vmatmul.mubr.msk.f32.vlgmr.msra.gmra.mxu0 %vm2739_vm15, %v2722_v38  ;;  %5479 = vmatprep.subr.mxu0 %v7417_v61 }
 0x53e   : > { %5481 = vmatprep.mubr.msk.f32.mxu0 %vm5973_vm1, %v7417_v61  ;;  %v2084_v41 = vmul.f32 0.03125, %v1860_v15 }
 0x53f   : > { %v5347_v23 = vpop.f32.mrf.mxu0 }
 0x540   : > { %v1932_v63 = vpop.f32.mrf.mxu1 }
 0x541   : > { %v2085_v3 = vmul.f32 0.03125, %v1932_v63 }
 0x542   : > { %v5358_v29 = vpop.f32.mrf.mxu1 }
 0x543   : > { %v2819_v25 = vrot.slane %v2085_v3, 7 }
 0x545   : > { %v2820_v8 = vsel %vm774_vm5, %v2819_v25, %v2084_v41 }
 0x547   : > { %v2004_v13 = vpop.f32.mrf.mxu0 }
 0x548   : > { %v2086_v36 = vmul.f32 0.03125, %v2004_v13 }
 0x549   : > { %v5369_v56 = vpop.f32.mrf.mxu0 }
 0x54a   : > { %v2821_v62 = vrot.slane %v2086_v36, 6  ;;  %v2076_v30 = vpop.f32.mrf.mxu1 }
 0x54b   : > { %v2087_v4 = vmul.f32 0.03125, %v2076_v30 }
 0x54c   : > { %v2822_v52 = vsel %vm776_vm6, %v2821_v62, %v2820_v8  ;;  %v5380_v27 = vpop.f32.mrf.mxu1 }
 0x54d   : > { %v2823_v19 = vrot.slane %v2087_v4, 5 }
 0x54f   : > { %v2824_v57 = vsel %vm778_vm7, %v2823_v19, %v2822_v52  ;;  %v2976_v52 = vld [vmem:[#allocation6 + $0xd8] sm:$0xff] }
 0x550   : > { %5475 = vmatpush3.msk.msra.mxu1 %vm1310_vm14, %v2824_v57 }
 0x551   : > { %v2206_v23 = vpop.f32.mrf.mxu0  ;;  %5477 = vmatmul.mubr.msk.f32.vlgmr.msra.gmra.mxu1 %vm2739_vm15, %v2722_v38  ;;  %5484 = vmatprep.subr.mxu1 %v7417_v61 }
 0x552   : > { %5486 = vmatprep.mubr.msk.f32.mxu1 %vm5973_vm1, %v7417_v61  ;;  %v2714_v41 = vmul.f32 0.03125, %v2206_v23  ;;  %v5839_v23 = vld [vmem:[%s6145_s23 + $0x18] sm:$0xff] }
 0x553   : > { %v5391_v15 = vpop.f32.mrf.mxu0 }
 0x554   : > { %v2278_v63 = vpop.f32.mrf.mxu1 }
 0x555   : > { %v2715_v3 = vmul.f32 0.03125, %v2278_v63 }
 0x556   : > { %v5402_v29 = vpop.f32.mrf.mxu1 }
 0x557   : > { %v2987_v25 = vrot.slane %v2715_v3, 7 }
 0x559   : > { %v2988_v62 = vsel %vm774_vm5, %v2987_v25, %v2714_v41 }
 0x55b   : > { %v2350_v13 = vpop.f32.mrf.mxu0 }
 0x55c   : > { %v2716_v36 = vmul.f32 0.03125, %v2350_v13 }
 0x55d   : > { %v5413_v19 = vpop.f32.mrf.mxu0 }
 0x55e   : > { %v2989_v56 = vrot.slane %v2716_v36, 6  ;;  %v2422_v57 = vpop.f32.mrf.mxu1 }
 0x55f   : > { %v2717_v38 = vmul.f32 0.03125, %v2422_v57 }
 0x560   : > { %v2990_v30 = vsel %vm776_vm6, %v2989_v56, %v2988_v62  ;;  %v5424_v8 = vpop.f32.mrf.mxu1 }
 0x561   : > { %v2991_v4 = vrot.slane %v2717_v38, 5 }
 0x563   : > { %v2992_v27 = vsel %vm778_vm7, %v2991_v4, %v2990_v30 }
 0x564   : > { %5480 = vmatpush3.msk.msra.mxu0 %vm1310_vm14, %v2992_v27  ;;  %v5840_v27 = vld [vmem:[%s6145_s23 + $0x38] sm:$0xff] }
 0x565   : > { %v2494_v15 = vpop.f32.mrf.mxu0  ;;  %5482 = vmatmul.mubr.msk.f32.vlgmr.msra.gmra.mxu0 %vm2739_vm15, %v2976_v52  ;;  %5489 = vmatprep.subr.mxu0 %v7417_v61 }
 0x566   : > { %5490 = vmatpush3.xpose.msk.msra.mxu0 %vm316_vm0, %v5839_v23  ;;  %5497 = vmatprep.mubr.msk.f32.mxu0 %vm5973_vm1, %v7417_v61  ;;  %v2718_v19 = vmul.f32 0.03125, %v2494_v15 }
 0x567   : > { %v5435_v63 = vpop.f32.mrf.mxu0  ;;  %5491 = vmatprep.subr.mxu0 %v7417_v61 }
 0x568   : > { %v2566_v29 = vpop.f32.mrf.mxu1 }
 0x569   : > { %v2719_v25 = vmul.f32 0.03125, %v2566_v29 }
 0x56a   : > { %v5446_v3 = vpop.f32.mrf.mxu1  ;;  %5492 = vmatpush3.xpose.msk.msra.mxu0 %vm316_vm0, %v6483_v5 }
 0x56b   : > { %5493 = vmatprep.subr.mxu0 %v7417_v61  ;;  %v3072_v13 = vrot.slane %v2719_v25, 7 }
 0x56d   : > { %v3073_v5 = vsel %vm774_vm5, %v3072_v13, %v2718_v19 }
 0x56e   : > { %5494 = vmatpush3.xpose.msk.msra.mxu0 %vm316_vm0, %v6493_v33 }
 0x56f   : > { %v2638_v36 = vpop.f32.mrf.mxu0  ;;  %5495 = vmatprep.subr.mxu0 %v7417_v61 }
 0x570   : > { %v2720_v41 = vmul.f32 0.03125, %v2638_v36 }
 0x571   : > { %v5457_v56 = vpop.f32.mrf.mxu0  ;;  %v2710_v57 = vpop.f32.mrf.mxu1 }
 0x572   : > { %v3074_v62 = vrot.slane %v2720_v41, 6  ;;  %v2721_v38 = vmul.f32 0.03125, %v2710_v57  ;;  %5496 = vmatpush3.xpose.msk.msra.mxu0 %vm316_vm0, %v6504_v11 }
 0x573   : > { %v5468_v30 = vpop.f32.mrf.mxu1  ;;  %5511 = vmatprep.subr.mxu0 %v7417_v61 }
 0x574   : > { %v3075_v33 = vsel %vm776_vm6, %v3074_v62, %v3073_v5  ;;  %v3076_v8 = vrot.slane %v2721_v38, 5  ;;  %v2981_v62 = vpop.permute.xlu0 %2980 }
 0x576   : > { %v3077_v4 = vsel %vm778_vm7, %v3076_v8, %v3075_v33 }
 0x577   : > { %5485 = vmatpush3.msk.msra.mxu1 %vm1310_vm14, %v3077_v4 }
 0x578   : > { %5487 = vmatmul.mubr.msk.f32.vlgmr.msra.gmra.mxu1 %vm2739_vm15, %v2976_v52  ;;  %5500 = vmatprep.subr.mxu1 %v7417_v61 }
 0x579   : > { %5501 = vmatpush3.xpose.msk.msra.mxu1 %vm316_vm0, %v5840_v27  ;;  %5508 = vmatprep.mubr.msk.f32.mxu1 %vm5973_vm1, %v7417_v61 }
 0x57a   : > { %5502 = vmatprep.subr.mxu1 %v7417_v61 }
 0x57d   : > { %5503 = vmatpush3.xpose.msk.msra.mxu1 %vm316_vm0, %v6487_v7  ;;  %v2727_v7 = vpop.permute.xlu1 %2726 }
 0x57e   : > { %5504 = vmatprep.subr.mxu1 %v7417_v61 }
 0x581   : > { %5505 = vmatpush3.xpose.msk.msra.mxu1 %vm316_vm0, %v6497_v32 }
 0x582   : > { %5506 = vmatprep.subr.mxu1 %v7417_v61 }
 0x585   : > { %5507 = vmatpush3.xpose.msk.msra.mxu1 %vm316_vm0, %v6510_v12 }
 0x586   : > { %5522 = vmatprep.subr.mxu1 %v7417_v61 }
 0x5fd   : > { %v2811_v32 = vpop.f32.mrf.mxu0 }
 0x5fe   : > { %v6977_v11 = vadd.f32 %v2811_v32, %v2727_v7 }
 0x5ff   : > { %v5473_v12 = vpop.f32.mrf.mxu0 }
 0x600   : > { %v4966_v52 = vmul.f32 -1.442695, %v6977_v11  ;;  %v2897_v15 = vmax.f32 %v6977_v11, 0.0 }
 0x602   : > { %5753 = vpow2.f32 %v4966_v52  ;;  %v2902_v23 = vsel %vm2901_vm2, %v2897_v15, 0.0 }
 0x603   : > { %2903 = vadd.xlane.f32.xlu1 %v2902_v23 }
 0x60f   : > { %v5754_v63 = vpop.eup %5753 }
 0x610   : > { %v2970_v29 = vadd.f32 1.0, %v5754_v63 }
 0x611   : > { %v2893_v3 = vpop.f32.mrf.mxu1 }
 0x612   : > { %5755 = vrcp.f32 %v2970_v29  ;;  %v6984_v25 = vadd.f32 %v2893_v3, %v2727_v7 }
 0x613   : > { %v5478_v13 = vpop.f32.mrf.mxu1 }
 0x614   : > { %v4967_v36 = vmul.f32 -1.442695, %v6984_v25  ;;  %v2898_v41 = vmax.f32 %v6984_v25, 0.0 }
 0x616   : > { %5757 = vpow2.f32 %v4967_v36  ;;  %v2905_v19 = vsel %vm2901_vm2, %v2898_v41, 0.0 }
 0x617   : > { %2906 = vadd.xlane.f32.xlu0 %v2905_v19 }
 0x61f   : > { %v6991_v56 = vpop.eup %5755 }
 0x620   : > { %4799 = vst.msk [vmem:[%s6967_s24] sm:$0xf0] %vm4796_vm3, %v6991_v56 }
 0x623   : > { %v5758_v57 = vpop.eup %5757 }
 0x624   : > { %v2971_v38 = vadd.f32 1.0, %v5758_v57 }
 0x625   : > { %v3064_v5 = vpop.f32.mrf.mxu0 }
 0x626   : > { %5759 = vrcp.f32 %v2971_v38  ;;  %v6996_v30 = vadd.f32 %v3064_v5, %v2981_v62 }
 0x627   : > { %v5483_v33 = vpop.f32.mrf.mxu0 }
 0x628   : > { %v4972_v8 = vmul.f32 -1.442695, %v6996_v30  ;;  %v3150_v4 = vmax.f32 %v6996_v30, 0.0 }
 0x62a   : > { %5761 = vpow2.f32 %v4972_v8  ;;  %v3154_v27 = vsel %vm2901_vm2, %v3150_v4, 0.0 }
 0x62b   : > { %3155 = vadd.xlane.f32.xlu1 %v3154_v27 }
 0x633   : > { %v7003_v7 = vpop.eup %5759 }
 0x634   : > { %4800 = vst.msk [vmem:[%s6967_s24 + $0x10] sm:$0xf0] %vm4796_vm3, %v7003_v7  ;;  %v3987_v11 = vcombine.high %v7003_v7, %v7003_v7 }
 0x637   : > { %v5762_v32 = vpop.eup %5761 }
 0x638   : > { %v3222_v12 = vadd.f32 1.0, %v5762_v32  ;;  %v3146_v52 = vpop.f32.mrf.mxu1 }
 0x639   : > { %v7008_v23 = vadd.f32 %v3146_v52, %v2981_v62 }
 0x63a   : > { %5763 = vrcp.f32 %v3222_v12  ;;  %v5488_v63 = vpop.f32.mrf.mxu1  ;;  %v7424_v12 = vld [vmem:[#allocation21_spill] sm:$0xff] }
 0x63b   : > { %v4973_v29 = vmul.f32 -1.442695, %v7008_v23  ;;  %v3151_v3 = vmax.f32 %v7008_v23, 0.0  ;;  %v3994_v63 = vrot.slane %v3987_v11, %v6552_v47 }
 0x63d   : > { %5765 = vpow2.f32 %v4973_v29  ;;  %v3157_v13 = vsel %vm2901_vm2, %v3151_v3, 0.0  ;;  %v7425_v29 = vld [vmem:[#allocation20_spill] sm:$0xff] }
 0x63e   : > { %3158 = vadd.xlane.f32.xlu1 %v3157_v13 }
 0x647   : > { %v7015_v36 = vpop.eup %5763 }
 0x648   : > { %v3230_v19 = vcombine.high %v7015_v36, %v7015_v36  ;;  %4797 = vst.msk [vmem:[%s6967_s24 - $0x4] sm:$0xf0] %vm4796_vm3, %v7015_v36 }
 0x64a   : > { %v5766_v57 = vpop.eup %5765  ;;  %v3237_v62 = vrot.slane %v3230_v19, %v6552_v47  ;;  %v7426_v19 = vld [vmem:[#allocation23_spill] sm:$0xff] }
 0x64b   : > { %v3223_v38 = vadd.f32 1.0, %v5766_v57 }
 0x64c   : > { %v3245_v5 = vrot.slane %v3237_v62, %v6552_v47  ;;  %v3238_v33 = vcombine.high %v3237_v62, %v3237_v62  ;;  %v3995_v62 = vcombine.high %v3994_v63, %v3994_v63 }
 0x64d   : > { %5767 = vrcp.f32 %v3223_v38  ;;  %v7427_v38 = vld [vmem:[#allocation22_spill] sm:$0xff] }
 0x64e   : > { %5498 = vmatmul.mubr.msk.f32.vlgmr.msra.gmra.mxu0 %vm316_vm0, %v3245_v5  ;;  %v3252_v8 = vrot.slane %v3238_v33, %v6552_v47  ;;  %v4002_v33 = vrot.slane %v3994_v63, %v6552_v47 }
 0x64f   : > { %5512 = vmatpush3.xpose.msk.msra.mxu0 %vm316_vm0, %v6563_v34  ;;  %5519 = vmatprep.mubr.msk.f32.mxu0 %vm5973_vm1, %v7417_v61 }
 0x650   : > { %5509 = vmatmul.mubr.msk.f32.vlgmr.msra.gmra.mxu1 %vm316_vm0, %v3252_v8  ;;  %5513 = vmatprep.subr.mxu0 %v7417_v61 }
 0x651   : > { %5523 = vmatpush3.xpose.msk.msra.mxu1 %vm316_vm0, %v6575_v43  ;;  %5530 = vmatprep.mubr.msk.f32.mxu1 %vm5973_vm1, %v7417_v61  ;;  %v3254_v43 = vcombine.high %v3252_v8, %v3252_v8  ;;  %v7428_v8 = vld [vmem:[#allocation24_spill] sm:$0xff] }
 0x652   : > { %5524 = vmatprep.subr.mxu1 %v7417_v61 }
 0x653   : > { %5514 = vmatpush3.xpose.msk.msra.mxu0 %vm316_vm0, %v6571_v16  ;;  %v3253_v16 = vcombine.high %v3245_v5, %v3245_v5 }
 0x654   : > { %5515 = vmatprep.subr.mxu0 %v7417_v61 }
 0x655   : > { %5525 = vmatpush3.xpose.msk.msra.mxu1 %vm316_vm0, %v6585_v46 }
 0x656   : > { %5526 = vmatprep.subr.mxu1 %v7417_v61 }
 0x657   : > { %5516 = vmatpush3.xpose.msk.msra.mxu0 %vm316_vm0, %v6581_v45 }
 0x658   : > { %5517 = vmatprep.subr.mxu0 %v7417_v61 }
 0x659   : > { %5527 = vmatpush3.xpose.msk.msra.mxu1 %vm316_vm0, %v6595_v51 }
 0x65a   : > { %v7048_v34 = vpop.eup %5767  ;;  %5528 = vmatprep.subr.mxu1 %v7417_v61 }
 0x65b   : > { %5518 = vmatpush3.xpose.msk.msra.mxu0 %vm316_vm0, %v6591_v50  ;;  %4798 = vst.msk [vmem:[%s6967_s24 + $0xc] sm:$0xf0] %vm4796_vm3, %v7048_v34  ;;  %v3255_v45 = vcombine.high %v7048_v34, %v7048_v34 }
 0x65c   : > { %5533 = vmatprep.subr.mxu0 %v7417_v61 }
 0x65d   : > { %5529 = vmatpush3.xpose.msk.msra.mxu1 %vm316_vm0, %v6604_v53  ;;  %v3262_v46 = vrot.slane %v3255_v45, %v6552_v47  ;;  %v7429_v45 = vld [vmem:[#allocation25_spill] sm:$0xff] }
 0x65e   : > { %5520 = vmatmul.mubr.msk.f32.vlgmr.msra.gmra.mxu0 %vm316_vm0, %v3253_v16  ;;  %5544 = vmatprep.subr.mxu1 %v7417_v61  ;;  %v4009_v16 = vrot.slane %v3995_v62, %v6552_v47 }
 0x65f   : > { %5534 = vmatpush3.xpose.msk.msra.mxu0 %vm316_vm0, %v6610_v60  ;;  %5541 = vmatprep.mubr.msk.f32.mxu0 %vm5973_vm1, %v7417_v61  ;;  %v3263_v50 = vcombine.high %v3262_v46, %v3262_v46  ;;  %v3270_v51 = vrot.slane %v3262_v46, %v6552_v47 }
 0x660   : > { %5531 = vmatmul.mubr.msk.f32.vlgmr.msra.gmra.mxu1 %vm316_vm0, %v3254_v43  ;;  %5535 = vmatprep.subr.mxu0 %v7417_v61 }
 0x661   : > { %5545 = vmatpush3.xpose.msk.msra.mxu1 %vm316_vm0, %v6623_v54  ;;  %5552 = vmatprep.mubr.msk.f32.mxu1 %vm5973_vm1, %v7417_v61  ;;  %v3277_v53 = vrot.slane %v3263_v50, %v6552_v47  ;;  %v3278_v60 = vcombine.high %v3270_v51, %v3270_v51  ;;  %v3962_v54 = vcombine.high %v6991_v56, %v6991_v56  ;;  %v7430_v50 = vld [vmem:[#allocation27_spill] sm:$0xff] }
 0x662   : > { %5546 = vmatprep.subr.mxu1 %v7417_v61 }
 0x663   : > { %5536 = vmatpush3.xpose.msk.msra.mxu0 %vm316_vm0, %v6619_v0  ;;  %v3279_v0 = vcombine.high %v3277_v53, %v3277_v53 }
 0x664   : > { %5537 = vmatprep.subr.mxu0 %v7417_v61 }
 0x665   : > { %5547 = vmatpush3.xpose.msk.msra.mxu1 %vm316_vm0, %v6633_v2 }
 0x666   : > { %5548 = vmatprep.subr.mxu1 %v7417_v61 }
 0x667   : > { %5538 = vmatpush3.xpose.msk.msra.mxu0 %vm316_vm0, %v6629_v55  ;;  %v3969_v55 = vrot.slane %v3962_v54, %v6552_v47  ;;  %v7432_v54 = vld [vmem:[#allocation29_spill] sm:$0xff] }
 0x668   : > { %5539 = vmatprep.subr.mxu0 %v7417_v61 }
 0x669   : > { %5549 = vmatpush3.xpose.msk.msra.mxu1 %vm316_vm0, %v6646_v10  ;;  %v3970_v2 = vcombine.high %v3969_v55, %v3969_v55 }
 0x66a   : > { %5550 = vmatprep.subr.mxu1 %v7417_v61 }
 0x66b   : > { %5540 = vmatpush3.xpose.msk.msra.mxu0 %vm316_vm0, %v6639_v58  ;;  %v3977_v58 = vrot.slane %v3969_v55, %v6552_v47 }
 0x66c   : > { %5555 = vmatprep.subr.mxu0 %v7417_v61 }
 0x66d   : > { %5551 = vmatpush3.xpose.msk.msra.mxu1 %vm316_vm0, %v6653_v59 }
 0x66e   : > { %5542 = vmatmul.mubr.msk.f32.vlgmr.msra.gmra.mxu0 %vm316_vm0, %v3270_v51  ;;  %5566 = vmatprep.subr.mxu1 %v7417_v61  ;;  %v7431_v51 = vld [vmem:[#allocation26_spill] sm:$0xff] }
 0x66f   : > { %5556 = vmatpush3.xpose.msk.msra.mxu0 %vm316_vm0, %v6660_v18  ;;  %5563 = vmatprep.mubr.msk.f32.mxu0 %vm5973_vm1, %v7417_v61  ;;  %v3984_v18 = vrot.slane %v3970_v2, %v6552_v47 }
 0x670   : > { %5553 = vmatmul.mubr.msk.f32.vlgmr.msra.gmra.mxu1 %vm316_vm0, %v3277_v53  ;;  %5557 = vmatprep.subr.mxu0 %v7417_v61 }
 0x671   : > { %5567 = vmatpush3.xpose.msk.msra.mxu1 %vm316_vm0, %v6671_v22  ;;  %5574 = vmatprep.mubr.msk.f32.mxu1 %vm5973_vm1, %v7417_v61 }
 0x672   : > { %5568 = vmatprep.subr.mxu1 %v7417_v61 }
 0x673   : > { %5558 = vmatpush3.xpose.msk.msra.mxu0 %vm316_vm0, %v6667_v21 }
 0x674   : > { %5559 = vmatprep.subr.mxu0 %v7417_v61 }
 0x675   : > { %5569 = vmatpush3.xpose.msk.msra.mxu1 %vm316_vm0, %v6681_v6 }
 0x676   : > { %5570 = vmatprep.subr.mxu1 %v7417_v61 }
 0x677   : > { %5560 = vmatpush3.xpose.msk.msra.mxu0 %vm316_vm0, %v6677_v14 }
 0x678   : > { %5561 = vmatprep.subr.mxu0 %v7417_v61 }
 0x679   : > { %5571 = vmatpush3.xpose.msk.msra.mxu1 %vm316_vm0, %v6693_v26 }
 0x67a   : > { %5572 = vmatprep.subr.mxu1 %v7417_v61 }
 0x67b   : > { %5562 = vmatpush3.xpose.msk.msra.mxu0 %vm316_vm0, %v6687_v24 }
 0x67c   : > { %5577 = vmatprep.subr.mxu0 %v7417_v61 }
 0x67d   : > { %5573 = vmatpush3.xpose.msk.msra.mxu1 %vm316_vm0, %v6702_v28  ;;  %v7418_v28 = vld [vmem:[#allocation14_spill] sm:$0xff] }
 0x67e   : > { %5564 = vmatmul.mubr.msk.f32.vlgmr.msra.gmra.mxu0 %vm316_vm0, %v3278_v60  ;;  %5588 = vmatprep.subr.mxu1 %v7417_v61 }
 0x67f   : > { %5578 = vmatpush3.xpose.msk.msra.mxu0 %vm316_vm0, %v6708_v1  ;;  %5585 = vmatprep.mubr.msk.f32.mxu0 %vm5973_vm1, %v7417_v61 }
 0x680   : > { %5575 = vmatmul.mubr.msk.f32.vlgmr.msra.gmra.mxu1 %vm316_vm0, %v3279_v0  ;;  %5579 = vmatprep.subr.mxu0 %v7417_v61 }
 0x681   : > { %5589 = vmatpush3.xpose.msk.msra.mxu1 %vm316_vm0, %v6721_v20  ;;  %5596 = vmatprep.mubr.msk.f32.mxu1 %vm5973_vm1, %v7417_v61  ;;  %v3985_v20 = vcombine.high %v3977_v58, %v3977_v58 }
 0x682   : > { %5590 = vmatprep.subr.mxu1 %v7417_v61 }
 0x683   : > { %5580 = vmatpush3.xpose.msk.msra.mxu0 %vm316_vm0, %v6717_v31  ;;  %v7419_v31 = vld [vmem:[#allocation13_spill] sm:$0xff] }
 0x684   : > { %5581 = vmatprep.subr.mxu0 %v7417_v61 }
 0x685   : > { %5591 = vmatpush3.xpose.msk.msra.mxu1 %vm316_vm0, %v6731_v35  ;;  %v7420_v35 = vld [vmem:[#allocation16_spill] sm:$0xff] }
 0x686   : > { %5592 = vmatprep.subr.mxu1 %v7417_v61 }
 0x687   : > { %5582 = vmatpush3.xpose.msk.msra.mxu0 %vm316_vm0, %v6727_v17 }
 0x688   : > { %5583 = vmatprep.subr.mxu0 %v7417_v61 }
 0x689   : > { %5593 = vmatpush3.xpose.msk.msra.mxu1 %vm316_vm0, %v6744_v39 }
 0x68a   : > { %5594 = vmatprep.subr.mxu1 %v7417_v61 }
 0x68b   : > { %5584 = vmatpush3.xpose.msk.msra.mxu0 %vm316_vm0, %v6737_v37  ;;  %v3986_v37 = vcombine.high %v3984_v18, %v3984_v18 }
 0x68c   : > { %5599 = vmatprep.subr.mxu0 %v7417_v61  ;;  %v2904_v10 = vpop.xlane.xlu1 %2903 }
 0x68d   : > { %5595 = vmatpush3.xpose.msk.msra.mxu1 %vm316_vm0, %v6751_v40  ;;  %v2908_v59 = vmul.f32 0.020408163, %v2904_v10  ;;  %v7421_v40 = vld [vmem:[#allocation17_spill] sm:$0xff] }
 0x68e   : > { %5586 = vmatmul.mubr.msk.f32.vlgmr.msra.gmra.mxu0 %vm316_vm0, %v3977_v58  ;;  %5610 = vmatprep.subr.mxu1 %v7417_v61  ;;  %v7434_v58 = vld [vmem:[#allocation31_spill] sm:$0xff] }
 0x68f   : > { %5600 = vmatpush3.xpose.msk.msra.mxu0 %vm316_vm0, %v6758_v42  ;;  %v2910_v21 = vsel %vm1310_vm14, %v2908_v59, 0.0  ;;  %5607 = vmatprep.mubr.msk.f32.mxu0 %vm5973_vm1, %v7417_v61  ;;  %v7435_v59 = vld [vmem:[#allocation30_spill] sm:$0xff] }
 0x690   : > { %5597 = vmatmul.mubr.msk.f32.vlgmr.msra.gmra.mxu1 %vm316_vm0, %v3984_v18  ;;  %5601 = vmatprep.subr.mxu0 %v7417_v61  ;;  %v2911_v22 = vrot.slane %v2910_v21, 4 }
 0x691   : > { %5611 = vmatpush3.xpose.msk.msra.mxu1 %vm316_vm0, %v6769_v44  ;;  %5618 = vmatprep.mubr.msk.f32.mxu1 %vm5973_vm1, %v7417_v61  ;;  %v7422_v44 = vld [vmem:[#allocation19_spill] sm:$0xff] }
 0x692   : > { %5612 = vmatprep.subr.mxu1 %v7417_v61  ;;  %v2912_v14 = vadd.f32 %v2911_v22, %v2910_v21  ;;  %v4010_v21 = vcombine.high %v4002_v33, %v4002_v33  ;;  %v7436_v22 = vld [vmem:[#allocation32_spill] sm:$0xff] }
 0x693   : > { %5602 = vmatpush3.xpose.msk.msra.mxu0 %vm316_vm0, %v6765_v9 }
 0x694   : > { %v2913_v6 = vrot.slane %v2912_v14, 2  ;;  %5603 = vmatprep.subr.mxu0 %v7417_v61 }
 0x695   : > { %5613 = vmatpush3.xpose.msk.msra.mxu1 %vm316_vm0, %v6779_v49 }
 0x696   : > { %v2914_v24 = vadd.f32 %v2913_v6, %v2912_v14  ;;  %5614 = vmatprep.subr.mxu1 %v7417_v61  ;;  %v4011_v6 = vcombine.high %v4009_v16, %v4009_v16 }
 0x697   : > { %5604 = vmatpush3.xpose.msk.msra.mxu0 %vm316_vm0, %v6775_v48 }
 0x698   : > { %v2915_v26 = vrot.slane %v2914_v24, 1  ;;  %5605 = vmatprep.subr.mxu0 %v7417_v61 }
 0x699   : > { %5615 = vmatpush3.xpose.msk.msra.mxu1 %vm316_vm0, %v7418_v28 }
 0x69a   : > { %5616 = vmatprep.subr.mxu1 %v7417_v61  ;;  %v2916_v1 = vadd.f32 %v2915_v26, %v2914_v24 }
 0x69b   : > { %5606 = vmatpush3.xpose.msk.msra.mxu0 %vm316_vm0, %v7419_v31 }
 0x69c   : > { %5621 = vmatprep.subr.mxu0 %v7417_v61  ;;  %v2924_v17 = vmul.f32 0.25, %v2916_v1 }
 0x69d   : > { %5617 = vmatpush3.xpose.msk.msra.mxu1 %vm316_vm0, %v7420_v35 }
 0x69e   : > { %5608 = vmatmul.mubr.msk.f32.vlgmr.msra.gmra.mxu0 %vm316_vm0, %v3985_v20  ;;  %5632 = vmatprep.subr.mxu1 %v7417_v61  ;;  %v7194_v39 = vsub.f32 %v2897_v15, %v2924_v17  ;;  %v7423_v15 = vld [vmem:[#allocation18_spill] sm:$0xff] }
 0x69f   : > { %5622 = vmatpush3.xpose.msk.msra.mxu0 %vm316_vm0, %v7421_v40  ;;  %5629 = vmatprep.mubr.msk.f32.mxu0 %vm5973_vm1, %v7417_v61 }
 0x6a0   : > { %5619 = vmatmul.mubr.msk.f32.vlgmr.msra.gmra.mxu1 %vm316_vm0, %v3986_v37  ;;  %5623 = vmatprep.subr.mxu0 %v7417_v61  ;;  %v2907_v42 = vpop.xlane.xlu0 %2906  ;;  %v2928_v9 = vmul.f32 %v7194_v39, %v7194_v39 }
 0x6a1   : > { %5633 = vmatpush3.xpose.msk.msra.mxu1 %vm316_vm0, %v7422_v44  ;;  %v2909_v48 = vmul.f32 0.020408163, %v2907_v42  ;;  %5640 = vmatprep.mubr.msk.f32.mxu1 %vm5973_vm1, %v7417_v61 }
 0x6a2   : > { %5634 = vmatprep.subr.mxu1 %v7417_v61  ;;  %v2930_v49 = vsel %vm2901_vm2, %v2928_v9, 0.0 }
 0x6a3   : > { %5624 = vmatpush3.xpose.msk.msra.mxu0 %vm316_vm0, %v7423_v15  ;;  %v2917_v27 = vsel %vm1310_vm14, %v2909_v48, 0.0  ;;  %2931 = vadd.xlane.f32.xlu1 %v2930_v49 }
 0x6a4   : > { %v2918_v32 = vrot.slane %v2917_v27, 4  ;;  %5625 = vmatprep.subr.mxu0 %v7417_v61 }
 0x6a5   : > { %5635 = vmatpush3.xpose.msk.msra.mxu1 %vm316_vm0, %v7424_v12 }
 0x6a6   : > { %v2919_v52 = vadd.f32 %v2918_v32, %v2917_v27  ;;  %5636 = vmatprep.subr.mxu1 %v7417_v61 }
 0x6a7   : > { %5626 = vmatpush3.xpose.msk.msra.mxu0 %vm316_vm0, %v7425_v29 }
 0x6a8   : > { %v2920_v13 = vrot.slane %v2919_v52, 2  ;;  %5627 = vmatprep.subr.mxu0 %v7417_v61 }
 0x6a9   : > { %5637 = vmatpush3.xpose.msk.msra.mxu1 %vm316_vm0, %v7426_v19 }
 0x6aa   : > { %v2921_v57 = vadd.f32 %v2920_v13, %v2919_v52  ;;  %5638 = vmatprep.subr.mxu1 %v7417_v61 }
 0x6ab   : > { %5628 = vmatpush3.xpose.msk.msra.mxu0 %vm316_vm0, %v7427_v38 }
 0x6ac   : > { %v2922_v5 = vrot.slane %v2921_v57, 1  ;;  %5643 = vmatprep.subr.mxu0 %v7417_v61 }
 0x6ad   : > { %5639 = vmatpush3.xpose.msk.msra.mxu1 %vm316_vm0, %v7428_v8 }
 0x6ae   : > { %5630 = vmatmul.mubr.msk.f32.vlgmr.msra.gmra.mxu0 %vm316_vm0, %v4002_v33  ;;  %5654 = vmatprep.subr.mxu1 %v7417_v61  ;;  %v2923_v43 = vadd.f32 %v2922_v5, %v2921_v57 }
 0x6af   : > { %5644 = vmatpush3.xpose.msk.msra.mxu0 %vm316_vm0, %v7429_v45  ;;  %5651 = vmatprep.mubr.msk.f32.mxu0 %vm5973_vm1, %v7417_v61 }
 0x6b0   : > { %5641 = vmatmul.mubr.msk.f32.vlgmr.msra.gmra.mxu1 %vm316_vm0, %v4009_v16  ;;  %5645 = vmatprep.subr.mxu0 %v7417_v61  ;;  %v2925_v46 = vmul.f32 0.25, %v2923_v43 }
 0x6b1   : > { %5655 = vmatpush3.xpose.msk.msra.mxu1 %vm316_vm0, %v7430_v50  ;;  %5662 = vmatprep.mubr.msk.f32.mxu1 %vm5973_vm1, %v7417_v61 }
 0x6b2   : > { %5656 = vmatprep.subr.mxu1 %v7417_v61  ;;  %v7248_v47 = vsub.f32 %v2898_v41, %v2925_v46  ;;  %v7433_v41 = vld [vmem:[#allocation28_spill] sm:$0xff] }
 0x6b3   : > { %5646 = vmatpush3.xpose.msk.msra.mxu0 %vm316_vm0, %v7431_v51 }
 0x6b4   : > { %v3156_v53 = vpop.xlane.xlu1 %3155  ;;  %5647 = vmatprep.subr.mxu0 %v7417_v61  ;;  %v2929_v60 = vmul.f32 %v7248_v47, %v7248_v47 }
 0x6b5   : > { %v3160_v0 = vmul.f32 0.020408163, %v3156_v53  ;;  %5657 = vmatpush3.xpose.msk.msra.mxu1 %vm316_vm0, %v7432_v54 }
 0x6b6   : > { %5658 = vmatprep.subr.mxu1 %v7417_v61  ;;  %v2933_v55 = vsel %vm2901_vm2, %v2929_v60, 0.0 }
 0x6b7   : > { %v3162_v25 = vsel %vm1310_vm14, %v3160_v0, 0.0  ;;  %5648 = vmatpush3.xpose.msk.msra.mxu0 %vm316_vm0, %v7433_v41  ;;  %2934 = vadd.xlane.f32.xlu1 %v2933_v55 }
 0x6b8   : > { %v3163_v2 = vrot.slane %v3162_v25, 4  ;;  %5649 = vmatprep.subr.mxu0 %v7417_v61 }
 0x6b9   : > { %5659 = vmatpush3.xpose.msk.msra.mxu1 %vm316_vm0, %v7434_v58 }
 0x6ba   : > { %v3164_v10 = vadd.f32 %v3163_v2, %v3162_v25  ;;  %5660 = vmatprep.subr.mxu1 %v7417_v61 }
 0x6bb   : > { %5650 = vmatpush3.xpose.msk.msra.mxu0 %vm316_vm0, %v7435_v59 }
 0x6bc   : > { %v3165_v18 = vrot.slane %v3164_v10, 2 }
 0x6bd   : > { %5661 = vmatpush3.xpose.msk.msra.mxu1 %vm316_vm0, %v7436_v22 }
 0x6be   : > { %v3166_v14 = vadd.f32 %v3165_v18, %v3164_v10  ;;  %5652 = vmatmul.mubr.msk.f32.vlgmr.msra.gmra.mxu0 %vm316_vm0, %v4010_v21 }
 0x6c0   : > { %v3167_v24 = vrot.slane %v3166_v14, 1  ;;  %5663 = vmatmul.mubr.msk.f32.vlgmr.msra.gmra.mxu1 %vm316_vm0, %v4011_v6  ;;  %vm4811_vm0 = vcmask 519424  }
 0x6c2   : > { %v3168_v26 = vadd.f32 %v3167_v24, %v3166_v14 }
 0x6c4   : > { %v3176_v28 = vmul.f32 0.25, %v3168_v26 }
 0x6c6   : > { %v7274_v61 = vsub.f32 %v3150_v4, %v3176_v28 }
 0x6c7   : > { %v3159_v1 = vpop.xlane.xlu1 %3158 }
 0x6c8   : > { %v3161_v31 = vmul.f32 0.020408163, %v3159_v1  ;;  %v3180_v20 = vmul.f32 %v7274_v61, %v7274_v61 }
 0x6ca   : > { %v3169_v17 = vsel %vm1310_vm14, %v3161_v31, 0.0  ;;  %v3182_v35 = vsel %vm2901_vm2, %v3180_v20, 0.0 }
 0x6cb   : > { %v3170_v37 = vrot.slane %v3169_v17, 4  ;;  %3183 = vadd.xlane.f32.xlu1 %v3182_v35 }
 0x6cd   : > { %v3171_v40 = vadd.f32 %v3170_v37, %v3169_v17 }
 0x6cf   : > { %v3172_v42 = vrot.slane %v3171_v40, 2 }
 0x6d1   : > { %v3173_v9 = vadd.f32 %v3172_v42, %v3171_v40 }
 0x6d3   : > { %v3174_v44 = vrot.slane %v3173_v9, 1 }
 0x6d5   : > { %v3175_v48 = vadd.f32 %v3174_v44, %v3173_v9 }
 0x6d7   : > { %v3177_v49 = vmul.f32 0.25, %v3175_v48 }
 0x6d9   : > { %v7282_v30 = vsub.f32 %v3151_v3, %v3177_v49 }
 0x6db   : > { %v3181_v4 = vmul.f32 %v7282_v30, %v7282_v30 }
 0x6dd   : > { %v3185_v11 = vsel %vm2901_vm2, %v3181_v4, 0.0 }
 0x6de   : > { %3186 = vadd.xlane.f32.xlu1 %v3185_v11 }
 0x70e   : > { %v3360_v15 = vpop.f32.mrf.mxu0 }
 0x70f   : > { %v3952_v12 = vmul.f32 0.020408163, %v3360_v15 }
 0x710   : > { %v5499_v27 = vpop.f32.mrf.mxu0  ;;  %v3444_v32 = vpop.f32.mrf.mxu1 }
 0x711   : > { %v3953_v52 = vmul.f32 0.020408163, %v3444_v32 }
 0x712   : > { %v5510_v63 = vpop.f32.mrf.mxu1 }
 0x713   : > { %v4736_v29 = vrot.slane %v3953_v52, 7 }
 0x715   : > { %v4737_v13 = vsel %vm774_vm5, %v4736_v29, %v3952_v12 }
 0x716   : > { %v4738_v19 = vsel %vm782_vm9, %v4736_v29, %v4737_v13  ;;  %v2899_v29 = vld [vmem:[#allocation6 + $0xc8] sm:$0xf] }
 0x71e   : > { %v3528_v23 = vpop.f32.mrf.mxu0 }
 0x71f   : > { %v3954_v3 = vmul.f32 0.020408163, %v3528_v23 }
 0x720   : > { %v3612_v57 = vpop.f32.mrf.mxu1  ;;  %v5521_v62 = vpop.f32.mrf.mxu0 }
 0x721   : > { %v4739_v38 = vrot.slane %v3954_v3, 6  ;;  %v3955_v5 = vmul.f32 0.020408163, %v3612_v57  ;;  %v4710_v3 = vsub.f32 1.0, %v6991_v56  ;;  %v2900_v57 = vld [vmem:[#allocation6 + $0xd0] sm:$0xf] }
 0x722   : > { %v5532_v33 = vpop.f32.mrf.mxu1 }
 0x723   : > { %v4740_v8 = vsel %vm776_vm6, %v4739_v38, %v4738_v19  ;;  %v4742_v16 = vrot.slane %v3955_v5, 5 }
 0x724   : > { %v4741_v43 = vsel %vm784_vm10, %v4739_v38, %v4740_v8 }
 0x725   : > { %v4743_v45 = vsel %vm778_vm7, %v4742_v16, %v4741_v43 }
 0x726   : > { %v7293_v46 = vsel %vm786_vm11, %v4742_v16, %v4743_v45 }
 0x72c   : > { %v2932_v50 = vpop.xlane.xlu1 %2931 }
 0x72d   : > { %v2936_v51 = vmul.f32 0.020408163, %v2932_v50  ;;  %v4714_v50 = vrot.slane %v4710_v3, 4 }
 0x72e   : > { %v3696_v53 = vpop.f32.mrf.mxu0 }
 0x72f   : > { %v2938_v60 = vsel %vm1310_vm14, %v2936_v51, 0.0  ;;  %v3956_v25 = vmul.f32 0.020408163, %v3696_v53 }
 0x730   : > { %v2939_v0 = vrot.slane %v2938_v60, 4  ;;  %v5543_v54 = vpop.f32.mrf.mxu0  ;;  %v3780_v55 = vpop.f32.mrf.mxu1 }
 0x731   : > { %v3957_v41 = vmul.f32 0.020408163, %v3780_v55 }
 0x732   : > { %v2940_v2 = vadd.f32 %v2939_v0, %v2938_v60  ;;  %v5554_v58 = vpop.f32.mrf.mxu1 }
 0x733   : > { %v4745_v10 = vrot.slane %v3957_v41, 7 }
 0x734   : > { %v2941_v59 = vrot.slane %v2940_v2, 2 }
 0x735   : > { %v4746_v18 = vsel %vm774_vm5, %v4745_v10, %v3956_v25 }
 0x736   : > { %v2942_v21 = vadd.f32 %v2941_v59, %v2940_v2  ;;  %v4747_v22 = vsel %vm782_vm9, %v4745_v10, %v4746_v18 }
 0x738   : > { %v2943_v14 = vrot.slane %v2942_v21, 1 }
 0x73a   : > { %v2944_v6 = vadd.f32 %v2943_v14, %v2942_v21 }
 0x73c   : > { %v2952_v24 = vmul.f32 0.25, %v2944_v6 }
 0x73e   : > { %v2954_v26 = vadd.f32 1e-05, %v2952_v24  ;;  %v3864_v28 = vpop.f32.mrf.mxu0 }
 0x73f   : > { %v3958_v1 = vmul.f32 0.020408163, %v3864_v28 }
 0x740   : > { %5769 = vrsqrt.f32 %v2954_v26  ;;  %v3948_v31 = vpop.f32.mrf.mxu1  ;;  %v2935_v20 = vpop.xlane.xlu1 %2934 }
 0x741   : > { %v4748_v17 = vrot.slane %v3958_v1, 6  ;;  %v3959_v35 = vmul.f32 0.020408163, %v3948_v31  ;;  %v2937_v37 = vmul.f32 0.020408163, %v2935_v20  ;;  %v5565_v40 = vpop.f32.mrf.mxu0  ;;  %v4711_v20 = vsub.f32 1.0, %v7003_v7 }
 0x742   : > { %v5576_v42 = vpop.f32.mrf.mxu1 }
 0x743   : > { %v4749_v9 = vsel %vm776_vm6, %v4748_v17, %v4747_v22  ;;  %v4751_v44 = vrot.slane %v3959_v35, 5  ;;  %v2945_v48 = vsel %vm1310_vm14, %v2937_v37, 0.0 }
 0x744   : > { %v4750_v49 = vsel %vm784_vm10, %v4748_v17, %v4749_v9  ;;  %v2946_v4 = vrot.slane %v2945_v48, 4 }
 0x745   : > { %v4752_v11 = vsel %vm778_vm7, %v4751_v44, %v4750_v49  ;;  %v4715_v49 = vrot.slane %v4711_v20, 4 }
 0x746   : > { %v2947_v15 = vadd.f32 %v2946_v4, %v2945_v48  ;;  %v7303_v27 = vsel %vm786_vm11, %v4751_v44, %v4752_v11 }
 0x748   : > { %v2948_v32 = vrot.slane %v2947_v15, 2 }
 0x74a   : > { %v2949_v12 = vadd.f32 %v2948_v32, %v2947_v15 }
 0x74c   : > { %v2950_v52 = vrot.slane %v2949_v12, 1 }
 0x74d   : > { %v5770_v63 = vpop.eup %5769 }
 0x74e   : > { %v2951_v13 = vadd.f32 %v2950_v52, %v2949_v12  ;;  %v4092_v19 = vpop.f32.mrf.mxu0  ;;  %v2958_v23 = vmul.f32 %v5770_v63, %v7194_v39 }
 0x74f   : > { %v4684_v51 = vmul.f32 0.020408163, %v4092_v19 }
 0x750   : > { %v2953_v62 = vmul.f32 0.25, %v2951_v13  ;;  %v5587_v38 = vpop.f32.mrf.mxu0  ;;  %v4176_v5 = vpop.f32.mrf.mxu1  ;;  %v2960_v33 = vmul.f32 %v2958_v23, %v2899_v29 }
 0x751   : > { %v4685_v8 = vmul.f32 0.020408163, %v4176_v5 }
 0x752   : > { %v2955_v16 = vadd.f32 1e-05, %v2953_v62  ;;  %v5598_v43 = vpop.f32.mrf.mxu1  ;;  %v2962_v45 = vadd.f32 %v2960_v33, %v2900_v57 }
 0x753   : > { %v4768_v53 = vrot.slane %v4685_v8, 7  ;;  %v3152_v43 = vld [vmem:[#allocation6 + $0xe8] sm:$0xf] }
 0x754   : > { %5771 = vrsqrt.f32 %v2955_v16  ;;  %v3184_v60 = vpop.xlane.xlu1 %3183  ;;  %v4718_v0 = vmul.f32 %v4714_v50, %v2962_v45 }
 0x755   : > { %v4769_v54 = vsel %vm774_vm5, %v4768_v53, %v4684_v51  ;;  %v3188_v39 = vmul.f32 0.020408163, %v3184_v60  ;;  %v4692_v51 = vsub.f32 1.0, %v7015_v36  ;;  %v3153_v60 = vld [vmem:[#allocation6 + $0xf0] sm:$0xf] }
 0x756   : > { %v4770_v56 = vsel %vm782_vm9, %v4768_v53, %v4769_v54  ;;  %v4720_v55 = vsel %vm2901_vm2, %v4718_v0, 0.0 }
 0x757   : > { %v3190_v25 = vsel %vm1310_vm14, %v3188_v39, 0.0  ;;  %4721 = vadd.xlane.f32.xlu0 %v4720_v55 }
 0x758   : > { %v3191_v41 = vrot.slane %v3190_v25, 4 }
 0x75a   : > { %v3192_v2 = vadd.f32 %v3191_v41, %v3190_v25 }
 0x75c   : > { %v3193_v58 = vrot.slane %v3192_v2, 2 }
 0x75e   : > { %v3194_v10 = vadd.f32 %v3193_v58, %v3192_v2  ;;  %v4260_v59 = vpop.f32.mrf.mxu0 }
 0x75f   : > { %v4686_v18 = vmul.f32 0.020408163, %v4260_v59 }
 0x760   : > { %v3195_v21 = vrot.slane %v3194_v10, 1  ;;  %v5609_v22 = vpop.f32.mrf.mxu0  ;;  %v4344_v14 = vpop.f32.mrf.mxu1 }
 0x761   : > { %v5772_v6 = vpop.eup %5771  ;;  %v4771_v24 = vrot.slane %v4686_v18, 6  ;;  %v4687_v26 = vmul.f32 0.020408163, %v4344_v14 }
 0x762   : > { %v3196_v28 = vadd.f32 %v3195_v21, %v3194_v10  ;;  %v5620_v1 = vpop.f32.mrf.mxu1  ;;  %v2959_v31 = vmul.f32 %v5772_v6, %v7248_v47 }
 0x763   : > { %v4772_v17 = vsel %vm776_vm6, %v4771_v24, %v4770_v56  ;;  %v4774_v35 = vrot.slane %v4687_v26, 5  ;;  %v4696_v56 = vrot.slane %v4692_v51, 4 }
 0x764   : > { %v3204_v37 = vmul.f32 0.25, %v3196_v28  ;;  %v4773_v40 = vsel %vm784_vm10, %v4771_v24, %v4772_v17  ;;  %v2961_v42 = vmul.f32 %v2959_v31, %v2899_v29  ;;  %v4693_v28 = vsub.f32 1.0, %v7048_v34 }
 0x765   : > { %v4775_v9 = vsel %vm778_vm7, %v4774_v35, %v4773_v40 }
 0x766   : > { %v3206_v44 = vadd.f32 1e-05, %v3204_v37  ;;  %v2963_v48 = vadd.f32 %v2961_v42, %v2900_v57  ;;  %v4776_v4 = vsel %vm786_vm11, %v4774_v35, %v4775_v9  ;;  %v4697_v20 = vrot.slane %v4693_v28, 4  ;;  %v7437_v42 = vld [vmem:[#allocation12_spill] sm:$0xff] }
 0x767   : > { %v3187_v11 = vpop.xlane.xlu1 %3186  ;;  %v4788_v9 = vmul.f32 %v7437_v42, %v4776_v4 }
 0x768   : > { %5773 = vrsqrt.f32 %v3206_v44  ;;  %v3189_v15 = vmul.f32 0.020408163, %v3187_v11  ;;  %v4719_v47 = vmul.f32 %v4715_v49, %v2963_v48  ;;  %v7438_v49 = vld [vmem:[#allocation15_spill] sm:$0xff] }
 0x76a   : > { %v3197_v7 = vsel %vm1310_vm14, %v3189_v15, 0.0  ;;  %v4723_v32 = vsel %vm2901_vm2, %v4719_v47, 0.0 }
 0x76b   : > { %v3198_v12 = vrot.slane %v3197_v7, 4  ;;  %4724 = vadd.xlane.f32.xlu1 %v4723_v32 }
 0x76d   : > { %v3199_v52 = vadd.f32 %v3198_v12, %v3197_v7  ;;  %v7439_v7 = vld [vmem:[#allocation10_spill] sm:$0xff] }
 0x76e   : > { %v4428_v63 = vpop.f32.mrf.mxu0  ;;  %v4756_v32 = vmul.f32 %v7439_v7, %v7293_v46 }
 0x76f   : > { %v3200_v29 = vrot.slane %v3199_v52, 2  ;;  %v4688_v38 = vmul.f32 0.020408163, %v4428_v63  ;;  %v7440_v63 = vld [vmem:[#allocation11_spill] sm:$0xff] }
 0x770   : > { %v5631_v13 = vpop.f32.mrf.mxu0  ;;  %v4512_v19 = vpop.f32.mrf.mxu1 }
 0x771   : > { %v3201_v23 = vadd.f32 %v3200_v29, %v3199_v52  ;;  %v4689_v3 = vmul.f32 0.020408163, %v4512_v19  ;;  %v4757_v29 = vmul.f32 %v7440_v63, %v7303_v27 }
 0x772   : > { %v5642_v57 = vpop.f32.mrf.mxu1 }
 0x773   : > { %v3202_v62 = vrot.slane %v3201_v23, 1  ;;  %v4777_v5 = vrot.slane %v4689_v3, 7 }
 0x775   : > { %v5774_v33 = vpop.eup %5773  ;;  %v3203_v8 = vadd.f32 %v3202_v62, %v3201_v23  ;;  %v4778_v16 = vsel %vm774_vm5, %v4777_v5, %v4688_v38 }
 0x776   : > { %v4779_v45 = vsel %vm782_vm9, %v4777_v5, %v4778_v16  ;;  %v3210_v50 = vmul.f32 %v5774_v33, %v7274_v61 }
 0x777   : > { %v3205_v53 = vmul.f32 0.25, %v3203_v8 }
 0x778   : > { %v3212_v0 = vmul.f32 %v3210_v50, %v3152_v43 }
 0x779   : > { %v3207_v54 = vadd.f32 1e-05, %v3205_v53 }
 0x77a   : > { %v3214_v39 = vadd.f32 %v3212_v0, %v3153_v60 }
 0x77b   : > { %5775 = vrsqrt.f32 %v3207_v54 }
 0x77c   : > { %v4700_v55 = vmul.f32 %v4696_v56, %v3214_v39 }
 0x77e   : > { %v4596_v25 = vpop.f32.mrf.mxu0  ;;  %v4702_v41 = vsel %vm2901_vm2, %v4700_v55, 0.0 }
 0x77f   : > { %v4690_v2 = vmul.f32 0.020408163, %v4596_v25  ;;  %4703 = vadd.xlane.f32.xlu0 %v4702_v41 }
 0x780   : > { %v5653_v58 = vpop.f32.mrf.mxu0  ;;  %v4680_v10 = vpop.f32.mrf.mxu1 }
 0x781   : > { %v4780_v59 = vrot.slane %v4690_v2, 6  ;;  %v4691_v18 = vmul.f32 0.020408163, %v4680_v10 }
 0x782   : > { %v5664_v61 = vpop.f32.mrf.mxu1 }
 0x783   : > { %v4781_v36 = vsel %vm776_vm6, %v4780_v59, %v4779_v45  ;;  %v4783_v21 = vrot.slane %v4691_v18, 5 }
 0x784   : > { %v4782_v22 = vsel %vm784_vm10, %v4780_v59, %v4781_v36 }
 0x785   : > { %v4784_v14 = vsel %vm778_vm7, %v4783_v21, %v4782_v22 }
 0x786   : > { %v4785_v6 = vsel %vm786_vm11, %v4783_v21, %v4784_v14 }
 0x787   : > { %v4789_v34 = vmul.f32 %v7438_v49, %v4785_v6 }
 0x788   : > { %v5776_v24 = vpop.eup %5775 }
 0x789   : > { %v3211_v26 = vmul.f32 %v5776_v24, %v7282_v30 }
 0x78b   : > { %v3213_v1 = vmul.f32 %v3211_v26, %v3152_v43 }
 0x78d   : > { %v3215_v31 = vadd.f32 %v3213_v1, %v3153_v60 }
 0x78f   : > { %v4701_v17 = vmul.f32 %v4697_v20, %v3215_v31 }
 0x791   : > { %v4705_v35 = vsel %vm2901_vm2, %v4701_v17, 0.0 }
 0x792   : > { %4706 = vadd.xlane.f32.xlu1 %v4705_v35 }
 0x7e0   : > { %v4722_v37 = vpop.xlane.xlu0 %4721 }
 0x7e1   : > { %v4726_v40 = vmul.f32 0.020408163, %v4722_v37 }
 0x7e3   : > { %v4790_v44 = vadd.f32 %v4788_v9, %v4726_v40 }
 0x7e5   : > { %4805 = vrot.lane.b32.xlu0 %v4790_v44, %s5976_s16 }
 0x7f4   : > { %v4725_v48 = vpop.xlane.xlu1 %4724 }
 0x7f5   : > { %v4727_v30 = vmul.f32 0.020408163, %v4725_v48 }
 0x7f7   : > { %v4791_v11 = vadd.f32 %v4789_v34, %v4727_v30 }
 0x7f9   : > { %4807 = vrot.lane.b32.xlu1 %v4791_v11, %s5976_s16 }
 0x808   : > { %v4704_v15 = vpop.xlane.xlu0 %4703 }
 0x809   : > { %v4708_v47 = vmul.f32 0.020408163, %v4704_v15 }
 0x80b   : > { %v4758_v12 = vadd.f32 %v4756_v32, %v4708_v47 }
 0x80d   : > { %4801 = vst.msk [vmem:[%s6967_s24 + $0x8] sm:$0xf] %vm1300_vm13, %v4758_v12 }
 0x81b   : > { %v4707_v4 = vpop.xlane.xlu1 %4706 }
 0x81c   : > { %v4709_v52 = vmul.f32 0.020408163, %v4707_v4 }
 0x81e   : > { %v4759_v13 = vadd.f32 %v4757_v29, %v4709_v52 }
 0x820   : > { %4802 = vst.msk [vmem:[%s6967_s24 + $0x18] sm:$0xf] %vm1300_vm13, %v4759_v13 }
 0x857   : > { %v4806_v19 = vpop.permute.xlu0 %4805 }
 0x858   : > { %4812 = vst.msk [vmem:[%s6967_s24 + $0x8] sm:$0xf] %vm4811_vm0, %v4806_v19 }
 0x86b   : > { %v4808_v23 = vpop.permute.xlu1 %4807 }
 0x86c   : > { %4813 = vst.msk [vmem:[%s6967_s24 + $0x18] sm:$0xf] %vm4811_vm0, %v4808_v23 }
 0x86d PF: > { %p16_p6 = scmp.ge.s32.totalorder %s6041_s22, 4   ;;  %s7441_s12 = smov %s5957_s13 }
 0x86e   : > { %s7442_s13 = smov %s5961_s14  ;;  %s7443_s14 = smov %s6061_s30 }
 0x86f   : > { %s7444_s15 = smov %s6041_s22  ;;  %18 = sbr.rel (!%p16_p6) target bundleno = 5 (0x5), region = 89 }
 0x874   :  { %4838 = vsyncpa [#allocation3], 1 }
 0x875   :  { %4840 = vsyncpa [#allocation3 + $0x1], 1 }
 0x876   :  { %4841 = vsyncpa [#allocation5], 1 }
 0x877   :  { %4843 = vsyncpa [#allocation5 + $0x1], 1 }

</bundles_post_ra>
